<compile_context>
chip_gen: v5e
topology: v5e:2x2
jax: 0.10.0
libtpu: 0.0.40
codegen_flags: <defaults>
</compile_context>

<pallas_src>
import functools
import math

import jax
import jax.numpy as jnp
from jax.experimental import pallas as pl
from jax.experimental.pallas import tpu as pltpu

W_IN = 88          # input width (time axis)
C_IN = 8           # input channels
N_FREQ = 45        # FFT real-part bins kept
BN_EPS = 1e-5

VMEM_SPEC = pl.BlockSpec(memory_space=pltpu.MemorySpace.VMEM)


def _round8(n):
    return ((n + 7) // 8) * 8


def _layer(name, src, dst, K, stride, pool, cin, cout, win, kind):
    wout = (win - K) // stride + 1
    # pooling-as-strided-max assumes full pooling windows (review concern #1)
    assert wout % pool == 0, f"{name}: Wout={wout} not divisible by pool={pool}"
    return dict(name=name, src=src, dst=dst, K=K, stride=stride, pool=pool,
                cin=cin, cout=cout, win=win, wout=wout, wpool=wout // pool,
                kind=kind)


# Op order follows the PyTorch ModuleDicts exactly.
#   relu_bn : conv -> ReLU -> BatchNorm (+pool)  -> BN kept as post-act affine
#   bn_tanh : conv -> BatchNorm -> Tanh (+pool)  -> BN folded into conv w/b
CONV_LAYERS = (
    _layer("conv1",  "x",  "a1", 5, 1, 2,  8, 20, W_IN,   "relu_bn"),
    _layer("conv2",  "a1", "a2", 3, 1, 2, 20, 40, 42,     "bn_tanh"),
    _layer("conv3",  "a2", "a3", 3, 1, 3, 40, 60, 20,     "relu_bn"),
    _layer("conv4",  "a3", "a4", 3, 3, 1, 60, 80, 6,      "bn_tanh"),
    _layer("fconv1", "f0", "f1", 5, 2, 1,  8, 16, N_FREQ, "relu_bn"),
    _layer("fconv2", "f1", "f2", 3, 2, 2, 16, 16, 21,     "bn_tanh"),
)

# activation buffers: (logical_width, slab_width (8-aligned), channels)
ACTS = {"f0": (N_FREQ, _round8(N_FREQ), C_IN)}
for _cfg in CONV_LAYERS:
    ACTS[_cfg["dst"]] = (_cfg["wpool"], _round8(_cfg["wpool"]), _cfg["cout"])
ACT_ORDER = ("f0", "a1", "a2", "a3", "a4", "f1", "f2")
POOLED = tuple(c["name"] for c in CONV_LAYERS if c["pool"] > 1)

for _cfg in CONV_LAYERS:   # static shape-consistency check
    _src_w = W_IN if _cfg["src"] == "x" else ACTS[_cfg["src"]][0]
    assert _cfg["win"] == _src_w, _cfg["name"]

W_A4, SLAB_A4, C_A4 = ACTS["a4"]          # main branch features: (2, 80)
W_F2, SLAB_F2, C_F2 = ACTS["f2"]          # fft branch features:  (5, 16)
NUM_FEAT = W_A4 * C_A4 + W_F2 * C_F2
assert NUM_FEAT == 240


def _rows(start, size, stride=1):
    return pl.ds(start, size) if stride == 1 else pl.ds(start, size, stride=stride)


# ----------------------------------------------------------------------------
# Fully fused kernel (DFT + 6 conv blocks + head), everything VMEM-resident.
# ----------------------------------------------------------------------------
def _fused_kernel(*refs, batch):
    it = iter(refs)
    x_ref = next(it)            # (batch*88, 8)  channels-last input rows
    cos_ref = next(it)          # (45, 88)       cos(2*pi*k*w/88)
    conv_p = {}
    for cfg in CONV_LAYERS:
        n_args = 4 if cfg["kind"] == "relu_bn" else 2
        conv_p[cfg["name"]] = tuple(next(it) for _ in range(n_args))
    whm_ref = next(it)          # (160, nc)  head weights, main branch (w,c rows)
    whf_ref = next(it)          # (80, nc)   head weights, fft branch (w,c rows)
    hb_ref = next(it)           # (1, nc)
    out_ref = next(it)          # (batch, nc)
    acts = {name: next(it) for name in ACT_ORDER}
    prepool = {name: next(it) for name in POOLED}

    f32 = jnp.float32

    # ---- FFT branch input: Re(FFT_88(x))[..., :45], channels-last rows ------
    cos_m = cos_ref[...]
    sw_f0 = ACTS["f0"][1]
    for n in range(batch):
        xw = x_ref[_rows(n * W_IN, W_IN), :]                          # (88, 8)
        acts["f0"][_rows(n * sw_f0, N_FREQ), :] = jnp.dot(
            cos_m, xw, preferred_element_type=f32)

    # ---- conv blocks: in-kernel im2col via K-tap accumulation ----------------
    for cfg in CONV_LAYERS:
        K, s, pool = cfg["K"], cfg["stride"], cfg["pool"]
        cin = cfg["cin"]
        wout, wpool = cfg["wout"], cfg["wpool"]
        src = x_ref if cfg["src"] == "x" else acts[cfg["src"]]
        sw_src = W_IN if cfg["src"] == "x" else ACTS[cfg["src"]][1]
        dst = acts[cfg["dst"]]
        sw_dst = ACTS[cfg["dst"]][1]

        p = conv_p[cfg["name"]]
        w_taps = [p[0][_rows(k * cin, cin), :] for k in range(K)]     # (cin, cout)
        bias = p[1][...]

        for n in range(batch):
            base = n * sw_src
            y = jnp.dot(src[_rows(base, wout, s), :], w_taps[0],
                        preferred_element_type=f32)
            for k in range(1, K):
                y = y + jnp.dot(src[_rows(base + k, wout, s), :], w_taps[k],
                                preferred_element_type=f32)
            y = y + bias

            if cfg["kind"] == "relu_bn":        # conv -> ReLU -> BatchNorm
                y = jnp.maximum(y, 0.0)
                y = y * p[2][...] + p[3][...]
            else:                               # conv(+BN folded) -> Tanh
                y = jnp.tanh(y)

            if pool == 1:
                dst[_rows(n * sw_dst, wout), :] = y
            else:                               # MaxPool([1, pool])
                pp = prepool[cfg["name"]]
                pp[...] = y
                pooled = pp[_rows(0, wpool, pool), :]
                for i in range(1, pool):
                    pooled = jnp.maximum(pooled, pp[_rows(i, wpool, pool), :])
                dst[_rows(n * sw_dst, wpool), :] = pooled

    # ---- head: cat(flatten) -> Dropout(identity) -> Linear -> softmax --------
    a4, f2 = acts["a4"], acts["f2"]
    logits = jnp.dot(a4[_rows(0, batch, SLAB_A4), :], whm_ref[_rows(0, C_A4), :],
                     preferred_element_type=f32)
    for w in range(1, W_A4):
        logits = logits + jnp.dot(a4[_rows(w, batch, SLAB_A4), :],
                                  whm_ref[_rows(w * C_A4, C_A4), :],
                                  preferred_element_type=f32)
    for w in range(W_F2):
        logits = logits + jnp.dot(f2[_rows(w, batch, SLAB_F2), :],
                                  whf_ref[_rows(w * C_F2, C_F2), :],
                                  preferred_element_type=f32)
    logits = logits + hb_ref[...]
    logits = logits - jnp.max(logits, axis=-1, keepdims=True)
    e = jnp.exp(logits)
    out_ref[...] = e * pl.reciprocal(jnp.sum(e, axis=-1, keepdims=True), approx=True)


# ----------------------------------------------------------------------------
# Wrapper (boundary layout glue only) + single pallas_call
# ----------------------------------------------------------------------------
def convnets_fft_forward(x_nchw, kparams, *, num_class):
    batch = x_nchw.shape[0]
    # NCHW (N, 8, 1, 88) -> channels-last rows (N*88, 8); boundary glue.
    x_rows = jnp.transpose(x_nchw[:, :, 0, :], (0, 2, 1)).reshape(batch * W_IN, C_IN)

    args = [x_rows, kparams["cos_t"]]
    for cfg in CONV_LAYERS:
        lp = kparams[cfg["name"]]
        args += [lp["w"], lp["b"]]
        if cfg["kind"] == "relu_bn":
            args += [lp["scale"], lp["shift"]]
    args += [kparams["whm"], kparams["whf"], kparams["hb"]]

    scratch = [pltpu.VMEM((batch * ACTS[a][1], ACTS[a][2]), jnp.float32)
               for a in ACT_ORDER]
    scratch += [pltpu.VMEM((cfg["wout"], cfg["cout"]), jnp.float32)
                for cfg in CONV_LAYERS if cfg["pool"] > 1]

    return pl.pallas_call(
        functools.partial(_fused_kernel, batch=batch),
        out_shape=jax.ShapeDtypeStruct((batch, num_class), jnp.float32),
        in_specs=[VMEM_SPEC] * len(args),
        out_specs=VMEM_SPEC,
        scratch_shapes=scratch,
    )(*args)


# ----------------------------------------------------------------------------
# Parameter init (mirrors PyTorch init_weight + BatchNorm defaults) & BN fold
# ----------------------------------------------------------------------------
def init_params(key, num_class):
    gain = {"relu_bn": math.sqrt(2.0), "bn_tanh": 5.0 / 3.0}
    keys = jax.random.split(key, len(CONV_LAYERS) + 1)

    params = {}
    for cfg, k in zip(CONV_LAYERS, keys[:-1]):
        fan_in = cfg["cin"] * cfg["K"]
        bound = gain[cfg["kind"]] * math.sqrt(3.0 / fan_in)
        cout = cfg["cout"]
        params[cfg["name"]] = dict(
            # rows = (tap k, input channel), cols = output channel
            w=jax.random.uniform(k, (cfg["K"] * cfg["cin"], cout),
                                 jnp.float32, -bound, bound),
            b=jnp.zeros((1, cout), jnp.float32),          # init_weight zeros bias
            gamma=jnp.ones((1, cout), jnp.float32),       # BatchNorm defaults
            beta=jnp.zeros((1, cout), jnp.float32),
            mean=jnp.zeros((1, cout), jnp.float32),
            var=jnp.ones((1, cout), jnp.float32),
        )

    bound = math.sqrt(2.0) * math.sqrt(3.0 / NUM_FEAT)
    params["linear_w"] = jax.random.uniform(keys[-1], (NUM_FEAT, num_class),
                                            jnp.float32, -bound, bound)
    params["linear_b"] = jnp.zeros((1, num_class), jnp.float32)
    return params


def prepare_kernel_params(params):
    """Fold inference BatchNorm and permute the linear weight to kernel layout."""
    kp = {}
    for cfg in CONV_LAYERS:
        p = params[cfg["name"]]
        scale = p["gamma"] * jax.lax.rsqrt(p["var"] + BN_EPS)
        shift = p["beta"] - p["mean"] * scale
        if cfg["kind"] == "bn_tanh":
            # conv -> BN -> tanh : BN folds exactly into the conv weight/bias.
            kp[cfg["name"]] = dict(w=p["w"] * scale, b=p["b"] * scale + shift)
        else:
            # conv -> relu -> BN : BN stays a post-activation affine.
            kp[cfg["name"]] = dict(w=p["w"], b=p["b"], scale=scale, shift=shift)

    wl = params["linear_w"]
    nc = wl.shape[1]
    # PyTorch flattens (N, C, 1, W) channel-major (feature index c*W + w);
    # kernel activations are (width, channel) rows -> permute rows to (w, c).
    wm = wl[: W_A4 * C_A4].reshape(C_A4, W_A4, nc).transpose(1, 0, 2)
    wf = wl[W_A4 * C_A4:].reshape(C_F2, W_F2, nc).transpose(1, 0, 2)
    kp["whm"] = wm.reshape(W_A4 * C_A4, nc)
    kp["whf"] = wf.reshape(W_F2 * C_F2, nc)
    kp["hb"] = params["linear_b"]

    # real-DFT cosine matrix: Re(FFT_88(x))[k] = sum_w cos(2*pi*k*w/88) x[w]
    k_i = jnp.arange(N_FREQ, dtype=jnp.float32)[:, None]
    w_i = jnp.arange(W_IN, dtype=jnp.float32)[None, :]
    kp["cos_t"] = jnp.cos(2.0 * jnp.pi * k_i * w_i / W_IN)
    return kp


if __name__ == "__main__":
    num_class = 6
    key = jax.random.PRNGKey(0)
    pkey, xkey = jax.random.split(key)

    params = init_params(pkey, num_class)
    kparams = prepare_kernel_params(params)

    # PyTorch NCHW input; W=88 is required by the 240-feature Linear layer.
    x = jax.random.normal(xkey, (2, C_IN, 1, W_IN), dtype=jnp.float32)

    fwd = jax.jit(functools.partial(convnets_fft_forward, num_class=num_class))
    out = fwd(x, kparams)
    jax.block_until_ready(out)

    assert out.shape == (2, num_class)
    assert bool(jnp.all(jnp.isfinite(out)))
    # softmax rows sum to 1 (pl.reciprocal(approx=True) leaves a tiny residual)
    assert bool(jnp.allclose(jnp.sum(out, axis=1), 1.0, atol=5e-3))
    print("KERNEL_OK")
</pallas_src>

<mosaic_0001>
module attributes {stable_mosaic.version = 11 : i64} {
  func.func @_fused_kernel(%arg0: memref<176x8xf32, #tpu.memory_space<vmem>>, %arg1: memref<45x88xf32, #tpu.memory_space<vmem>>, %arg2: memref<40x20xf32, #tpu.memory_space<vmem>>, %arg3: memref<1x20xf32, #tpu.memory_space<vmem>>, %arg4: memref<1x20xf32, #tpu.memory_space<vmem>>, %arg5: memref<1x20xf32, #tpu.memory_space<vmem>>, %arg6: memref<60x40xf32, #tpu.memory_space<vmem>>, %arg7: memref<1x40xf32, #tpu.memory_space<vmem>>, %arg8: memref<120x60xf32, #tpu.memory_space<vmem>>, %arg9: memref<1x60xf32, #tpu.memory_space<vmem>>, %arg10: memref<1x60xf32, #tpu.memory_space<vmem>>, %arg11: memref<1x60xf32, #tpu.memory_space<vmem>>, %arg12: memref<180x80xf32, #tpu.memory_space<vmem>>, %arg13: memref<1x80xf32, #tpu.memory_space<vmem>>, %arg14: memref<40x16xf32, #tpu.memory_space<vmem>>, %arg15: memref<1x16xf32, #tpu.memory_space<vmem>>, %arg16: memref<1x16xf32, #tpu.memory_space<vmem>>, %arg17: memref<1x16xf32, #tpu.memory_space<vmem>>, %arg18: memref<48x16xf32, #tpu.memory_space<vmem>>, %arg19: memref<1x16xf32, #tpu.memory_space<vmem>>, %arg20: memref<160x6xf32, #tpu.memory_space<vmem>>, %arg21: memref<80x6xf32, #tpu.memory_space<vmem>>, %arg22: memref<1x6xf32, #tpu.memory_space<vmem>>, %arg23: memref<2x6xf32, #tpu.memory_space<vmem>>, %arg24: memref<96x8xf32, #tpu.memory_space<vmem>>, %arg25: memref<96x20xf32, #tpu.memory_space<vmem>>, %arg26: memref<48x40xf32, #tpu.memory_space<vmem>>, %arg27: memref<16x60xf32, #tpu.memory_space<vmem>>, %arg28: memref<16x80xf32, #tpu.memory_space<vmem>>, %arg29: memref<48x16xf32, #tpu.memory_space<vmem>>, %arg30: memref<16x16xf32, #tpu.memory_space<vmem>>, %arg31: memref<84x20xf32, #tpu.memory_space<vmem>>, %arg32: memref<40x40xf32, #tpu.memory_space<vmem>>, %arg33: memref<18x60xf32, #tpu.memory_space<vmem>>, %arg34: memref<10x16xf32, #tpu.memory_space<vmem>>) attributes {dimension_semantics = [], scalar_prefetch = 0 : i64, scratch_operands = 11 : i64, tpu.core_type = #tpu.core_type<tc>} {
    %c0 = arith.constant 0 : index
    %c0_0 = arith.constant 0 : index
    %0 = vector.load %arg1[%c0, %c0_0] : memref<45x88xf32, #tpu.memory_space<vmem>>, vector<45x88xf32>
    %c0_1 = arith.constant 0 : index
    %c0_2 = arith.constant 0 : index
    %1 = vector.load %arg0[%c0_1, %c0_2] : memref<176x8xf32, #tpu.memory_space<vmem>>, vector<88x8xf32>
    %cst = arith.constant dense<0.000000e+00> : vector<45x8xf32>
    %2 = tpu.matmul %0, %1, %cst {dimension_numbers = #tpu.dot_dimension_numbers<[1], [0], [0], [1], [0, 0, 1, 1], [], []>} : vector<45x88xf32>, vector<88x8xf32>, vector<45x8xf32> -> vector<45x8xf32>
    %c0_3 = arith.constant 0 : index
    %c0_4 = arith.constant 0 : index
    %3 = vector.load %arg24[%c0_3, %c0_4] : memref<96x8xf32, #tpu.memory_space<vmem>>, vector<45x8xf32>
    tpu.vector_store %arg24[%c0_3, %c0_4], %2 {strides = array<i32>} : memref<96x8xf32, #tpu.memory_space<vmem>>, vector<45x8xf32>,
    %c88 = arith.constant 88 : index
    %c0_5 = arith.constant 0 : index
    %4 = vector.load %arg0[%c88, %c0_5] : memref<176x8xf32, #tpu.memory_space<vmem>>, vector<88x8xf32>
    %cst_6 = arith.constant dense<0.000000e+00> : vector<45x8xf32>
    %5 = tpu.matmul %0, %4, %cst_6 {dimension_numbers = #tpu.dot_dimension_numbers<[1], [0], [0], [1], [0, 0, 1, 1], [], []>} : vector<45x88xf32>, vector<88x8xf32>, vector<45x8xf32> -> vector<45x8xf32>
    %c48 = arith.constant 48 : index
    %c0_7 = arith.constant 0 : index
    %6 = vector.load %arg24[%c48, %c0_7] : memref<96x8xf32, #tpu.memory_space<vmem>>, vector<45x8xf32>
    tpu.vector_store %arg24[%c48, %c0_7], %5 {strides = array<i32>} : memref<96x8xf32, #tpu.memory_space<vmem>>, vector<45x8xf32>,
    %c0_8 = arith.constant 0 : index
    %c0_9 = arith.constant 0 : index
    %7 = vector.load %arg2[%c0_8, %c0_9] : memref<40x20xf32, #tpu.memory_space<vmem>>, vector<8x20xf32>
    %c8 = arith.constant 8 : index
    %c0_10 = arith.constant 0 : index
    %8 = vector.load %arg2[%c8, %c0_10] : memref<40x20xf32, #tpu.memory_space<vmem>>, vector<8x20xf32>
    %c16 = arith.constant 16 : index
    %c0_11 = arith.constant 0 : index
    %9 = vector.load %arg2[%c16, %c0_11] : memref<40x20xf32, #tpu.memory_space<vmem>>, vector<8x20xf32>
    %c24 = arith.constant 24 : index
    %c0_12 = arith.constant 0 : index
    %10 = vector.load %arg2[%c24, %c0_12] : memref<40x20xf32, #tpu.memory_space<vmem>>, vector<8x20xf32>
    %c32 = arith.constant 32 : index
    %c0_13 = arith.constant 0 : index
    %11 = vector.load %arg2[%c32, %c0_13] : memref<40x20xf32, #tpu.memory_space<vmem>>, vector<8x20xf32>
    %c0_14 = arith.constant 0 : index
    %c0_15 = arith.constant 0 : index
    %12 = vector.load %arg3[%c0_14, %c0_15] : memref<1x20xf32, #tpu.memory_space<vmem>>, vector<1x20xf32>
    %c0_16 = arith.constant 0 : index
    %c0_17 = arith.constant 0 : index
    %13 = vector.load %arg0[%c0_16, %c0_17] : memref<176x8xf32, #tpu.memory_space<vmem>>, vector<84x8xf32>
    %cst_18 = arith.constant dense<0.000000e+00> : vector<84x20xf32>
    %14 = tpu.matmul %13, %7, %cst_18 {dimension_numbers = #tpu.dot_dimension_numbers<[1], [0], [0], [1], [0, 0, 1, 1], [], []>} : vector<84x8xf32>, vector<8x20xf32>, vector<84x20xf32> -> vector<84x20xf32>
    %c1 = arith.constant 1 : index
    %c0_19 = arith.constant 0 : index
    %15 = vector.load %arg0[%c1, %c0_19] : memref<176x8xf32, #tpu.memory_space<vmem>>, vector<84x8xf32>
    %cst_20 = arith.constant dense<0.000000e+00> : vector<84x20xf32>
    %16 = tpu.matmul %15, %8, %cst_20 {dimension_numbers = #tpu.dot_dimension_numbers<[1], [0], [0], [1], [0, 0, 1, 1], [], []>} : vector<84x8xf32>, vector<8x20xf32>, vector<84x20xf32> -> vector<84x20xf32>
    %17 = arith.addf %14, %16 : vector<84x20xf32>
    %c2 = arith.constant 2 : index
    %c0_21 = arith.constant 0 : index
    %18 = vector.load %arg0[%c2, %c0_21] : memref<176x8xf32, #tpu.memory_space<vmem>>, vector<84x8xf32>
    %cst_22 = arith.constant dense<0.000000e+00> : vector<84x20xf32>
    %19 = tpu.matmul %18, %9, %cst_22 {dimension_numbers = #tpu.dot_dimension_numbers<[1], [0], [0], [1], [0, 0, 1, 1], [], []>} : vector<84x8xf32>, vector<8x20xf32>, vector<84x20xf32> -> vector<84x20xf32>
    %20 = arith.addf %17, %19 : vector<84x20xf32>
    %c3 = arith.constant 3 : index
    %c0_23 = arith.constant 0 : index
    %21 = vector.load %arg0[%c3, %c0_23] : memref<176x8xf32, #tpu.memory_space<vmem>>, vector<84x8xf32>
    %cst_24 = arith.constant dense<0.000000e+00> : vector<84x20xf32>
    %22 = tpu.matmul %21, %10, %cst_24 {dimension_numbers = #tpu.dot_dimension_numbers<[1], [0], [0], [1], [0, 0, 1, 1], [], []>} : vector<84x8xf32>, vector<8x20xf32>, vector<84x20xf32> -> vector<84x20xf32>
    %23 = arith.addf %20, %22 : vector<84x20xf32>
    %c4 = arith.constant 4 : index
    %c0_25 = arith.constant 0 : index
    %24 = vector.load %arg0[%c4, %c0_25] : memref<176x8xf32, #tpu.memory_space<vmem>>, vector<84x8xf32>
    %cst_26 = arith.constant dense<0.000000e+00> : vector<84x20xf32>
    %25 = tpu.matmul %24, %11, %cst_26 {dimension_numbers = #tpu.dot_dimension_numbers<[1], [0], [0], [1], [0, 0, 1, 1], [], []>} : vector<84x8xf32>, vector<8x20xf32>, vector<84x20xf32> -> vector<84x20xf32>
    %26 = arith.addf %23, %25 : vector<84x20xf32>
    %27 = vector.broadcast %12 : vector<1x20xf32> to vector<84x20xf32>
    %28 = arith.addf %26, %27 : vector<84x20xf32>
    %cst_27 = arith.constant 0.000000e+00 : f32
    %29 = vector.broadcast %cst_27 : f32 to vector<84x20xf32>
    %30 = arith.maximumf %28, %29 : vector<84x20xf32>
    %c0_28 = arith.constant 0 : index
    %c0_29 = arith.constant 0 : index
    %31 = vector.load %arg4[%c0_28, %c0_29] : memref<1x20xf32, #tpu.memory_space<vmem>>, vector<1x20xf32>
    %32 = vector.broadcast %31 : vector<1x20xf32> to vector<84x20xf32>
    %33 = arith.mulf %30, %32 : vector<84x20xf32>
    %c0_30 = arith.constant 0 : index
    %c0_31 = arith.constant 0 : index
    %34 = vector.load %arg5[%c0_30, %c0_31] : memref<1x20xf32, #tpu.memory_space<vmem>>, vector<1x20xf32>
    %35 = vector.broadcast %34 : vector<1x20xf32> to vector<84x20xf32>
    %36 = arith.addf %33, %35 : vector<84x20xf32>
    %c0_32 = arith.constant 0 : index
    %c0_33 = arith.constant 0 : index
    %37 = vector.load %arg31[%c0_32, %c0_33] : memref<84x20xf32, #tpu.memory_space<vmem>>, vector<84x20xf32>
    tpu.vector_store %arg31[%c0_32, %c0_33], %36 {strides = array<i32>} : memref<84x20xf32, #tpu.memory_space<vmem>>, vector<84x20xf32>,
    %c0_34 = arith.constant 0 : index
    %c0_35 = arith.constant 0 : index
    %38 = tpu.strided_load %arg31[%c0_34, %c0_35] {strides = array<i32: 2, 1>} : memref<84x20xf32, #tpu.memory_space<vmem>>, vector<42x20xf32>
    %c1_36 = arith.constant 1 : index
    %c0_37 = arith.constant 0 : index
    %39 = tpu.strided_load %arg31[%c1_36, %c0_37] {strides = array<i32: 2, 1>} : memref<84x20xf32, #tpu.memory_space<vmem>>, vector<42x20xf32>
    %40 = arith.maximumf %38, %39 : vector<42x20xf32>
    %c0_38 = arith.constant 0 : index
    %c0_39 = arith.constant 0 : index
    %41 = vector.load %arg25[%c0_38, %c0_39] : memref<96x20xf32, #tpu.memory_space<vmem>>, vector<42x20xf32>
    tpu.vector_store %arg25[%c0_38, %c0_39], %40 {strides = array<i32>} : memref<96x20xf32, #tpu.memory_space<vmem>>, vector<42x20xf32>,
    %c88_40 = arith.constant 88 : index
    %c0_41 = arith.constant 0 : index
    %42 = vector.load %arg0[%c88_40, %c0_41] : memref<176x8xf32, #tpu.memory_space<vmem>>, vector<84x8xf32>
    %cst_42 = arith.constant dense<0.000000e+00> : vector<84x20xf32>
    %43 = tpu.matmul %42, %7, %cst_42 {dimension_numbers = #tpu.dot_dimension_numbers<[1], [0], [0], [1], [0, 0, 1, 1], [], []>} : vector<84x8xf32>, vector<8x20xf32>, vector<84x20xf32> -> vector<84x20xf32>
    %c89 = arith.constant 89 : index
    %c0_43 = arith.constant 0 : index
    %44 = vector.load %arg0[%c89, %c0_43] : memref<176x8xf32, #tpu.memory_space<vmem>>, vector<84x8xf32>
    %cst_44 = arith.constant dense<0.000000e+00> : vector<84x20xf32>
    %45 = tpu.matmul %44, %8, %cst_44 {dimension_numbers = #tpu.dot_dimension_numbers<[1], [0], [0], [1], [0, 0, 1, 1], [], []>} : vector<84x8xf32>, vector<8x20xf32>, vector<84x20xf32> -> vector<84x20xf32>
    %46 = arith.addf %43, %45 : vector<84x20xf32>
    %c90 = arith.constant 90 : index
    %c0_45 = arith.constant 0 : index
    %47 = vector.load %arg0[%c90, %c0_45] : memref<176x8xf32, #tpu.memory_space<vmem>>, vector<84x8xf32>
    %cst_46 = arith.constant dense<0.000000e+00> : vector<84x20xf32>
    %48 = tpu.matmul %47, %9, %cst_46 {dimension_numbers = #tpu.dot_dimension_numbers<[1], [0], [0], [1], [0, 0, 1, 1], [], []>} : vector<84x8xf32>, vector<8x20xf32>, vector<84x20xf32> -> vector<84x20xf32>
    %49 = arith.addf %46, %48 : vector<84x20xf32>
    %c91 = arith.constant 91 : index
    %c0_47 = arith.constant 0 : index
    %50 = vector.load %arg0[%c91, %c0_47] : memref<176x8xf32, #tpu.memory_space<vmem>>, vector<84x8xf32>
    %cst_48 = arith.constant dense<0.000000e+00> : vector<84x20xf32>
    %51 = tpu.matmul %50, %10, %cst_48 {dimension_numbers = #tpu.dot_dimension_numbers<[1], [0], [0], [1], [0, 0, 1, 1], [], []>} : vector<84x8xf32>, vector<8x20xf32>, vector<84x20xf32> -> vector<84x20xf32>
    %52 = arith.addf %49, %51 : vector<84x20xf32>
    %c92 = arith.constant 92 : index
    %c0_49 = arith.constant 0 : index
    %53 = vector.load %arg0[%c92, %c0_49] : memref<176x8xf32, #tpu.memory_space<vmem>>, vector<84x8xf32>
    %cst_50 = arith.constant dense<0.000000e+00> : vector<84x20xf32>
    %54 = tpu.matmul %53, %11, %cst_50 {dimension_numbers = #tpu.dot_dimension_numbers<[1], [0], [0], [1], [0, 0, 1, 1], [], []>} : vector<84x8xf32>, vector<8x20xf32>, vector<84x20xf32> -> vector<84x20xf32>
    %55 = arith.addf %52, %54 : vector<84x20xf32>
    %56 = vector.broadcast %12 : vector<1x20xf32> to vector<84x20xf32>
    %57 = arith.addf %55, %56 : vector<84x20xf32>
    %cst_51 = arith.constant 0.000000e+00 : f32
    %58 = vector.broadcast %cst_51 : f32 to vector<84x20xf32>
    %59 = arith.maximumf %57, %58 : vector<84x20xf32>
    %c0_52 = arith.constant 0 : index
    %c0_53 = arith.constant 0 : index
    %60 = vector.load %arg4[%c0_52, %c0_53] : memref<1x20xf32, #tpu.memory_space<vmem>>, vector<1x20xf32>
    %61 = vector.broadcast %60 : vector<1x20xf32> to vector<84x20xf32>
    %62 = arith.mulf %59, %61 : vector<84x20xf32>
    %c0_54 = arith.constant 0 : index
    %c0_55 = arith.constant 0 : index
    %63 = vector.load %arg5[%c0_54, %c0_55] : memref<1x20xf32, #tpu.memory_space<vmem>>, vector<1x20xf32>
    %64 = vector.broadcast %63 : vector<1x20xf32> to vector<84x20xf32>
    %65 = arith.addf %62, %64 : vector<84x20xf32>
    %c0_56 = arith.constant 0 : index
    %c0_57 = arith.constant 0 : index
    %66 = vector.load %arg31[%c0_56, %c0_57] : memref<84x20xf32, #tpu.memory_space<vmem>>, vector<84x20xf32>
    tpu.vector_store %arg31[%c0_56, %c0_57], %65 {strides = array<i32>} : memref<84x20xf32, #tpu.memory_space<vmem>>, vector<84x20xf32>,
    %c0_58 = arith.constant 0 : index
    %c0_59 = arith.constant 0 : index
    %67 = tpu.strided_load %arg31[%c0_58, %c0_59] {strides = array<i32: 2, 1>} : memref<84x20xf32, #tpu.memory_space<vmem>>, vector<42x20xf32>
    %c1_60 = arith.constant 1 : index
    %c0_61 = arith.constant 0 : index
    %68 = tpu.strided_load %arg31[%c1_60, %c0_61] {strides = array<i32: 2, 1>} : memref<84x20xf32, #tpu.memory_space<vmem>>, vector<42x20xf32>
    %69 = arith.maximumf %67, %68 : vector<42x20xf32>
    %c48_62 = arith.constant 48 : index
    %c0_63 = arith.constant 0 : index
    %70 = vector.load %arg25[%c48_62, %c0_63] : memref<96x20xf32, #tpu.memory_space<vmem>>, vector<42x20xf32>
    tpu.vector_store %arg25[%c48_62, %c0_63], %69 {strides = array<i32>} : memref<96x20xf32, #tpu.memory_space<vmem>>, vector<42x20xf32>,
    %c0_64 = arith.constant 0 : index
    %c0_65 = arith.constant 0 : index
    %71 = vector.load %arg6[%c0_64, %c0_65] : memref<60x40xf32, #tpu.memory_space<vmem>>, vector<20x40xf32>
    %c20 = arith.constant 20 : index
    %c0_66 = arith.constant 0 : index
    %72 = vector.load %arg6[%c20, %c0_66] : memref<60x40xf32, #tpu.memory_space<vmem>>, vector<20x40xf32>
    %c40 = arith.constant 40 : index
    %c0_67 = arith.constant 0 : index
    %73 = vector.load %arg6[%c40, %c0_67] : memref<60x40xf32, #tpu.memory_space<vmem>>, vector<20x40xf32>
    %c0_68 = arith.constant 0 : index
    %c0_69 = arith.constant 0 : index
    %74 = vector.load %arg7[%c0_68, %c0_69] : memref<1x40xf32, #tpu.memory_space<vmem>>, vector<1x40xf32>
    %c0_70 = arith.constant 0 : index
    %c0_71 = arith.constant 0 : index
    %75 = vector.load %arg25[%c0_70, %c0_71] : memref<96x20xf32, #tpu.memory_space<vmem>>, vector<40x20xf32>
    %cst_72 = arith.constant dense<0.000000e+00> : vector<40x40xf32>
    %76 = tpu.matmul %75, %71, %cst_72 {dimension_numbers = #tpu.dot_dimension_numbers<[1], [0], [0], [1], [0, 0, 1, 1], [], []>} : vector<40x20xf32>, vector<20x40xf32>, vector<40x40xf32> -> vector<40x40xf32>
    %c1_73 = arith.constant 1 : index
    %c0_74 = arith.constant 0 : index
    %77 = vector.load %arg25[%c1_73, %c0_74] : memref<96x20xf32, #tpu.memory_space<vmem>>, vector<40x20xf32>
    %cst_75 = arith.constant dense<0.000000e+00> : vector<40x40xf32>
    %78 = tpu.matmul %77, %72, %cst_75 {dimension_numbers = #tpu.dot_dimension_numbers<[1], [0], [0], [1], [0, 0, 1, 1], [], []>} : vector<40x20xf32>, vector<20x40xf32>, vector<40x40xf32> -> vector<40x40xf32>
    %79 = arith.addf %76, %78 : vector<40x40xf32>
    %c2_76 = arith.constant 2 : index
    %c0_77 = arith.constant 0 : index
    %80 = vector.load %arg25[%c2_76, %c0_77] : memref<96x20xf32, #tpu.memory_space<vmem>>, vector<40x20xf32>
    %cst_78 = arith.constant dense<0.000000e+00> : vector<40x40xf32>
    %81 = tpu.matmul %80, %73, %cst_78 {dimension_numbers = #tpu.dot_dimension_numbers<[1], [0], [0], [1], [0, 0, 1, 1], [], []>} : vector<40x20xf32>, vector<20x40xf32>, vector<40x40xf32> -> vector<40x40xf32>
    %82 = arith.addf %79, %81 : vector<40x40xf32>
    %83 = vector.broadcast %74 : vector<1x40xf32> to vector<40x40xf32>
    %84 = arith.addf %82, %83 : vector<40x40xf32>
    %85 = math.tanh %84 : vector<40x40xf32>
    %c0_79 = arith.constant 0 : index
    %c0_80 = arith.constant 0 : index
    %86 = vector.load %arg32[%c0_79, %c0_80] : memref<40x40xf32, #tpu.memory_space<vmem>>, vector<40x40xf32>
    tpu.vector_store %arg32[%c0_79, %c0_80], %85 {strides = array<i32>} : memref<40x40xf32, #tpu.memory_space<vmem>>, vector<40x40xf32>,
    %c0_81 = arith.constant 0 : index
    %c0_82 = arith.constant 0 : index
    %87 = tpu.strided_load %arg32[%c0_81, %c0_82] {strides = array<i32: 2, 1>} : memref<40x40xf32, #tpu.memory_space<vmem>>, vector<20x40xf32>
    %c1_83 = arith.constant 1 : index
    %c0_84 = arith.constant 0 : index
    %88 = tpu.strided_load %arg32[%c1_83, %c0_84] {strides = array<i32: 2, 1>} : memref<40x40xf32, #tpu.memory_space<vmem>>, vector<20x40xf32>
    %89 = arith.maximumf %87, %88 : vector<20x40xf32>
    %c0_85 = arith.constant 0 : index
    %c0_86 = arith.constant 0 : index
    %90 = vector.load %arg26[%c0_85, %c0_86] : memref<48x40xf32, #tpu.memory_space<vmem>>, vector<20x40xf32>
    tpu.vector_store %arg26[%c0_85, %c0_86], %89 {strides = array<i32>} : memref<48x40xf32, #tpu.memory_space<vmem>>, vector<20x40xf32>,
    %c48_87 = arith.constant 48 : index
    %c0_88 = arith.constant 0 : index
    %91 = vector.load %arg25[%c48_87, %c0_88] : memref<96x20xf32, #tpu.memory_space<vmem>>, vector<40x20xf32>
    %cst_89 = arith.constant dense<0.000000e+00> : vector<40x40xf32>
    %92 = tpu.matmul %91, %71, %cst_89 {dimension_numbers = #tpu.dot_dimension_numbers<[1], [0], [0], [1], [0, 0, 1, 1], [], []>} : vector<40x20xf32>, vector<20x40xf32>, vector<40x40xf32> -> vector<40x40xf32>
    %c49 = arith.constant 49 : index
    %c0_90 = arith.constant 0 : index
    %93 = vector.load %arg25[%c49, %c0_90] : memref<96x20xf32, #tpu.memory_space<vmem>>, vector<40x20xf32>
    %cst_91 = arith.constant dense<0.000000e+00> : vector<40x40xf32>
    %94 = tpu.matmul %93, %72, %cst_91 {dimension_numbers = #tpu.dot_dimension_numbers<[1], [0], [0], [1], [0, 0, 1, 1], [], []>} : vector<40x20xf32>, vector<20x40xf32>, vector<40x40xf32> -> vector<40x40xf32>
    %95 = arith.addf %92, %94 : vector<40x40xf32>
    %c50 = arith.constant 50 : index
    %c0_92 = arith.constant 0 : index
    %96 = vector.load %arg25[%c50, %c0_92] : memref<96x20xf32, #tpu.memory_space<vmem>>, vector<40x20xf32>
    %cst_93 = arith.constant dense<0.000000e+00> : vector<40x40xf32>
    %97 = tpu.matmul %96, %73, %cst_93 {dimension_numbers = #tpu.dot_dimension_numbers<[1], [0], [0], [1], [0, 0, 1, 1], [], []>} : vector<40x20xf32>, vector<20x40xf32>, vector<40x40xf32> -> vector<40x40xf32>
    %98 = arith.addf %95, %97 : vector<40x40xf32>
    %99 = vector.broadcast %74 : vector<1x40xf32> to vector<40x40xf32>
    %100 = arith.addf %98, %99 : vector<40x40xf32>
    %101 = math.tanh %100 : vector<40x40xf32>
    %c0_94 = arith.constant 0 : index
    %c0_95 = arith.constant 0 : index
    %102 = vector.load %arg32[%c0_94, %c0_95] : memref<40x40xf32, #tpu.memory_space<vmem>>, vector<40x40xf32>
    tpu.vector_store %arg32[%c0_94, %c0_95], %101 {strides = array<i32>} : memref<40x40xf32, #tpu.memory_space<vmem>>, vector<40x40xf32>,
    %c0_96 = arith.constant 0 : index
    %c0_97 = arith.constant 0 : index
    %103 = tpu.strided_load %arg32[%c0_96, %c0_97] {strides = array<i32: 2, 1>} : memref<40x40xf32, #tpu.memory_space<vmem>>, vector<20x40xf32>
    %c1_98 = arith.constant 1 : index
    %c0_99 = arith.constant 0 : index
    %104 = tpu.strided_load %arg32[%c1_98, %c0_99] {strides = array<i32: 2, 1>} : memref<40x40xf32, #tpu.memory_space<vmem>>, vector<20x40xf32>
    %105 = arith.maximumf %103, %104 : vector<20x40xf32>
    %c24_100 = arith.constant 24 : index
    %c0_101 = arith.constant 0 : index
    %106 = vector.load %arg26[%c24_100, %c0_101] : memref<48x40xf32, #tpu.memory_space<vmem>>, vector<20x40xf32>
    tpu.vector_store %arg26[%c24_100, %c0_101], %105 {strides = array<i32>} : memref<48x40xf32, #tpu.memory_space<vmem>>, vector<20x40xf32>,
    %c0_102 = arith.constant 0 : index
    %c0_103 = arith.constant 0 : index
    %107 = vector.load %arg8[%c0_102, %c0_103] : memref<120x60xf32, #tpu.memory_space<vmem>>, vector<40x60xf32>
    %c40_104 = arith.constant 40 : index
    %c0_105 = arith.constant 0 : index
    %108 = vector.load %arg8[%c40_104, %c0_105] : memref<120x60xf32, #tpu.memory_space<vmem>>, vector<40x60xf32>
    %c80 = arith.constant 80 : index
    %c0_106 = arith.constant 0 : index
    %109 = vector.load %arg8[%c80, %c0_106] : memref<120x60xf32, #tpu.memory_space<vmem>>, vector<40x60xf32>
    %c0_107 = arith.constant 0 : index
    %c0_108 = arith.constant 0 : index
    %110 = vector.load %arg9[%c0_107, %c0_108] : memref<1x60xf32, #tpu.memory_space<vmem>>, vector<1x60xf32>
    %c0_109 = arith.constant 0 : index
    %c0_110 = arith.constant 0 : index
    %111 = vector.load %arg26[%c0_109, %c0_110] : memref<48x40xf32, #tpu.memory_space<vmem>>, vector<18x40xf32>
    %cst_111 = arith.constant dense<0.000000e+00> : vector<18x60xf32>
    %112 = tpu.matmul %111, %107, %cst_111 {dimension_numbers = #tpu.dot_dimension_numbers<[1], [0], [0], [1], [0, 0, 1, 1], [], []>} : vector<18x40xf32>, vector<40x60xf32>, vector<18x60xf32> -> vector<18x60xf32>
    %c1_112 = arith.constant 1 : index
    %c0_113 = arith.constant 0 : index
    %113 = vector.load %arg26[%c1_112, %c0_113] : memref<48x40xf32, #tpu.memory_space<vmem>>, vector<18x40xf32>
    %cst_114 = arith.constant dense<0.000000e+00> : vector<18x60xf32>
    %114 = tpu.matmul %113, %108, %cst_114 {dimension_numbers = #tpu.dot_dimension_numbers<[1], [0], [0], [1], [0, 0, 1, 1], [], []>} : vector<18x40xf32>, vector<40x60xf32>, vector<18x60xf32> -> vector<18x60xf32>
    %115 = arith.addf %112, %114 : vector<18x60xf32>
    %c2_115 = arith.constant 2 : index
    %c0_116 = arith.constant 0 : index
    %116 = vector.load %arg26[%c2_115, %c0_116] : memref<48x40xf32, #tpu.memory_space<vmem>>, vector<18x40xf32>
    %cst_117 = arith.constant dense<0.000000e+00> : vector<18x60xf32>
    %117 = tpu.matmul %116, %109, %cst_117 {dimension_numbers = #tpu.dot_dimension_numbers<[1], [0], [0], [1], [0, 0, 1, 1], [], []>} : vector<18x40xf32>, vector<40x60xf32>, vector<18x60xf32> -> vector<18x60xf32>
    %118 = arith.addf %115, %117 : vector<18x60xf32>
    %119 = vector.broadcast %110 : vector<1x60xf32> to vector<18x60xf32>
    %120 = arith.addf %118, %119 : vector<18x60xf32>
    %cst_118 = arith.constant 0.000000e+00 : f32
    %121 = vector.broadcast %cst_118 : f32 to vector<18x60xf32>
    %122 = arith.maximumf %120, %121 : vector<18x60xf32>
    %c0_119 = arith.constant 0 : index
    %c0_120 = arith.constant 0 : index
    %123 = vector.load %arg10[%c0_119, %c0_120] : memref<1x60xf32, #tpu.memory_space<vmem>>, vector<1x60xf32>
    %124 = vector.broadcast %123 : vector<1x60xf32> to vector<18x60xf32>
    %125 = arith.mulf %122, %124 : vector<18x60xf32>
    %c0_121 = arith.constant 0 : index
    %c0_122 = arith.constant 0 : index
    %126 = vector.load %arg11[%c0_121, %c0_122] : memref<1x60xf32, #tpu.memory_space<vmem>>, vector<1x60xf32>
    %127 = vector.broadcast %126 : vector<1x60xf32> to vector<18x60xf32>
    %128 = arith.addf %125, %127 : vector<18x60xf32>
    %c0_123 = arith.constant 0 : index
    %c0_124 = arith.constant 0 : index
    %129 = vector.load %arg33[%c0_123, %c0_124] : memref<18x60xf32, #tpu.memory_space<vmem>>, vector<18x60xf32>
    tpu.vector_store %arg33[%c0_123, %c0_124], %128 {strides = array<i32>} : memref<18x60xf32, #tpu.memory_space<vmem>>, vector<18x60xf32>,
    %c0_125 = arith.constant 0 : index
    %c0_126 = arith.constant 0 : index
    %130 = tpu.strided_load %arg33[%c0_125, %c0_126] {strides = array<i32: 3, 1>} : memref<18x60xf32, #tpu.memory_space<vmem>>, vector<6x60xf32>
    %c1_127 = arith.constant 1 : index
    %c0_128 = arith.constant 0 : index
    %131 = tpu.strided_load %arg33[%c1_127, %c0_128] {strides = array<i32: 3, 1>} : memref<18x60xf32, #tpu.memory_space<vmem>>, vector<6x60xf32>
    %132 = arith.maximumf %130, %131 : vector<6x60xf32>
    %c2_129 = arith.constant 2 : index
    %c0_130 = arith.constant 0 : index
    %133 = tpu.strided_load %arg33[%c2_129, %c0_130] {strides = array<i32: 3, 1>} : memref<18x60xf32, #tpu.memory_space<vmem>>, vector<6x60xf32>
    %134 = arith.maximumf %132, %133 : vector<6x60xf32>
    %c0_131 = arith.constant 0 : index
    %c0_132 = arith.constant 0 : index
    %135 = vector.load %arg27[%c0_131, %c0_132] : memref<16x60xf32, #tpu.memory_space<vmem>>, vector<6x60xf32>
    tpu.vector_store %arg27[%c0_131, %c0_132], %134 {strides = array<i32>} : memref<16x60xf32, #tpu.memory_space<vmem>>, vector<6x60xf32>,
    %c24_133 = arith.constant 24 : index
    %c0_134 = arith.constant 0 : index
    %136 = vector.load %arg26[%c24_133, %c0_134] : memref<48x40xf32, #tpu.memory_space<vmem>>, vector<18x40xf32>
    %cst_135 = arith.constant dense<0.000000e+00> : vector<18x60xf32>
    %137 = tpu.matmul %136, %107, %cst_135 {dimension_numbers = #tpu.dot_dimension_numbers<[1], [0], [0], [1], [0, 0, 1, 1], [], []>} : vector<18x40xf32>, vector<40x60xf32>, vector<18x60xf32> -> vector<18x60xf32>
    %c25 = arith.constant 25 : index
    %c0_136 = arith.constant 0 : index
    %138 = vector.load %arg26[%c25, %c0_136] : memref<48x40xf32, #tpu.memory_space<vmem>>, vector<18x40xf32>
    %cst_137 = arith.constant dense<0.000000e+00> : vector<18x60xf32>
    %139 = tpu.matmul %138, %108, %cst_137 {dimension_numbers = #tpu.dot_dimension_numbers<[1], [0], [0], [1], [0, 0, 1, 1], [], []>} : vector<18x40xf32>, vector<40x60xf32>, vector<18x60xf32> -> vector<18x60xf32>
    %140 = arith.addf %137, %139 : vector<18x60xf32>
    %c26 = arith.constant 26 : index
    %c0_138 = arith.constant 0 : index
    %141 = vector.load %arg26[%c26, %c0_138] : memref<48x40xf32, #tpu.memory_space<vmem>>, vector<18x40xf32>
    %cst_139 = arith.constant dense<0.000000e+00> : vector<18x60xf32>
    %142 = tpu.matmul %141, %109, %cst_139 {dimension_numbers = #tpu.dot_dimension_numbers<[1], [0], [0], [1], [0, 0, 1, 1], [], []>} : vector<18x40xf32>, vector<40x60xf32>, vector<18x60xf32> -> vector<18x60xf32>
    %143 = arith.addf %140, %142 : vector<18x60xf32>
    %144 = vector.broadcast %110 : vector<1x60xf32> to vector<18x60xf32>
    %145 = arith.addf %143, %144 : vector<18x60xf32>
    %cst_140 = arith.constant 0.000000e+00 : f32
    %146 = vector.broadcast %cst_140 : f32 to vector<18x60xf32>
    %147 = arith.maximumf %145, %146 : vector<18x60xf32>
    %c0_141 = arith.constant 0 : index
    %c0_142 = arith.constant 0 : index
    %148 = vector.load %arg10[%c0_141, %c0_142] : memref<1x60xf32, #tpu.memory_space<vmem>>, vector<1x60xf32>
    %149 = vector.broadcast %148 : vector<1x60xf32> to vector<18x60xf32>
    %150 = arith.mulf %147, %149 : vector<18x60xf32>
    %c0_143 = arith.constant 0 : index
    %c0_144 = arith.constant 0 : index
    %151 = vector.load %arg11[%c0_143, %c0_144] : memref<1x60xf32, #tpu.memory_space<vmem>>, vector<1x60xf32>
    %152 = vector.broadcast %151 : vector<1x60xf32> to vector<18x60xf32>
    %153 = arith.addf %150, %152 : vector<18x60xf32>
    %c0_145 = arith.constant 0 : index
    %c0_146 = arith.constant 0 : index
    %154 = vector.load %arg33[%c0_145, %c0_146] : memref<18x60xf32, #tpu.memory_space<vmem>>, vector<18x60xf32>
    tpu.vector_store %arg33[%c0_145, %c0_146], %153 {strides = array<i32>} : memref<18x60xf32, #tpu.memory_space<vmem>>, vector<18x60xf32>,
    %c0_147 = arith.constant 0 : index
    %c0_148 = arith.constant 0 : index
    %155 = tpu.strided_load %arg33[%c0_147, %c0_148] {strides = array<i32: 3, 1>} : memref<18x60xf32, #tpu.memory_space<vmem>>, vector<6x60xf32>
    %c1_149 = arith.constant 1 : index
    %c0_150 = arith.constant 0 : index
    %156 = tpu.strided_load %arg33[%c1_149, %c0_150] {strides = array<i32: 3, 1>} : memref<18x60xf32, #tpu.memory_space<vmem>>, vector<6x60xf32>
    %157 = arith.maximumf %155, %156 : vector<6x60xf32>
    %c2_151 = arith.constant 2 : index
    %c0_152 = arith.constant 0 : index
    %158 = tpu.strided_load %arg33[%c2_151, %c0_152] {strides = array<i32: 3, 1>} : memref<18x60xf32, #tpu.memory_space<vmem>>, vector<6x60xf32>
    %159 = arith.maximumf %157, %158 : vector<6x60xf32>
    %c8_153 = arith.constant 8 : index
    %c0_154 = arith.constant 0 : index
    %160 = vector.load %arg27[%c8_153, %c0_154] : memref<16x60xf32, #tpu.memory_space<vmem>>, vector<6x60xf32>
    tpu.vector_store %arg27[%c8_153, %c0_154], %159 {strides = array<i32>} : memref<16x60xf32, #tpu.memory_space<vmem>>, vector<6x60xf32>,
    %c0_155 = arith.constant 0 : index
    %c0_156 = arith.constant 0 : index
    %161 = vector.load %arg12[%c0_155, %c0_156] : memref<180x80xf32, #tpu.memory_space<vmem>>, vector<60x80xf32>
    %c60 = arith.constant 60 : index
    %c0_157 = arith.constant 0 : index
    %162 = vector.load %arg12[%c60, %c0_157] : memref<180x80xf32, #tpu.memory_space<vmem>>, vector<60x80xf32>
    %c120 = arith.constant 120 : index
    %c0_158 = arith.constant 0 : index
    %163 = vector.load %arg12[%c120, %c0_158] : memref<180x80xf32, #tpu.memory_space<vmem>>, vector<60x80xf32>
    %c0_159 = arith.constant 0 : index
    %c0_160 = arith.constant 0 : index
    %164 = vector.load %arg13[%c0_159, %c0_160] : memref<1x80xf32, #tpu.memory_space<vmem>>, vector<1x80xf32>
    %c0_161 = arith.constant 0 : index
    %c0_162 = arith.constant 0 : index
    %165 = tpu.strided_load %arg27[%c0_161, %c0_162] {strides = array<i32: 3, 1>} : memref<16x60xf32, #tpu.memory_space<vmem>>, vector<2x60xf32>
    %cst_163 = arith.constant dense<0.000000e+00> : vector<2x80xf32>
    %166 = tpu.matmul %165, %161, %cst_163 {dimension_numbers = #tpu.dot_dimension_numbers<[1], [0], [0], [1], [0, 0, 1, 1], [], []>} : vector<2x60xf32>, vector<60x80xf32>, vector<2x80xf32> -> vector<2x80xf32>
    %c1_164 = arith.constant 1 : index
    %c0_165 = arith.constant 0 : index
    %167 = tpu.strided_load %arg27[%c1_164, %c0_165] {strides = array<i32: 3, 1>} : memref<16x60xf32, #tpu.memory_space<vmem>>, vector<2x60xf32>
    %cst_166 = arith.constant dense<0.000000e+00> : vector<2x80xf32>
    %168 = tpu.matmul %167, %162, %cst_166 {dimension_numbers = #tpu.dot_dimension_numbers<[1], [0], [0], [1], [0, 0, 1, 1], [], []>} : vector<2x60xf32>, vector<60x80xf32>, vector<2x80xf32> -> vector<2x80xf32>
    %169 = arith.addf %166, %168 : vector<2x80xf32>
    %c2_167 = arith.constant 2 : index
    %c0_168 = arith.constant 0 : index
    %170 = tpu.strided_load %arg27[%c2_167, %c0_168] {strides = array<i32: 3, 1>} : memref<16x60xf32, #tpu.memory_space<vmem>>, vector<2x60xf32>
    %cst_169 = arith.constant dense<0.000000e+00> : vector<2x80xf32>
    %171 = tpu.matmul %170, %163, %cst_169 {dimension_numbers = #tpu.dot_dimension_numbers<[1], [0], [0], [1], [0, 0, 1, 1], [], []>} : vector<2x60xf32>, vector<60x80xf32>, vector<2x80xf32> -> vector<2x80xf32>
    %172 = arith.addf %169, %171 : vector<2x80xf32>
    %173 = vector.broadcast %164 : vector<1x80xf32> to vector<2x80xf32>
    %174 = arith.addf %172, %173 : vector<2x80xf32>
    %175 = math.tanh %174 : vector<2x80xf32>
    %c0_170 = arith.constant 0 : index
    %c0_171 = arith.constant 0 : index
    %176 = vector.load %arg28[%c0_170, %c0_171] : memref<16x80xf32, #tpu.memory_space<vmem>>, vector<2x80xf32>
    tpu.vector_store %arg28[%c0_170, %c0_171], %175 {strides = array<i32>} : memref<16x80xf32, #tpu.memory_space<vmem>>, vector<2x80xf32>,
    %c8_172 = arith.constant 8 : index
    %c0_173 = arith.constant 0 : index
    %177 = tpu.strided_load %arg27[%c8_172, %c0_173] {strides = array<i32: 3, 1>} : memref<16x60xf32, #tpu.memory_space<vmem>>, vector<2x60xf32>
    %cst_174 = arith.constant dense<0.000000e+00> : vector<2x80xf32>
    %178 = tpu.matmul %177, %161, %cst_174 {dimension_numbers = #tpu.dot_dimension_numbers<[1], [0], [0], [1], [0, 0, 1, 1], [], []>} : vector<2x60xf32>, vector<60x80xf32>, vector<2x80xf32> -> vector<2x80xf32>
    %c9 = arith.constant 9 : index
    %c0_175 = arith.constant 0 : index
    %179 = tpu.strided_load %arg27[%c9, %c0_175] {strides = array<i32: 3, 1>} : memref<16x60xf32, #tpu.memory_space<vmem>>, vector<2x60xf32>
    %cst_176 = arith.constant dense<0.000000e+00> : vector<2x80xf32>
    %180 = tpu.matmul %179, %162, %cst_176 {dimension_numbers = #tpu.dot_dimension_numbers<[1], [0], [0], [1], [0, 0, 1, 1], [], []>} : vector<2x60xf32>, vector<60x80xf32>, vector<2x80xf32> -> vector<2x80xf32>
    %181 = arith.addf %178, %180 : vector<2x80xf32>
    %c10 = arith.constant 10 : index
    %c0_177 = arith.constant 0 : index
    %182 = tpu.strided_load %arg27[%c10, %c0_177] {strides = array<i32: 3, 1>} : memref<16x60xf32, #tpu.memory_space<vmem>>, vector<2x60xf32>
    %cst_178 = arith.constant dense<0.000000e+00> : vector<2x80xf32>
    %183 = tpu.matmul %182, %163, %cst_178 {dimension_numbers = #tpu.dot_dimension_numbers<[1], [0], [0], [1], [0, 0, 1, 1], [], []>} : vector<2x60xf32>, vector<60x80xf32>, vector<2x80xf32> -> vector<2x80xf32>
    %184 = arith.addf %181, %183 : vector<2x80xf32>
    %185 = vector.broadcast %164 : vector<1x80xf32> to vector<2x80xf32>
    %186 = arith.addf %184, %185 : vector<2x80xf32>
    %187 = math.tanh %186 : vector<2x80xf32>
    %c8_179 = arith.constant 8 : index
    %c0_180 = arith.constant 0 : index
    %188 = vector.load %arg28[%c8_179, %c0_180] : memref<16x80xf32, #tpu.memory_space<vmem>>, vector<2x80xf32>
    tpu.vector_store %arg28[%c8_179, %c0_180], %187 {strides = array<i32>} : memref<16x80xf32, #tpu.memory_space<vmem>>, vector<2x80xf32>,
    %c0_181 = arith.constant 0 : index
    %c0_182 = arith.constant 0 : index
    %189 = vector.load %arg14[%c0_181, %c0_182] : memref<40x16xf32, #tpu.memory_space<vmem>>, vector<8x16xf32>
    %c8_183 = arith.constant 8 : index
    %c0_184 = arith.constant 0 : index
    %190 = vector.load %arg14[%c8_183, %c0_184] : memref<40x16xf32, #tpu.memory_space<vmem>>, vector<8x16xf32>
    %c16_185 = arith.constant 16 : index
    %c0_186 = arith.constant 0 : index
    %191 = vector.load %arg14[%c16_185, %c0_186] : memref<40x16xf32, #tpu.memory_space<vmem>>, vector<8x16xf32>
    %c24_187 = arith.constant 24 : index
    %c0_188 = arith.constant 0 : index
    %192 = vector.load %arg14[%c24_187, %c0_188] : memref<40x16xf32, #tpu.memory_space<vmem>>, vector<8x16xf32>
    %c32_189 = arith.constant 32 : index
    %c0_190 = arith.constant 0 : index
    %193 = vector.load %arg14[%c32_189, %c0_190] : memref<40x16xf32, #tpu.memory_space<vmem>>, vector<8x16xf32>
    %c0_191 = arith.constant 0 : index
    %c0_192 = arith.constant 0 : index
    %194 = vector.load %arg15[%c0_191, %c0_192] : memref<1x16xf32, #tpu.memory_space<vmem>>, vector<1x16xf32>
    %c0_193 = arith.constant 0 : index
    %c0_194 = arith.constant 0 : index
    %195 = tpu.strided_load %arg24[%c0_193, %c0_194] {strides = array<i32: 2, 1>} : memref<96x8xf32, #tpu.memory_space<vmem>>, vector<21x8xf32>
    %cst_195 = arith.constant dense<0.000000e+00> : vector<21x16xf32>
    %196 = tpu.matmul %195, %189, %cst_195 {dimension_numbers = #tpu.dot_dimension_numbers<[1], [0], [0], [1], [0, 0, 1, 1], [], []>} : vector<21x8xf32>, vector<8x16xf32>, vector<21x16xf32> -> vector<21x16xf32>
    %c1_196 = arith.constant 1 : index
    %c0_197 = arith.constant 0 : index
    %197 = tpu.strided_load %arg24[%c1_196, %c0_197] {strides = array<i32: 2, 1>} : memref<96x8xf32, #tpu.memory_space<vmem>>, vector<21x8xf32>
    %cst_198 = arith.constant dense<0.000000e+00> : vector<21x16xf32>
    %198 = tpu.matmul %197, %190, %cst_198 {dimension_numbers = #tpu.dot_dimension_numbers<[1], [0], [0], [1], [0, 0, 1, 1], [], []>} : vector<21x8xf32>, vector<8x16xf32>, vector<21x16xf32> -> vector<21x16xf32>
    %199 = arith.addf %196, %198 : vector<21x16xf32>
    %c2_199 = arith.constant 2 : index
    %c0_200 = arith.constant 0 : index
    %200 = tpu.strided_load %arg24[%c2_199, %c0_200] {strides = array<i32: 2, 1>} : memref<96x8xf32, #tpu.memory_space<vmem>>, vector<21x8xf32>
    %cst_201 = arith.constant dense<0.000000e+00> : vector<21x16xf32>
    %201 = tpu.matmul %200, %191, %cst_201 {dimension_numbers = #tpu.dot_dimension_numbers<[1], [0], [0], [1], [0, 0, 1, 1], [], []>} : vector<21x8xf32>, vector<8x16xf32>, vector<21x16xf32> -> vector<21x16xf32>
    %202 = arith.addf %199, %201 : vector<21x16xf32>
    %c3_202 = arith.constant 3 : index
    %c0_203 = arith.constant 0 : index
    %203 = tpu.strided_load %arg24[%c3_202, %c0_203] {strides = array<i32: 2, 1>} : memref<96x8xf32, #tpu.memory_space<vmem>>, vector<21x8xf32>
    %cst_204 = arith.constant dense<0.000000e+00> : vector<21x16xf32>
    %204 = tpu.matmul %203, %192, %cst_204 {dimension_numbers = #tpu.dot_dimension_numbers<[1], [0], [0], [1], [0, 0, 1, 1], [], []>} : vector<21x8xf32>, vector<8x16xf32>, vector<21x16xf32> -> vector<21x16xf32>
    %205 = arith.addf %202, %204 : vector<21x16xf32>
    %c4_205 = arith.constant 4 : index
    %c0_206 = arith.constant 0 : index
    %206 = tpu.strided_load %arg24[%c4_205, %c0_206] {strides = array<i32: 2, 1>} : memref<96x8xf32, #tpu.memory_space<vmem>>, vector<21x8xf32>
    %cst_207 = arith.constant dense<0.000000e+00> : vector<21x16xf32>
    %207 = tpu.matmul %206, %193, %cst_207 {dimension_numbers = #tpu.dot_dimension_numbers<[1], [0], [0], [1], [0, 0, 1, 1], [], []>} : vector<21x8xf32>, vector<8x16xf32>, vector<21x16xf32> -> vector<21x16xf32>
    %208 = arith.addf %205, %207 : vector<21x16xf32>
    %209 = vector.broadcast %194 : vector<1x16xf32> to vector<21x16xf32>
    %210 = arith.addf %208, %209 : vector<21x16xf32>
    %cst_208 = arith.constant 0.000000e+00 : f32
    %211 = vector.broadcast %cst_208 : f32 to vector<21x16xf32>
    %212 = arith.maximumf %210, %211 : vector<21x16xf32>
    %c0_209 = arith.constant 0 : index
    %c0_210 = arith.constant 0 : index
    %213 = vector.load %arg16[%c0_209, %c0_210] : memref<1x16xf32, #tpu.memory_space<vmem>>, vector<1x16xf32>
    %214 = vector.broadcast %213 : vector<1x16xf32> to vector<21x16xf32>
    %215 = arith.mulf %212, %214 : vector<21x16xf32>
    %c0_211 = arith.constant 0 : index
    %c0_212 = arith.constant 0 : index
    %216 = vector.load %arg17[%c0_211, %c0_212] : memref<1x16xf32, #tpu.memory_space<vmem>>, vector<1x16xf32>
    %217 = vector.broadcast %216 : vector<1x16xf32> to vector<21x16xf32>
    %218 = arith.addf %215, %217 : vector<21x16xf32>
    %c0_213 = arith.constant 0 : index
    %c0_214 = arith.constant 0 : index
    %219 = vector.load %arg29[%c0_213, %c0_214] : memref<48x16xf32, #tpu.memory_space<vmem>>, vector<21x16xf32>
    tpu.vector_store %arg29[%c0_213, %c0_214], %218 {strides = array<i32>} : memref<48x16xf32, #tpu.memory_space<vmem>>, vector<21x16xf32>,
    %c48_215 = arith.constant 48 : index
    %c0_216 = arith.constant 0 : index
    %220 = tpu.strided_load %arg24[%c48_215, %c0_216] {strides = array<i32: 2, 1>} : memref<96x8xf32, #tpu.memory_space<vmem>>, vector<21x8xf32>
    %cst_217 = arith.constant dense<0.000000e+00> : vector<21x16xf32>
    %221 = tpu.matmul %220, %189, %cst_217 {dimension_numbers = #tpu.dot_dimension_numbers<[1], [0], [0], [1], [0, 0, 1, 1], [], []>} : vector<21x8xf32>, vector<8x16xf32>, vector<21x16xf32> -> vector<21x16xf32>
    %c49_218 = arith.constant 49 : index
    %c0_219 = arith.constant 0 : index
    %222 = tpu.strided_load %arg24[%c49_218, %c0_219] {strides = array<i32: 2, 1>} : memref<96x8xf32, #tpu.memory_space<vmem>>, vector<21x8xf32>
    %cst_220 = arith.constant dense<0.000000e+00> : vector<21x16xf32>
    %223 = tpu.matmul %222, %190, %cst_220 {dimension_numbers = #tpu.dot_dimension_numbers<[1], [0], [0], [1], [0, 0, 1, 1], [], []>} : vector<21x8xf32>, vector<8x16xf32>, vector<21x16xf32> -> vector<21x16xf32>
    %224 = arith.addf %221, %223 : vector<21x16xf32>
    %c50_221 = arith.constant 50 : index
    %c0_222 = arith.constant 0 : index
    %225 = tpu.strided_load %arg24[%c50_221, %c0_222] {strides = array<i32: 2, 1>} : memref<96x8xf32, #tpu.memory_space<vmem>>, vector<21x8xf32>
    %cst_223 = arith.constant dense<0.000000e+00> : vector<21x16xf32>
    %226 = tpu.matmul %225, %191, %cst_223 {dimension_numbers = #tpu.dot_dimension_numbers<[1], [0], [0], [1], [0, 0, 1, 1], [], []>} : vector<21x8xf32>, vector<8x16xf32>, vector<21x16xf32> -> vector<21x16xf32>
    %227 = arith.addf %224, %226 : vector<21x16xf32>
    %c51 = arith.constant 51 : index
    %c0_224 = arith.constant 0 : index
    %228 = tpu.strided_load %arg24[%c51, %c0_224] {strides = array<i32: 2, 1>} : memref<96x8xf32, #tpu.memory_space<vmem>>, vector<21x8xf32>
    %cst_225 = arith.constant dense<0.000000e+00> : vector<21x16xf32>
    %229 = tpu.matmul %228, %192, %cst_225 {dimension_numbers = #tpu.dot_dimension_numbers<[1], [0], [0], [1], [0, 0, 1, 1], [], []>} : vector<21x8xf32>, vector<8x16xf32>, vector<21x16xf32> -> vector<21x16xf32>
    %230 = arith.addf %227, %229 : vector<21x16xf32>
    %c52 = arith.constant 52 : index
    %c0_226 = arith.constant 0 : index
    %231 = tpu.strided_load %arg24[%c52, %c0_226] {strides = array<i32: 2, 1>} : memref<96x8xf32, #tpu.memory_space<vmem>>, vector<21x8xf32>
    %cst_227 = arith.constant dense<0.000000e+00> : vector<21x16xf32>
    %232 = tpu.matmul %231, %193, %cst_227 {dimension_numbers = #tpu.dot_dimension_numbers<[1], [0], [0], [1], [0, 0, 1, 1], [], []>} : vector<21x8xf32>, vector<8x16xf32>, vector<21x16xf32> -> vector<21x16xf32>
    %233 = arith.addf %230, %232 : vector<21x16xf32>
    %234 = vector.broadcast %194 : vector<1x16xf32> to vector<21x16xf32>
    %235 = arith.addf %233, %234 : vector<21x16xf32>
    %cst_228 = arith.constant 0.000000e+00 : f32
    %236 = vector.broadcast %cst_228 : f32 to vector<21x16xf32>
    %237 = arith.maximumf %235, %236 : vector<21x16xf32>
    %c0_229 = arith.constant 0 : index
    %c0_230 = arith.constant 0 : index
    %238 = vector.load %arg16[%c0_229, %c0_230] : memref<1x16xf32, #tpu.memory_space<vmem>>, vector<1x16xf32>
    %239 = vector.broadcast %238 : vector<1x16xf32> to vector<21x16xf32>
    %240 = arith.mulf %237, %239 : vector<21x16xf32>
    %c0_231 = arith.constant 0 : index
    %c0_232 = arith.constant 0 : index
    %241 = vector.load %arg17[%c0_231, %c0_232] : memref<1x16xf32, #tpu.memory_space<vmem>>, vector<1x16xf32>
    %242 = vector.broadcast %241 : vector<1x16xf32> to vector<21x16xf32>
    %243 = arith.addf %240, %242 : vector<21x16xf32>
    %c24_233 = arith.constant 24 : index
    %c0_234 = arith.constant 0 : index
    %244 = vector.load %arg29[%c24_233, %c0_234] : memref<48x16xf32, #tpu.memory_space<vmem>>, vector<21x16xf32>
    tpu.vector_store %arg29[%c24_233, %c0_234], %243 {strides = array<i32>} : memref<48x16xf32, #tpu.memory_space<vmem>>, vector<21x16xf32>,
    %c0_235 = arith.constant 0 : index
    %c0_236 = arith.constant 0 : index
    %245 = vector.load %arg18[%c0_235, %c0_236] : memref<48x16xf32, #tpu.memory_space<vmem>>, vector<16x16xf32>
    %c16_237 = arith.constant 16 : index
    %c0_238 = arith.constant 0 : index
    %246 = vector.load %arg18[%c16_237, %c0_238] : memref<48x16xf32, #tpu.memory_space<vmem>>, vector<16x16xf32>
    %c32_239 = arith.constant 32 : index
    %c0_240 = arith.constant 0 : index
    %247 = vector.load %arg18[%c32_239, %c0_240] : memref<48x16xf32, #tpu.memory_space<vmem>>, vector<16x16xf32>
    %c0_241 = arith.constant 0 : index
    %c0_242 = arith.constant 0 : index
    %248 = vector.load %arg19[%c0_241, %c0_242] : memref<1x16xf32, #tpu.memory_space<vmem>>, vector<1x16xf32>
    %c0_243 = arith.constant 0 : index
    %c0_244 = arith.constant 0 : index
    %249 = tpu.strided_load %arg29[%c0_243, %c0_244] {strides = array<i32: 2, 1>} : memref<48x16xf32, #tpu.memory_space<vmem>>, vector<10x16xf32>
    %cst_245 = arith.constant dense<0.000000e+00> : vector<10x16xf32>
    %250 = tpu.matmul %249, %245, %cst_245 {dimension_numbers = #tpu.dot_dimension_numbers<[1], [0], [0], [1], [0, 0, 1, 1], [], []>} : vector<10x16xf32>, vector<16x16xf32>, vector<10x16xf32> -> vector<10x16xf32>
    %c1_246 = arith.constant 1 : index
    %c0_247 = arith.constant 0 : index
    %251 = tpu.strided_load %arg29[%c1_246, %c0_247] {strides = array<i32: 2, 1>} : memref<48x16xf32, #tpu.memory_space<vmem>>, vector<10x16xf32>
    %cst_248 = arith.constant dense<0.000000e+00> : vector<10x16xf32>
    %252 = tpu.matmul %251, %246, %cst_248 {dimension_numbers = #tpu.dot_dimension_numbers<[1], [0], [0], [1], [0, 0, 1, 1], [], []>} : vector<10x16xf32>, vector<16x16xf32>, vector<10x16xf32> -> vector<10x16xf32>
    %253 = arith.addf %250, %252 : vector<10x16xf32>
    %c2_249 = arith.constant 2 : index
    %c0_250 = arith.constant 0 : index
    %254 = tpu.strided_load %arg29[%c2_249, %c0_250] {strides = array<i32: 2, 1>} : memref<48x16xf32, #tpu.memory_space<vmem>>, vector<10x16xf32>
    %cst_251 = arith.constant dense<0.000000e+00> : vector<10x16xf32>
    %255 = tpu.matmul %254, %247, %cst_251 {dimension_numbers = #tpu.dot_dimension_numbers<[1], [0], [0], [1], [0, 0, 1, 1], [], []>} : vector<10x16xf32>, vector<16x16xf32>, vector<10x16xf32> -> vector<10x16xf32>
    %256 = arith.addf %253, %255 : vector<10x16xf32>
    %257 = vector.broadcast %248 : vector<1x16xf32> to vector<10x16xf32>
    %258 = arith.addf %256, %257 : vector<10x16xf32>
    %259 = math.tanh %258 : vector<10x16xf32>
    %c0_252 = arith.constant 0 : index
    %c0_253 = arith.constant 0 : index
    %260 = vector.load %arg34[%c0_252, %c0_253] : memref<10x16xf32, #tpu.memory_space<vmem>>, vector<10x16xf32>
    tpu.vector_store %arg34[%c0_252, %c0_253], %259 {strides = array<i32>} : memref<10x16xf32, #tpu.memory_space<vmem>>, vector<10x16xf32>,
    %c0_254 = arith.constant 0 : index
    %c0_255 = arith.constant 0 : index
    %261 = tpu.strided_load %arg34[%c0_254, %c0_255] {strides = array<i32: 2, 1>} : memref<10x16xf32, #tpu.memory_space<vmem>>, vector<5x16xf32>
    %c1_256 = arith.constant 1 : index
    %c0_257 = arith.constant 0 : index
    %262 = tpu.strided_load %arg34[%c1_256, %c0_257] {strides = array<i32: 2, 1>} : memref<10x16xf32, #tpu.memory_space<vmem>>, vector<5x16xf32>
    %263 = arith.maximumf %261, %262 : vector<5x16xf32>
    %c0_258 = arith.constant 0 : index
    %c0_259 = arith.constant 0 : index
    %264 = vector.load %arg30[%c0_258, %c0_259] : memref<16x16xf32, #tpu.memory_space<vmem>>, vector<5x16xf32>
    tpu.vector_store %arg30[%c0_258, %c0_259], %263 {strides = array<i32>} : memref<16x16xf32, #tpu.memory_space<vmem>>, vector<5x16xf32>,
    %c24_260 = arith.constant 24 : index
    %c0_261 = arith.constant 0 : index
    %265 = tpu.strided_load %arg29[%c24_260, %c0_261] {strides = array<i32: 2, 1>} : memref<48x16xf32, #tpu.memory_space<vmem>>, vector<10x16xf32>
    %cst_262 = arith.constant dense<0.000000e+00> : vector<10x16xf32>
    %266 = tpu.matmul %265, %245, %cst_262 {dimension_numbers = #tpu.dot_dimension_numbers<[1], [0], [0], [1], [0, 0, 1, 1], [], []>} : vector<10x16xf32>, vector<16x16xf32>, vector<10x16xf32> -> vector<10x16xf32>
    %c25_263 = arith.constant 25 : index
    %c0_264 = arith.constant 0 : index
    %267 = tpu.strided_load %arg29[%c25_263, %c0_264] {strides = array<i32: 2, 1>} : memref<48x16xf32, #tpu.memory_space<vmem>>, vector<10x16xf32>
    %cst_265 = arith.constant dense<0.000000e+00> : vector<10x16xf32>
    %268 = tpu.matmul %267, %246, %cst_265 {dimension_numbers = #tpu.dot_dimension_numbers<[1], [0], [0], [1], [0, 0, 1, 1], [], []>} : vector<10x16xf32>, vector<16x16xf32>, vector<10x16xf32> -> vector<10x16xf32>
    %269 = arith.addf %266, %268 : vector<10x16xf32>
    %c26_266 = arith.constant 26 : index
    %c0_267 = arith.constant 0 : index
    %270 = tpu.strided_load %arg29[%c26_266, %c0_267] {strides = array<i32: 2, 1>} : memref<48x16xf32, #tpu.memory_space<vmem>>, vector<10x16xf32>
    %cst_268 = arith.constant dense<0.000000e+00> : vector<10x16xf32>
    %271 = tpu.matmul %270, %247, %cst_268 {dimension_numbers = #tpu.dot_dimension_numbers<[1], [0], [0], [1], [0, 0, 1, 1], [], []>} : vector<10x16xf32>, vector<16x16xf32>, vector<10x16xf32> -> vector<10x16xf32>
    %272 = arith.addf %269, %271 : vector<10x16xf32>
    %273 = vector.broadcast %248 : vector<1x16xf32> to vector<10x16xf32>
    %274 = arith.addf %272, %273 : vector<10x16xf32>
    %275 = math.tanh %274 : vector<10x16xf32>
    %c0_269 = arith.constant 0 : index
    %c0_270 = arith.constant 0 : index
    %276 = vector.load %arg34[%c0_269, %c0_270] : memref<10x16xf32, #tpu.memory_space<vmem>>, vector<10x16xf32>
    tpu.vector_store %arg34[%c0_269, %c0_270], %275 {strides = array<i32>} : memref<10x16xf32, #tpu.memory_space<vmem>>, vector<10x16xf32>,
    %c0_271 = arith.constant 0 : index
    %c0_272 = arith.constant 0 : index
    %277 = tpu.strided_load %arg34[%c0_271, %c0_272] {strides = array<i32: 2, 1>} : memref<10x16xf32, #tpu.memory_space<vmem>>, vector<5x16xf32>
    %c1_273 = arith.constant 1 : index
    %c0_274 = arith.constant 0 : index
    %278 = tpu.strided_load %arg34[%c1_273, %c0_274] {strides = array<i32: 2, 1>} : memref<10x16xf32, #tpu.memory_space<vmem>>, vector<5x16xf32>
    %279 = arith.maximumf %277, %278 : vector<5x16xf32>
    %c8_275 = arith.constant 8 : index
    %c0_276 = arith.constant 0 : index
    %280 = vector.load %arg30[%c8_275, %c0_276] : memref<16x16xf32, #tpu.memory_space<vmem>>, vector<5x16xf32>
    tpu.vector_store %arg30[%c8_275, %c0_276], %279 {strides = array<i32>} : memref<16x16xf32, #tpu.memory_space<vmem>>, vector<5x16xf32>,
    %c0_277 = arith.constant 0 : index
    %c0_278 = arith.constant 0 : index
    %281 = tpu.strided_load %arg28[%c0_277, %c0_278] {strides = array<i32: 8, 1>} : memref<16x80xf32, #tpu.memory_space<vmem>>, vector<2x80xf32>
    %c0_279 = arith.constant 0 : index
    %c0_280 = arith.constant 0 : index
    %282 = vector.load %arg20[%c0_279, %c0_280] : memref<160x6xf32, #tpu.memory_space<vmem>>, vector<80x6xf32>
    %cst_281 = arith.constant dense<0.000000e+00> : vector<2x6xf32>
    %283 = tpu.matmul %281, %282, %cst_281 {dimension_numbers = #tpu.dot_dimension_numbers<[1], [0], [0], [1], [0, 0, 1, 1], [], []>} : vector<2x80xf32>, vector<80x6xf32>, vector<2x6xf32> -> vector<2x6xf32>
    %c1_282 = arith.constant 1 : index
    %c0_283 = arith.constant 0 : index
    %284 = tpu.strided_load %arg28[%c1_282, %c0_283] {strides = array<i32: 8, 1>} : memref<16x80xf32, #tpu.memory_space<vmem>>, vector<2x80xf32>
    %c80_284 = arith.constant 80 : index
    %c0_285 = arith.constant 0 : index
    %285 = vector.load %arg20[%c80_284, %c0_285] : memref<160x6xf32, #tpu.memory_space<vmem>>, vector<80x6xf32>
    %cst_286 = arith.constant dense<0.000000e+00> : vector<2x6xf32>
    %286 = tpu.matmul %284, %285, %cst_286 {dimension_numbers = #tpu.dot_dimension_numbers<[1], [0], [0], [1], [0, 0, 1, 1], [], []>} : vector<2x80xf32>, vector<80x6xf32>, vector<2x6xf32> -> vector<2x6xf32>
    %287 = arith.addf %283, %286 : vector<2x6xf32>
    %c0_287 = arith.constant 0 : index
    %c0_288 = arith.constant 0 : index
    %288 = tpu.strided_load %arg30[%c0_287, %c0_288] {strides = array<i32: 8, 1>} : memref<16x16xf32, #tpu.memory_space<vmem>>, vector<2x16xf32>
    %c0_289 = arith.constant 0 : index
    %c0_290 = arith.constant 0 : index
    %289 = vector.load %arg21[%c0_289, %c0_290] : memref<80x6xf32, #tpu.memory_space<vmem>>, vector<16x6xf32>
    %cst_291 = arith.constant dense<0.000000e+00> : vector<2x6xf32>
    %290 = tpu.matmul %288, %289, %cst_291 {dimension_numbers = #tpu.dot_dimension_numbers<[1], [0], [0], [1], [0, 0, 1, 1], [], []>} : vector<2x16xf32>, vector<16x6xf32>, vector<2x6xf32> -> vector<2x6xf32>
    %291 = arith.addf %287, %290 : vector<2x6xf32>
    %c1_292 = arith.constant 1 : index
    %c0_293 = arith.constant 0 : index
    %292 = tpu.strided_load %arg30[%c1_292, %c0_293] {strides = array<i32: 8, 1>} : memref<16x16xf32, #tpu.memory_space<vmem>>, vector<2x16xf32>
    %c16_294 = arith.constant 16 : index
    %c0_295 = arith.constant 0 : index
    %293 = vector.load %arg21[%c16_294, %c0_295] : memref<80x6xf32, #tpu.memory_space<vmem>>, vector<16x6xf32>
    %cst_296 = arith.constant dense<0.000000e+00> : vector<2x6xf32>
    %294 = tpu.matmul %292, %293, %cst_296 {dimension_numbers = #tpu.dot_dimension_numbers<[1], [0], [0], [1], [0, 0, 1, 1], [], []>} : vector<2x16xf32>, vector<16x6xf32>, vector<2x6xf32> -> vector<2x6xf32>
    %295 = arith.addf %291, %294 : vector<2x6xf32>
    %c2_297 = arith.constant 2 : index
    %c0_298 = arith.constant 0 : index
    %296 = tpu.strided_load %arg30[%c2_297, %c0_298] {strides = array<i32: 8, 1>} : memref<16x16xf32, #tpu.memory_space<vmem>>, vector<2x16xf32>
    %c32_299 = arith.constant 32 : index
    %c0_300 = arith.constant 0 : index
    %297 = vector.load %arg21[%c32_299, %c0_300] : memref<80x6xf32, #tpu.memory_space<vmem>>, vector<16x6xf32>
    %cst_301 = arith.constant dense<0.000000e+00> : vector<2x6xf32>
    %298 = tpu.matmul %296, %297, %cst_301 {dimension_numbers = #tpu.dot_dimension_numbers<[1], [0], [0], [1], [0, 0, 1, 1], [], []>} : vector<2x16xf32>, vector<16x6xf32>, vector<2x6xf32> -> vector<2x6xf32>
    %299 = arith.addf %295, %298 : vector<2x6xf32>
    %c3_302 = arith.constant 3 : index
    %c0_303 = arith.constant 0 : index
    %300 = tpu.strided_load %arg30[%c3_302, %c0_303] {strides = array<i32: 8, 1>} : memref<16x16xf32, #tpu.memory_space<vmem>>, vector<2x16xf32>
    %c48_304 = arith.constant 48 : index
    %c0_305 = arith.constant 0 : index
    %301 = vector.load %arg21[%c48_304, %c0_305] : memref<80x6xf32, #tpu.memory_space<vmem>>, vector<16x6xf32>
    %cst_306 = arith.constant dense<0.000000e+00> : vector<2x6xf32>
    %302 = tpu.matmul %300, %301, %cst_306 {dimension_numbers = #tpu.dot_dimension_numbers<[1], [0], [0], [1], [0, 0, 1, 1], [], []>} : vector<2x16xf32>, vector<16x6xf32>, vector<2x6xf32> -> vector<2x6xf32>
    %303 = arith.addf %299, %302 : vector<2x6xf32>
    %c4_307 = arith.constant 4 : index
    %c0_308 = arith.constant 0 : index
    %304 = tpu.strided_load %arg30[%c4_307, %c0_308] {strides = array<i32: 8, 1>} : memref<16x16xf32, #tpu.memory_space<vmem>>, vector<2x16xf32>
    %c64 = arith.constant 64 : index
    %c0_309 = arith.constant 0 : index
    %305 = vector.load %arg21[%c64, %c0_309] : memref<80x6xf32, #tpu.memory_space<vmem>>, vector<16x6xf32>
    %cst_310 = arith.constant dense<0.000000e+00> : vector<2x6xf32>
    %306 = tpu.matmul %304, %305, %cst_310 {dimension_numbers = #tpu.dot_dimension_numbers<[1], [0], [0], [1], [0, 0, 1, 1], [], []>} : vector<2x16xf32>, vector<16x6xf32>, vector<2x6xf32> -> vector<2x6xf32>
    %307 = arith.addf %303, %306 : vector<2x6xf32>
    %c0_311 = arith.constant 0 : index
    %c0_312 = arith.constant 0 : index
    %308 = vector.load %arg22[%c0_311, %c0_312] : memref<1x6xf32, #tpu.memory_space<vmem>>, vector<1x6xf32>
    %309 = vector.broadcast %308 : vector<1x6xf32> to vector<2x6xf32>
    %310 = arith.addf %307, %309 : vector<2x6xf32>
    %cst_313 = arith.constant dense<0xFF800000> : vector<2xf32>
    %311 = vector.multi_reduction <maximumf>, %310, %cst_313 [1] : vector<2x6xf32> to vector<2xf32>
    %312 = vector.shape_cast %311 : vector<2xf32> to vector<2x1xf32>
    %313 = vector.broadcast %312 : vector<2x1xf32> to vector<2x6xf32>
    %314 = arith.subf %310, %313 : vector<2x6xf32>
    %315 = math.exp %314 : vector<2x6xf32>
    %cst_314 = arith.constant dense<0.000000e+00> : vector<2xf32>
    %316 = vector.multi_reduction <add>, %315, %cst_314 [1] : vector<2x6xf32> to vector<2xf32>
    %317 = vector.shape_cast %316 : vector<2xf32> to vector<2x1xf32>
    %318 = tpu.reciprocal %317 {approx = true} : vector<2x1xf32> -> vector<2x1xf32>
    %319 = vector.broadcast %318 : vector<2x1xf32> to vector<2x6xf32>
    %320 = arith.mulf %315, %319 : vector<2x6xf32>
    %c0_315 = arith.constant 0 : index
    %c0_316 = arith.constant 0 : index
    %321 = vector.load %arg23[%c0_315, %c0_316] : memref<2x6xf32, #tpu.memory_space<vmem>>, vector<2x6xf32>
    tpu.vector_store %arg23[%c0_315, %c0_316], %320 {strides = array<i32>} : memref<2x6xf32, #tpu.memory_space<vmem>>, vector<2x6xf32>,
    return
  }
}

</mosaic_0001>

<bundles_post_ra>
// kernel: convnets_fft_forward.1
= control target key start
LH: loop header
LB: loop body
LE: loop exit
PB: predicated region body
PF: predicated region fallthrough
CT: control target
= control target key end

     0   :  { %s5083_s0 = inlined_call_operand.vmem [shape: f32[176,8], index: 0, kind: input, shape index: {}]   ;;  %s5084_s1 = inlined_call_operand.vmem [shape: f32[45,88], index: 1, kind: input, shape index: {}]   ;;  %s5085_s2 = inlined_call_operand.vmem [shape: f32[40,20], index: 2, kind: input, shape index: {}]   ;;  %s5086_s3 = inlined_call_operand.vmem [shape: f32[1,20], index: 3, kind: input, shape index: {}]   ;;  %s5087_s4 = inlined_call_operand.vmem [shape: f32[1,20], index: 4, kind: input, shape index: {}]   ;;  %s5088_s5 = inlined_call_operand.vmem [shape: f32[1,20], index: 5, kind: input, shape index: {}]   ;;  %s5089_s6 = inlined_call_operand.vmem [shape: f32[60,40], index: 6, kind: input, shape index: {}]   ;;  %s5090_s7 = inlined_call_operand.vmem [shape: f32[1,40], index: 7, kind: input, shape index: {}]   ;;  %s5091_s8 = inlined_call_operand.vmem [shape: f32[120,60], index: 8, kind: input, shape index: {}]   ;;  %s5092_s9 = inlined_call_operand.vmem [shape: f32[1,60], index: 9, kind: input, shape index: {}]   ;;  %s5093_s10 = inlined_call_operand.vmem [shape: f32[1,60], index: 10, kind: input, shape index: {}]   ;;  %s5094_s11 = inlined_call_operand.vmem [shape: f32[1,60], index: 11, kind: input, shape index: {}]   ;;  %s5095_s12 = inlined_call_operand.vmem [shape: f32[180,80], index: 12, kind: input, shape index: {}]   ;;  %s5096_s13 = inlined_call_operand.vmem [shape: f32[1,80], index: 13, kind: input, shape index: {}]   ;;  %s5097_s14 = inlined_call_operand.vmem [shape: f32[40,16], index: 14, kind: input, shape index: {}]   ;;  %s5098_s15 = inlined_call_operand.vmem [shape: f32[1,16], index: 15, kind: input, shape index: {}]   ;;  %s5099_s16 = inlined_call_operand.vmem [shape: f32[1,16], index: 16, kind: input, shape index: {}]   ;;  %s5100_s17 = inlined_call_operand.vmem [shape: f32[1,16], index: 17, kind: input, shape index: {}]   ;;  %s5101_s18 = inlined_call_operand.vmem [shape: f32[48,16], index: 18, kind: input, shape index: {}]   ;;  %s5102_s19 = inlined_call_operand.vmem [shape: f32[1,16], index: 19, kind: input, shape index: {}]   ;;  %s5103_s20 = inlined_call_operand.vmem [shape: f32[160,6], index: 20, kind: input, shape index: {}]   ;;  %s5104_s21 = inlined_call_operand.vmem [shape: f32[80,6], index: 21, kind: input, shape index: {}]   ;;  %s5105_s22 = inlined_call_operand.vmem [shape: f32[1,6], index: 22, kind: input, shape index: {}]   ;;  %s5106_s23 = inlined_call_operand.hbm [shape: f32[2,6], index: 23, kind: output, shape index: {}]  }
   0x1   :  { %5114 = sst [smem:[#allocation16_spill]] %s5083_s0 }
   0x2   :  { %5115 = sst [smem:[#allocation17_spill]] %s5084_s1 }
   0x3   :  { %5116 = sst [smem:[#allocation18_spill]] %s5085_s2 }
   0x4   :  { %5117 = sst [smem:[#allocation19_spill]] %s5086_s3 }
   0x5   :  { %5118 = sst [smem:[#allocation20_spill]] %s5087_s4 }
   0x6   :  { %5119 = sst [smem:[#allocation21_spill]] %s5088_s5 }
   0x7   :  { %5120 = sst [smem:[#allocation22_spill]] %s5089_s6 }
   0x8   :  { %5121 = sst [smem:[#allocation23_spill]] %s5090_s7 }
   0x9   :  { %5122 = sst [smem:[#allocation24_spill]] %s5100_s17 }
   0xa   :  { %s5123_s24 = sld [smem:[#allocation16_spill]]  ;;  %vm146_vm0 = vcmask 64512  }
   0xb   :  { %s5124_s17 = sld [smem:[#allocation18_spill]] }
  0x10   :  { %v91_v0 = vld [vmem:[%s5123_s24 + $0x50] sm:$0xff]  ;;  %v223_v3 = vld [vmem:[%s5123_s24 + $0x1] sm:$0xff]  ;;  %v3771_v10 = vld [vmem:[%s5123_s24 + $0x38] sm:$0xff] }
  0x11   :  { %v207_v1 = vld [vmem:[%s5124_s17 + $0x8] sm:$0xff]  ;;  %v3735_v2 = vld [vmem:[%s5124_s17] sm:$0xff]  ;;  %116 = vmatpush.msra.mxu0 %v91_v0  ;;  %v3776_v11 = vld [vmem:[%s5123_s24 + $0x98] sm:$0xff] }
  0x12   :  { %282 = vmatpush.msra.mxu2 %v207_v1  ;;  %v212_v4 = vld [vmem:[%s5123_s24] sm:$0xff]  ;;  %365 = vmatpush.msra.mxu3 %v3735_v2  ;;  %v3751_v6 = vld [vmem:[%s5123_s24 + $0x48] sm:$0xff]  ;;  %v3783_v12 = vld [vmem:[%s5123_s24 + $0x30] sm:$0xff] }
  0x13   :  { %v210_v5 = vld [vmem:[%s5124_s17 + $0x20] sm:$0xff]  ;;  %3298 = vmatmul.msk.f32.vlgmr.msra.gmra.mxu2 %vm146_vm0, %v223_v3  ;;  %v164_v7 = vld [vmem:[%s5123_s24 + $0xa8] sm:$0xff]  ;;  %3309 = vmatmul.msk.f32.vlgmr.msra.gmra.mxu3 %vm146_vm0, %v212_v4  ;;  %v3788_v13 = vld [vmem:[%s5123_s24 + $0x90] sm:$0xff] }
  0x14   :  { %669 = vmatpush.msrb.mxu2 %v210_v5  ;;  %v3760_v8 = vld [vmem:[%s5123_s24 + $0x40] sm:$0xff]  ;;  %117 = vmatpush.msra.mxu0 %v3751_v6  ;;  %v224_v14 = vld [vmem:[%s5123_s24 + $0x9] sm:$0xff]  ;;  %v84_v20 = vld [vmem:[%s5123_s24 + $0x18] sm:$0xff] }
  0x15   :  { %v3765_v9 = vld [vmem:[%s5123_s24 + $0xa0] sm:$0xff]  ;;  %170 = vmatpush.msra.mxu1 %v164_v7  ;;  %889 = vmatpush.msrb.mxu3 %v207_v1  ;;  %v213_v15 = vld [vmem:[%s5123_s24 + $0x8] sm:$0xff]  ;;  %v3824_v21 = vld [vmem:[%s5123_s24 + $0x78] sm:$0xff] }
  0x16   :  { %118 = vmatpush.msra.mxu0 %v3760_v8  ;;  %v86_v16 = vld [vmem:[%s5123_s24 + $0x28] sm:$0xff]  ;;  %v85_v18 = vld [vmem:[%s5123_s24 + $0x20] sm:$0xff]  ;;  %v83_v22 = vld [vmem:[%s5123_s24 + $0x10] sm:$0xff] }
  0x17   :  { %171 = vmatpush.msra.mxu1 %v3765_v9  ;;  %1276 = vmatpush.msra.mxu3 %v210_v5  ;;  %v3804_v17 = vld [vmem:[%s5123_s24 + $0x88] sm:$0xff]  ;;  %v3816_v19 = vld [vmem:[%s5123_s24 + $0x80] sm:$0xff]  ;;  %v3833_v23 = vld [vmem:[%s5123_s24 + $0x70] sm:$0xff] }
  0x18   :  { %119 = vmatpush.msra.mxu0 %v3771_v10  ;;  %v225_v24 = vld [vmem:[%s5123_s24 + $0x11] sm:$0xff]  ;;  %v3846_v26 = vld [vmem:[%s5123_s24 + $0x68] sm:$0xff]  ;;  %v3854_v27 = vld [vmem:[%s5123_s24 + $0x60] sm:$0xff] }
  0x19   :  { %172 = vmatpush.msra.mxu1 %v3776_v11  ;;  %v209_v25 = vld [vmem:[%s5124_s17 + $0x18] sm:$0xff] }
  0x1a   :  { %120 = vmatpush.msra.mxu0 %v3783_v12  ;;  %1171 = vmatpush.msra.mxu2 %v209_v25 }
  0x1b   :  { %173 = vmatpush.msra.mxu1 %v3788_v13  ;;  %3299 = vmatmul.msk.f32.gmra.mxu2 %vm146_vm0, %v224_v14 }
  0x1c   :  { %3310 = vmatmul.msk.f32.gmra.mxu3 %vm146_vm0, %v213_v15  ;;  %121 = vmatpush.msra.mxu0 %v86_v16 }
  0x1d   :  { %174 = vmatpush.msra.mxu1 %v3804_v17 }
  0x1e   :  { %122 = vmatpush.msra.mxu0 %v85_v18 }
  0x1f   :  { %175 = vmatpush.msra.mxu1 %v3816_v19 }
  0x20   :  { %123 = vmatpush.msra.mxu0 %v84_v20 }
  0x21   :  { %176 = vmatpush.msra.mxu1 %v3824_v21 }
  0x22   :  { %124 = vmatpush.msra.mxu0 %v83_v22 }
  0x23   :  { %177 = vmatpush.msra.mxu1 %v3833_v23  ;;  %3300 = vmatmul.msk.f32.gmra.mxu2 %vm146_vm0, %v225_v24 }
  0x24   :  { %3311 = vmatmul.msk.f32.gmra.mxu3 %vm146_vm0, %v83_v22 }
  0x25   :  { %28 = vsyncpa [#allocation14], 0  ;;  %125 = vmatpush.msra.mxu0 %v213_v15  ;;  %178 = vmatpush.msra.mxu1 %v3846_v26  ;;  %s5125_s25 = sld [smem:[#allocation17_spill]]  ;;  %vm92_vm1 = vcmask 719872   ;;  %v3863_v29 = vld [vmem:[%s5123_s24 + $0x58] sm:$0xff]  ;;  %v208_v30 = vld [vmem:[%s5124_s17 + $0x10] sm:$0xff] }
  0x26   :  { %v226_v31 = vld [vmem:[%s5123_s24 + $0x19] sm:$0xff]  ;;  %v227_v33 = vld [vmem:[%s5123_s24 + $0x21] sm:$0xff]  ;;  %v228_v35 = vld [vmem:[%s5123_s24 + $0x29] sm:$0xff]  ;;  %vm152_vm2 = vcmask 61440   ;;  %s5126_s30 = sld [smem:[#allocation19_spill]]  ;;  %vm1444_vm3 = vcmask 1043456  }
  0x27   :  { %126 = vmatpush.msra.mxu0 %v212_v4  ;;  %179 = vmatpush.msra.mxu1 %v3854_v27  ;;  %v229_v37 = vld [vmem:[%s5123_s24 + $0x31] sm:$0xff]  ;;  %v230_v39 = vld [vmem:[%s5123_s24 + $0x39] sm:$0xff]  ;;  %v231_v41 = vld [vmem:[%s5123_s24 + $0x41] sm:$0xff]  ;;  %s5127_s2 = sld [smem:[#allocation22_spill]]  ;;  %vm770_vm4 = vcmask 162816   ;;  %vm781_vm5 = vcmask 158720  }
  0x28   :  { %v400_v42 = vld [vmem:[%s5123_s24 + $0x2] sm:$0xff]  ;;  %v401_v45 = vld [vmem:[%s5123_s24 + $0xa] sm:$0xff]  ;;  %v402_v49 = vld [vmem:[%s5123_s24 + $0x12] sm:$0xff]  ;;  %s5128_s4 = sld [smem:[#allocation20_spill]]  ;;  %vm817_vm6 = vcmask 156672   ;;  %vm1603_vm7 = vcmask 326656  }
  0x29   :  { %180 = vmatpush.msra.mxu1 %v3863_v29  ;;  %459 = vmatpush.msrb.mxu0 %v208_v30  ;;  %v505_v43 = vld [vmem:[%s5123_s24 + $0x3] sm:$0xff]  ;;  %v506_v46 = vld [vmem:[%s5123_s24 + $0xb] sm:$0xff]  ;;  %v507_v50 = vld [vmem:[%s5123_s24 + $0x13] sm:$0xff]  ;;  %s5129_s26 = sld [smem:[#allocation21_spill]]  ;;  %vm1625_vm8 = vcmask 322560   ;;  %vm1971_vm9 = vcmask 490496  }
  0x2a   :  { %v232_v44 = vld [vmem:[%s5123_s24 + $0x49] sm:$0xff]  ;;  %v233_v47 = vld [vmem:[%s5123_s24 + $0x51] sm:$0xf]  ;;  %v830_v52 = vld [vmem:[%s5123_s24 + $0x59] sm:$0xff]  ;;  %s5130_s6 = sld [smem:[#allocation23_spill]]  ;;  %vm1974_vm10 = vcmask 484352  }
  0x2b   :  { %v75_v28 = vld [vmem:[%s5125_s25] sm:$0xff]  ;;  %564 = vmatpush.msrb.mxu1 %v209_v25  ;;  %3301 = vmatmul.msk.f32.gmra.mxu2 %vm146_vm0, %v226_v31  ;;  %v76_v32 = vld [vmem:[%s5125_s25 + $0x8] sm:$0xff]  ;;  %v77_v34 = vld [vmem:[%s5125_s25 + $0x10] sm:$0xff]  ;;  %vm1983_vm11 = vcmask 488448   ;;  %vm2245_vm12 = vcmask 648192   ;;  %s5131_s0 = sld [smem:[#allocation24_spill]] }
  0x2c   :  { %3286 = vmatmul.msk.f32.vlgmr.msra.gmra.mxu0 %vm92_vm1, %v75_v28  ;;  %3292 = vmatmul.msk.f32.vlgmr.msra.gmra.mxu1 %vm92_vm1, %v75_v28  ;;  %v78_v36 = vld [vmem:[%s5125_s25 + $0x18] sm:$0xff]  ;;  %v79_v38 = vld [vmem:[%s5125_s25 + $0x20] sm:$0xff]  ;;  %v80_v40 = vld [vmem:[%s5125_s25 + $0x28] sm:$0x1f]  ;;  %vm2568_vm13 = vcmask 130048   ;;  %vm2571_vm14 = vcmask 126976  }
  0x2d   :  { %972 = vmatpush.msra.mxu0 %v3735_v2  ;;  %3312 = vmatmul.msk.f32.gmra.mxu3 %vm146_vm0, %v84_v20  ;;  %v222_v48 = vld [vmem:[%s5123_s24 + $0x50] sm:$0xf]  ;;  %v610_v51 = vld [vmem:[%s5123_s24 + $0x4] sm:$0xff]  ;;  %v403_v53 = vld [vmem:[%s5123_s24 + $0x1a] sm:$0xff]  ;;  %vm3066_vm15 = vcmask 654336  }
  0x2e   :  { %1066 = vmatpush.msra.mxu1 %v208_v30  ;;  %v508_v54 = vld [vmem:[%s5123_s24 + $0x1b] sm:$0xff]  ;;  %v611_v55 = vld [vmem:[%s5123_s24 + $0xc] sm:$0xff]  ;;  %v509_v58 = vld [vmem:[%s5123_s24 + $0x23] sm:$0xff] }
  0x2f   :  { %v831_v56 = vld [vmem:[%s5123_s24 + $0x61] sm:$0xff]  ;;  %v612_v59 = vld [vmem:[%s5123_s24 + $0x14] sm:$0xff]  ;;  %v832_v60 = vld [vmem:[%s5123_s24 + $0x69] sm:$0xff] }
  0x30   :  { %v404_v57 = vld [vmem:[%s5123_s24 + $0x22] sm:$0xff]  ;;  %v405_v61 = vld [vmem:[%s5123_s24 + $0x2a] sm:$0xff]  ;;  %v406_v1 = vld [vmem:[%s5123_s24 + $0x32] sm:$0xff] }
  0x31   :  { %v510_v62 = vld [vmem:[%s5123_s24 + $0x2b] sm:$0xff]  ;;  %v613_v63 = vld [vmem:[%s5123_s24 + $0x1c] sm:$0xff]  ;;  %v511_v2 = vld [vmem:[%s5123_s24 + $0x33] sm:$0xff] }
  0x32   :  { %v833_v0 = vld [vmem:[%s5123_s24 + $0x71] sm:$0xff]  ;;  %v614_v3 = vld [vmem:[%s5123_s24 + $0x24] sm:$0xff]  ;;  %v834_v4 = vld [vmem:[%s5123_s24 + $0x79] sm:$0xff] }
  0x33   :  { %3302 = vmatmul.msk.f32.gmra.mxu2 %vm146_vm0, %v227_v33  ;;  %v407_v5 = vld [vmem:[%s5123_s24 + $0x3a] sm:$0xff]  ;;  %v615_v7 = vld [vmem:[%s5123_s24 + $0x2c] sm:$0xff]  ;;  %v513_v15 = vld [vmem:[%s5123_s24 + $0x43] sm:$0xff] }
  0x34   :  { %3287 = vmatmul.msk.f32.gmra.mxu0 %vm92_vm1, %v76_v32  ;;  %3293 = vmatmul.msk.f32.gmra.mxu1 %vm92_vm1, %v76_v32  ;;  %v836_v20 = vld [vmem:[%s5123_s24 + $0x89] sm:$0xff]  ;;  %v617_v31 = vld [vmem:[%s5123_s24 + $0x3c] sm:$0xff]  ;;  %v837_v32 = vld [vmem:[%s5123_s24 + $0x91] sm:$0xff] }
  0x35   :  { %3313 = vmatmul.msk.f32.gmra.mxu3 %vm146_vm0, %v85_v18  ;;  %v616_v18 = vld [vmem:[%s5123_s24 + $0x34] sm:$0xff]  ;;  %v409_v22 = vld [vmem:[%s5123_s24 + $0x4a] sm:$0xff] }
  0x36   :  { %v514_v28 = vld [vmem:[%s5123_s24 + $0x4b] sm:$0xff] }
  0x3b   :  { %3303 = vmatmul.msk.f32.gmra.mxu2 %vm146_vm0, %v228_v35 }
  0x3c   :  { %3288 = vmatmul.msk.f32.gmra.mxu0 %vm92_vm1, %v77_v34  ;;  %3294 = vmatmul.msk.f32.gmra.mxu1 %vm92_vm1, %v77_v34  ;;  %v410_v34 = vld [vmem:[%s5123_s24 + $0x52] sm:$0xf] }
  0x3d   :  { %3314 = vmatmul.msk.f32.gmra.mxu3 %vm146_vm0, %v86_v16 }
  0x43   :  { %3304 = vmatmul.msk.f32.gmra.mxu2 %vm146_vm0, %v229_v37  ;;  %v515_v37 = vld [vmem:[%s5123_s24 + $0x53] sm:$0xf] }
  0x44   :  { %3289 = vmatmul.msk.f32.gmra.mxu0 %vm92_vm1, %v78_v36  ;;  %3295 = vmatmul.msk.f32.gmra.mxu1 %vm92_vm1, %v78_v36 }
  0x45   :  { %3315 = vmatmul.msk.f32.gmra.mxu3 %vm146_vm0, %v3783_v12 }
  0x4b   :  { %3305 = vmatmul.msk.f32.gmra.mxu2 %vm146_vm0, %v230_v39 }
  0x4c   :  { %3290 = vmatmul.msk.f32.gmra.mxu0 %vm92_vm1, %v79_v38  ;;  %3296 = vmatmul.msk.f32.gmra.mxu1 %vm92_vm1, %v79_v38 }
  0x4d   :  { %3316 = vmatmul.msk.f32.gmra.mxu3 %vm146_vm0, %v3771_v10  ;;  %v408_v10 = vld [vmem:[%s5123_s24 + $0x42] sm:$0xff] }
  0x53   :  { %3306 = vmatmul.msk.f32.gmra.mxu2 %vm146_vm0, %v231_v41  ;;  %v838_v41 = vld [vmem:[%s5123_s24 + $0x99] sm:$0xff] }
  0x54   :  { %3291 = vmatmul.msk.f32.gmra.mxu0 %vm92_vm1, %v80_v40  ;;  %3297 = vmatmul.msk.f32.gmra.mxu1 %vm92_vm1, %v80_v40  ;;  %v618_v40 = vld [vmem:[%s5123_s24 + $0x44] sm:$0xff]  ;;  %vm3257_vm1 = vcmask 41984  }
  0x55   :  { %3317 = vmatmul.msk.f32.gmra.mxu3 %vm146_vm0, %v3760_v8  ;;  %v835_v8 = vld [vmem:[%s5123_s24 + $0x81] sm:$0xff] }
  0x5b   :  { %3307 = vmatmul.msk.f32.gmra.mxu2 %vm146_vm0, %v232_v44 }
  0x5c   :  { %3320 = vmatmul.msk.f32.vlgmr.msrb.gmra.mxu0 %vm146_vm0, %v400_v42  ;;  %3331 = vmatmul.msk.f32.vlgmr.msrb.gmra.mxu1 %vm146_vm0, %v505_v43 }
  0x5d   :  { %3318 = vmatmul.msk.f32.gmra.mxu3 %vm146_vm0, %v3751_v6  ;;  %v512_v6 = vld [vmem:[%s5123_s24 + $0x3b] sm:$0xff] }
  0x63   :  { %3308 = vmatmul.msk.f32.gmra.mxu2 %vm146_vm0, %v233_v47 }
  0x64   :  { %3321 = vmatmul.msk.f32.gmra.mxu0 %vm146_vm0, %v401_v45  ;;  %3332 = vmatmul.msk.f32.gmra.mxu1 %vm146_vm0, %v506_v46  ;;  %v1007_v45 = vld [vmem:[%s5123_s24 + $0x5a] sm:$0xff] }
  0x65   :  { %3319 = vmatmul.msk.f32.gmra.mxu3 %vm146_vm0, %v222_v48  ;;  %v619_v48 = vld [vmem:[%s5123_s24 + $0x4c] sm:$0xff] }
  0x6b   :  { %3342 = vmatmul.msk.f32.vlgmr.msrb.gmra.mxu2 %vm146_vm0, %v610_v51 }
  0x6c   :  { %3322 = vmatmul.msk.f32.gmra.mxu0 %vm146_vm0, %v402_v49  ;;  %3333 = vmatmul.msk.f32.gmra.mxu1 %vm146_vm0, %v507_v50  ;;  %v839_v49 = vld [vmem:[%s5123_s24 + $0xa1] sm:$0xff] }
  0x6d   :  { %3353 = vmatmul.msk.f32.vlgmr.msrb.gmra.mxu3 %vm146_vm0, %v830_v52  ;;  %v1008_v52 = vld [vmem:[%s5123_s24 + $0x62] sm:$0xff] }
  0x73   :  { %3343 = vmatmul.msk.f32.gmra.mxu2 %vm146_vm0, %v611_v55  ;;  %v620_v55 = vld [vmem:[%s5123_s24 + $0x54] sm:$0xf] }
  0x74   :  { %3323 = vmatmul.msk.f32.gmra.mxu0 %vm146_vm0, %v403_v53  ;;  %3334 = vmatmul.msk.f32.gmra.mxu1 %vm146_vm0, %v508_v54 }
  0x75   :  { %3354 = vmatmul.msk.f32.gmra.mxu3 %vm146_vm0, %v831_v56  ;;  %v840_v56 = vld [vmem:[%s5123_s24 + $0xa9] sm:$0xf] }
  0x7b   :  { %3344 = vmatmul.msk.f32.gmra.mxu2 %vm146_vm0, %v612_v59  ;;  %v1009_v59 = vld [vmem:[%s5123_s24 + $0x6a] sm:$0xff] }
  0x7c   :  { %3324 = vmatmul.msk.f32.gmra.mxu0 %vm146_vm0, %v404_v57  ;;  %3335 = vmatmul.msk.f32.gmra.mxu1 %vm146_vm0, %v509_v58 }
  0x7d   :  { %3355 = vmatmul.msk.f32.gmra.mxu3 %vm146_vm0, %v832_v60 }
  0x83   :  { %3345 = vmatmul.msk.f32.gmra.mxu2 %vm146_vm0, %v613_v63  ;;  %v1217_v63 = vld [vmem:[%s5123_s24 + $0x5c] sm:$0xff] }
  0x84   :  { %3325 = vmatmul.msk.f32.gmra.mxu0 %vm146_vm0, %v405_v61  ;;  %3336 = vmatmul.msk.f32.gmra.mxu1 %vm146_vm0, %v510_v62  ;;  %v1112_v62 = vld [vmem:[%s5123_s24 + $0x5b] sm:$0xff] }
  0x85   :  { %3356 = vmatmul.msk.f32.gmra.mxu3 %vm146_vm0, %v833_v0 }
  0x8b   :  { %3346 = vmatmul.msk.f32.gmra.mxu2 %vm146_vm0, %v614_v3 }
  0x8c   :  { %3326 = vmatmul.msk.f32.gmra.mxu0 %vm146_vm0, %v406_v1  ;;  %3337 = vmatmul.msk.f32.gmra.mxu1 %vm146_vm0, %v511_v2  ;;  %v1010_v2 = vld [vmem:[%s5123_s24 + $0x72] sm:$0xff] }
  0x8d   :  { %3357 = vmatmul.msk.f32.gmra.mxu3 %vm146_vm0, %v834_v4 }
  0x93   :  { %3347 = vmatmul.msk.f32.gmra.mxu2 %vm146_vm0, %v615_v7 }
  0x94   :  { %3327 = vmatmul.msk.f32.gmra.mxu0 %vm146_vm0, %v407_v5  ;;  %3338 = vmatmul.msk.f32.gmra.mxu1 %vm146_vm0, %v512_v6  ;;  %v1113_v5 = vld [vmem:[%s5123_s24 + $0x63] sm:$0xff] }
  0x95   :  { %3358 = vmatmul.msk.f32.gmra.mxu3 %vm146_vm0, %v835_v8  ;;  %v1218_v6 = vld [vmem:[%s5123_s24 + $0x64] sm:$0xff] }
  0x96   :  { %v284_v12 = vpop.f32.mrf.mxu2  ;;  %v367_v14 = vpop.f32.mrf.mxu3 }
  0x97   :  { %v4063_v16 = vadd.f32 %v367_v14, %v284_v12 }
  0x9b   :  { %3348 = vmatmul.msk.f32.gmra.mxu2 %vm146_vm0, %v616_v18  ;;  %v1219_v18 = vld [vmem:[%s5123_s24 + $0x6c] sm:$0xff] }
  0x9c   :  { %3328 = vmatmul.msk.f32.gmra.mxu0 %vm146_vm0, %v408_v10  ;;  %3339 = vmatmul.msk.f32.gmra.mxu1 %vm146_vm0, %v513_v15  ;;  %v1011_v10 = vld [vmem:[%s5123_s24 + $0x7a] sm:$0xff]  ;;  %v1114_v15 = vld [vmem:[%s5123_s24 + $0x6b] sm:$0xff] }
  0x9d   :  { %3359 = vmatmul.msk.f32.gmra.mxu3 %vm146_vm0, %v836_v20 }
  0x9e   :  { %v287_v24 = vpop.f32.mrf.mxu2 }
  0x9f   :  { %v370_v25 = vpop.f32.mrf.mxu3 }
  0xa0   :  { %v4081_v30 = vadd.f32 %v370_v25, %v287_v24 }
  0xa3   :  { %3349 = vmatmul.msk.f32.gmra.mxu2 %vm146_vm0, %v617_v31  ;;  %v1115_v31 = vld [vmem:[%s5123_s24 + $0x73] sm:$0xff] }
  0xa4   :  { %3329 = vmatmul.msk.f32.gmra.mxu0 %vm146_vm0, %v409_v22  ;;  %3340 = vmatmul.msk.f32.gmra.mxu1 %vm146_vm0, %v514_v28 }
  0xa5   :  { %3360 = vmatmul.msk.f32.gmra.mxu3 %vm146_vm0, %v837_v32  ;;  %v1220_v32 = vld [vmem:[%s5123_s24 + $0x74] sm:$0xff] }
  0xa6   :  { %v290_v36 = vpop.f32.mrf.mxu2 }
  0xa7   :  { %v373_v38 = vpop.f32.mrf.mxu3 }
  0xa8   :  { %v4102_v39 = vadd.f32 %v373_v38, %v290_v36  ;;  %v1221_v38 = vld [vmem:[%s5123_s24 + $0x7c] sm:$0xff] }
  0xa9   :  { %v128_v33 = vpop.f32.mrf.mxu0  ;;  %v182_v35 = vpop.f32.mrf.mxu1 }
  0xaa   :  { %147 = vst.msk [vmem:[#allocation2] sm:$0xff] %vm146_vm0, %v128_v33 }
  0xab   :  { %200 = vst.msk [vmem:[#allocation2 + $0x30] sm:$0xff] %vm146_vm0, %v182_v35  ;;  %3350 = vmatmul.msk.f32.gmra.mxu2 %vm146_vm0, %v618_v40  ;;  %v1013_v35 = vld [vmem:[%s5123_s24 + $0x8a] sm:$0xff] }
  0xac   :  { %3330 = vmatmul.msk.f32.gmra.mxu0 %vm146_vm0, %v410_v34  ;;  %3341 = vmatmul.msk.f32.gmra.mxu1 %vm146_vm0, %v515_v37  ;;  %v1116_v37 = vld [vmem:[%s5123_s24 + $0x7b] sm:$0xff] }
  0xad   :  { %3361 = vmatmul.msk.f32.gmra.mxu3 %vm146_vm0, %v838_v41 }
  0xae   :  { %v293_v44 = vpop.f32.mrf.mxu2 }
  0xb0   :  { %v376_v46 = vpop.f32.mrf.mxu3 }
  0xb1   :  { %v131_v42 = vpop.f32.mrf.mxu0  ;;  %v185_v43 = vpop.f32.mrf.mxu1  ;;  %v4120_v47 = vadd.f32 %v376_v46, %v293_v44  ;;  %v1117_v44 = vld [vmem:[%s5123_s24 + $0x83] sm:$0xff] }
  0xb2   :  { %148 = vst.msk [vmem:[#allocation2 + $0x8] sm:$0xff] %vm146_vm0, %v131_v42 }
  0xb3   :  { %201 = vst.msk [vmem:[#allocation2 + $0x38] sm:$0xff] %vm146_vm0, %v185_v43  ;;  %3351 = vmatmul.msk.f32.gmra.mxu2 %vm146_vm0, %v619_v48 }
  0xb4   :  { %3364 = vmatmul.msk.f32.vlgmr.msra.gmra.mxu0 %vm146_vm0, %v3863_v29  ;;  %3375 = vmatmul.msk.f32.vlgmr.msra.gmra.mxu1 %vm146_vm0, %v1007_v45  ;;  %v1222_v45 = vld [vmem:[%s5123_s24 + $0x84] sm:$0xff] }
  0xb5   :  { %3362 = vmatmul.msk.f32.gmra.mxu3 %vm146_vm0, %v839_v49 }
  0xb6   :  { %v296_v51 = vpop.f32.mrf.mxu2 }
  0xb8   :  { %v379_v53 = vpop.f32.mrf.mxu3 }
  0xb9   :  { %v134_v50 = vpop.f32.mrf.mxu0  ;;  %v188_v29 = vpop.f32.mrf.mxu1  ;;  %v4138_v54 = vadd.f32 %v379_v53, %v296_v51  ;;  %v4269_v51 = vld [vmem:[%s5127_s2 + $0x10] sm:$0xf] }
  0xba   :  { %149 = vst.msk [vmem:[#allocation2 + $0x10] sm:$0xff] %vm146_vm0, %v134_v50  ;;  %3414 = vmatpush.msk.msrb.mxu1 %vm1444_vm3, %v4269_v51 }
  0xbb   :  { %202 = vst.msk [vmem:[#allocation2 + $0x40] sm:$0xff] %vm146_vm0, %v188_v29  ;;  %3352 = vmatmul.msk.f32.gmra.mxu2 %vm146_vm0, %v620_v55  ;;  %v1118_v55 = vld [vmem:[%s5123_s24 + $0x8b] sm:$0xff] }
  0xbc   :  { %3365 = vmatmul.msk.f32.gmra.mxu0 %vm146_vm0, %v3854_v27  ;;  %3376 = vmatmul.msk.f32.gmra.mxu1 %vm146_vm0, %v1008_v52 }
  0xbd   :  { %3363 = vmatmul.msk.f32.gmra.mxu3 %vm146_vm0, %v840_v56  ;;  %v1223_v56 = vld [vmem:[%s5123_s24 + $0x8c] sm:$0xff] }
  0xbe   :  { %v299_v58 = vpop.f32.mrf.mxu2 }
  0xc0   :  { %v382_v60 = vpop.f32.mrf.mxu3 }
  0xc1   :  { %v137_v57 = vpop.f32.mrf.mxu0  ;;  %v191_v27 = vpop.f32.mrf.mxu1  ;;  %v4156_v61 = vadd.f32 %v382_v60, %v299_v58  ;;  %v4293_v58 = vld [vmem:[%s5128_s4] ss:$0 sm:$0xff] }
  0xc2   :  { %150 = vst.msk [vmem:[#allocation2 + $0x18] sm:$0xff] %vm146_vm0, %v137_v57  ;;  %v4286_v57 = vld [vmem:[%s5127_s2 + $0x8] sm:$0xff] }
  0xc3   :  { %203 = vst.msk [vmem:[#allocation2 + $0x48] sm:$0xff] %vm146_vm0, %v191_v27  ;;  %3386 = vmatmul.msk.f32.vlgmr.msra.gmra.mxu2 %vm146_vm0, %v1112_v62  ;;  %1512 = vmatpush.msrb.mxu1 %v4286_v57 }
  0xc4   :  { %3366 = vmatmul.msk.f32.gmra.mxu0 %vm146_vm0, %v3846_v26  ;;  %3377 = vmatmul.msk.f32.gmra.mxu1 %vm146_vm0, %v1009_v59  ;;  %v4300_v59 = vld [vmem:[%s5127_s2] sm:$0xff] }
  0xc5   :  { %3397 = vmatmul.msk.f32.vlgmr.msra.gmra.mxu3 %vm146_vm0, %v1217_v63  ;;  %1513 = vmatpush.msrb.mxu1 %v4300_v59 }
  0xc6   :  { %v302_v1 = vpop.f32.mrf.mxu2 }
  0xc8   :  { %v385_v3 = vpop.f32.mrf.mxu3 }
  0xc9   :  { %v140_v0 = vpop.f32.mrf.mxu0  ;;  %v194_v26 = vpop.f32.mrf.mxu1  ;;  %v4174_v4 = vadd.f32 %v385_v3, %v302_v1 }
  0xca   :  { %151 = vst.msk [vmem:[#allocation2 + $0x20] sm:$0xff] %vm146_vm0, %v140_v0 }
  0xcb   :  { %204 = vst.msk [vmem:[#allocation2 + $0x50] sm:$0xff] %vm146_vm0, %v194_v26  ;;  %3387 = vmatmul.msk.f32.gmra.mxu2 %vm146_vm0, %v1113_v5 }
  0xcc   :  { %3367 = vmatmul.msk.f32.gmra.mxu0 %vm146_vm0, %v3833_v23  ;;  %3378 = vmatmul.msk.f32.gmra.mxu1 %vm146_vm0, %v1010_v2  ;;  %v1016_v2 = vld [vmem:[%s5123_s24 + $0xa2] sm:$0xff] }
  0xcd   :  { %3398 = vmatmul.msk.f32.gmra.mxu3 %vm146_vm0, %v1218_v6 }
  0xce   :  { %v305_v8 = vpop.f32.mrf.mxu2 }
  0xd0   :  { %v388_v12 = vpop.f32.mrf.mxu3 }
  0xd1   :  { %v143_v7 = vpop.f32.mrf.mxu0  ;;  %v197_v23 = vpop.f32.mrf.mxu1  ;;  %v4190_v14 = vadd.f32 %v388_v12, %v305_v8 }
  0xd2   :  { %153 = vst.msk [vmem:[#allocation2 + $0x28] sm:$0x1f] %vm152_vm2, %v143_v7  ;;  %v1119_v7 = vld [vmem:[%s5123_s24 + $0x93] sm:$0xff] }
  0xd3   :  { %205 = vst.msk [vmem:[#allocation2 + $0x58] sm:$0x1f] %vm152_vm2, %v197_v23  ;;  %3388 = vmatmul.msk.f32.gmra.mxu2 %vm146_vm0, %v1114_v15  ;;  %v1224_v23 = vld [vmem:[%s5123_s24 + $0x94] sm:$0xff]  ;;  %v829_v15 = vld [vmem:[%s5123_s24 + $0xa8] sm:$0xf] }
  0xd4   :  { %3368 = vmatmul.msk.f32.gmra.mxu0 %vm146_vm0, %v3824_v21  ;;  %3379 = vmatmul.msk.f32.gmra.mxu1 %vm146_vm0, %v1011_v10  ;;  %v1012_v21 = vld [vmem:[%s5123_s24 + $0x82] sm:$0xff] }
  0xd5   :  { %3399 = vmatmul.msk.f32.gmra.mxu3 %vm146_vm0, %v1219_v18 }
  0xd6   :  { %v308_v22 = vpop.f32.mrf.mxu2 }
  0xd8   :  { %v391_v25 = vpop.f32.mrf.mxu3 }
  0xd9   :  { %v461_v20 = vpop.f32.mrf.mxu0  ;;  %v566_v24 = vpop.f32.mrf.mxu1  ;;  %v4206_v28 = vadd.f32 %v391_v25, %v308_v22  ;;  %v1417_v25 = vld [vmem:[%s5127_s2 + $0x38] sm:$0xf] }
  0xda   :  { %v494_v46 = vadd.f32 %v461_v20, %v4063_v16  ;;  %v1015_v16 = vld [vmem:[%s5123_s24 + $0x9a] sm:$0xff]  ;;  %3420 = vmatpush.msk.msrb.mxu2 %vm1444_vm3, %v1417_v25  ;;  %3438 = vmatpush.msk.msra.mxu1 %vm1444_vm3, %v1417_v25 }
  0xdb   :  { %3389 = vmatmul.msk.f32.gmra.mxu2 %vm146_vm0, %v1115_v31 }
  0xdc   :  { %3369 = vmatmul.msk.f32.gmra.mxu0 %vm146_vm0, %v3816_v19  ;;  %3380 = vmatmul.msk.f32.gmra.mxu1 %vm146_vm0, %v1012_v21  ;;  %v599_v49 = vadd.f32 %v566_v24, %v494_v46  ;;  %v1017_v24 = vld [vmem:[%s5123_s24 + $0xaa] sm:$0xf]  ;;  %v1414_v21 = vld [vmem:[%s5127_s2 + $0x24] sm:$0xf] }
  0xdd   :  { %3400 = vmatmul.msk.f32.gmra.mxu3 %vm146_vm0, %v1220_v32  ;;  %3408 = vmatpush.msk.msrb.mxu0 %vm1444_vm3, %v1414_v21 }
  0xde   :  { %v4217_v34 = vpop.f32.mrf.mxu2  ;;  %3426 = vmatpush.msk.msrb.mxu3 %vm1444_vm3, %v1414_v21 }
  0xe0   :  { %v4222_v36 = vpop.f32.mrf.mxu3 }
  0xe1   :  { %v464_v33 = vpop.f32.mrf.mxu0  ;;  %v569_v19 = vpop.f32.mrf.mxu1 }
  0xe3   :  { %3390 = vmatmul.msk.f32.gmra.mxu2 %vm146_vm0, %v1116_v37  ;;  %v1413_v37 = vld [vmem:[%s5127_s2 + $0x1c] sm:$0xff] }
  0xe4   :  { %3370 = vmatmul.msk.f32.gmra.mxu0 %vm146_vm0, %v3804_v17  ;;  %3381 = vmatmul.msk.f32.gmra.mxu1 %vm146_vm0, %v1013_v35  ;;  %v1014_v17 = vld [vmem:[%s5123_s24 + $0x92] sm:$0xff]  ;;  %v1225_v35 = vld [vmem:[%s5123_s24 + $0x9c] sm:$0xff] }
  0xe5   :  { %3401 = vmatmul.msk.f32.gmra.mxu3 %vm146_vm0, %v1221_v38  ;;  %v1416_v38 = vld [vmem:[%s5127_s2 + $0x30] sm:$0xff]  ;;  %1462 = vmatpush.msrb.mxu0 %v1413_v37 }
  0xe6   :  { %v4235_v41 = vpop.f32.mrf.mxu2  ;;  %1567 = vmatpush.msrb.mxu2 %v1416_v38  ;;  %1666 = vmatpush.msrb.mxu3 %v1413_v37 }
  0xe7   :  { %1765 = vmatpush.msra.mxu1 %v1416_v38 }
  0xe8   :  { %v4240_v43 = vpop.f32.mrf.mxu3 }
  0xe9   :  { %v467_v40 = vpop.f32.mrf.mxu0  ;;  %v572_v42 = vpop.f32.mrf.mxu1 }
  0xea   :  { %v496_v8 = vadd.f32 %v467_v40, %v4102_v39 }
  0xeb   :  { %3391 = vmatmul.msk.f32.gmra.mxu2 %vm146_vm0, %v1117_v44  ;;  %v1415_v44 = vld [vmem:[%s5127_s2 + $0x28] sm:$0xff] }
  0xec   :  { %3371 = vmatmul.msk.f32.gmra.mxu0 %vm146_vm0, %v3788_v13  ;;  %3382 = vmatmul.msk.f32.gmra.mxu1 %vm146_vm0, %v1014_v17  ;;  %v4259_v13 = vld [vmem:[%s5126_s30] ss:$0 sm:$0xff]  ;;  %v601_v18 = vadd.f32 %v572_v42, %v496_v8  ;;  %v1412_v17 = vld [vmem:[%s5127_s2 + $0x14] sm:$0xff]  ;;  %v1227_v8 = vld [vmem:[%s5123_s24 + $0xac] sm:$0xf] }
  0xed   :  { %3402 = vmatmul.msk.f32.gmra.mxu3 %vm146_vm0, %v1222_v45  ;;  %1463 = vmatpush.msrb.mxu0 %v1412_v17 }
  0xee   :  { %v671_v29 = vpop.f32.mrf.mxu2  ;;  %1568 = vmatpush.msrb.mxu2 %v1415_v44  ;;  %1667 = vmatpush.msrb.mxu3 %v1412_v17 }
  0xef   :  { %v704_v52 = vadd.f32 %v671_v29, %v599_v49  ;;  %3432 = vmatpush.msk.msra.mxu0 %vm1444_vm3, %v4269_v51  ;;  %v1226_v51 = vld [vmem:[%s5123_s24 + $0xa4] sm:$0xff]  ;;  %1766 = vmatpush.msra.mxu1 %v1415_v44 }
  0xf0   :  { %v4273_v53 = vpop.f32.mrf.mxu3 }
  0xf1   :  { %v4254_v48 = vpop.f32.mrf.mxu0  ;;  %v4261_v50 = vpop.f32.mrf.mxu1  ;;  %v718_v27 = vadd.f32 %v4259_v13, %v704_v52  ;;  %1713 = vmatpush.msra.mxu0 %v4286_v57 }
  0xf2   :  { %v497_v40 = vadd.f32 %v4254_v48, %v4120_v47 }
  0xf3   :  { %v729_v60 = vmax.f32 %v718_v27, 0.0  ;;  %3392 = vmatmul.msk.f32.gmra.mxu2 %vm146_vm0, %v1118_v55  ;;  %1714 = vmatpush.msra.mxu0 %v4300_v59  ;;  %v1122_v59 = vld [vmem:[%s5123_s24 + $0xab] sm:$0xf] }
  0xf4   :  { %3372 = vmatmul.msk.f32.gmra.mxu0 %vm146_vm0, %v3776_v11  ;;  %v495_v11 = vadd.f32 %v464_v33, %v4081_v30  ;;  %3383 = vmatmul.msk.f32.gmra.mxu1 %vm146_vm0, %v1015_v16  ;;  %v4305_v30 = vld [vmem:[%s5129_s26] ss:$0 sm:$0xff]  ;;  %v602_v46 = vadd.f32 %v4261_v50, %v497_v40 }
  0xf5   :  { %3403 = vmatmul.msk.f32.gmra.mxu3 %vm146_vm0, %v1223_v56  ;;  %v744_v0 = vmul.f32 %v4293_v58, %v729_v60  ;;  %v1121_v56 = vld [vmem:[%s5123_s24 + $0xa3] sm:$0xff] }
  0xf6   :  { %v600_v63 = vadd.f32 %v569_v19, %v495_v11  ;;  %v674_v1 = vpop.f32.mrf.mxu2  ;;  %v1120_v19 = vld [vmem:[%s5123_s24 + $0x9b] sm:$0xff] }
  0xf7   :  { %v759_v3 = vadd.f32 %v4305_v30, %v744_v0 }
  0xf8   :  { %v705_v5 = vadd.f32 %v674_v1, %v600_v63  ;;  %v4321_v6 = vpop.f32.mrf.mxu3 }
  0xf9   :  { %v4309_v62 = vpop.f32.mrf.mxu0  ;;  %v4313_v26 = vpop.f32.mrf.mxu1  ;;  %771 = vst.msk [vmem:[#allocation9] sm:$0xff] %vm770_vm4, %v759_v3 }
  0xfa   :  { %v719_v10 = vadd.f32 %v4259_v13, %v705_v5  ;;  %v498_v27 = vadd.f32 %v4309_v62, %v4138_v54 }
  0xfb   :  { %3393 = vmatmul.msk.f32.gmra.mxu2 %vm146_vm0, %v1119_v7 }
  0xfc   :  { %3373 = vmatmul.msk.f32.gmra.mxu0 %vm146_vm0, %v3765_v9  ;;  %3384 = vmatmul.msk.f32.gmra.mxu1 %vm146_vm0, %v1016_v2  ;;  %v730_v12 = vmax.f32 %v719_v10, 0.0  ;;  %v603_v1 = vadd.f32 %v4313_v26, %v498_v27 }
  0xfd   :  { %3404 = vmatmul.msk.f32.gmra.mxu3 %vm146_vm0, %v1224_v23 }
  0xfe   :  { %v745_v39 = vmul.f32 %v4293_v58, %v730_v12  ;;  %v677_v22 = vpop.f32.mrf.mxu2 }
  0xff   :  { %v706_v32 = vadd.f32 %v677_v22, %v601_v18 }
 0x100   :  { %v760_v31 = vadd.f32 %v4305_v30, %v745_v39  ;;  %v4354_v33 = vpop.f32.mrf.mxu3 }
 0x101   :  { %v4335_v9 = vpop.f32.mrf.mxu0  ;;  %v4341_v20 = vpop.f32.mrf.mxu1  ;;  %v720_v42 = vadd.f32 %v4259_v13, %v706_v32 }
 0x102   :  { %772 = vst.msk [vmem:[#allocation9 + $0x8] sm:$0xff] %vm770_vm4, %v760_v31  ;;  %v499_v23 = vadd.f32 %v4335_v9, %v4156_v61 }
 0x103   :  { %v731_v45 = vmax.f32 %v720_v42, 0.0  ;;  %3394 = vmatmul.msk.f32.gmra.mxu2 %vm146_vm0, %v1120_v19 }
 0x104   :  { %3374 = vmatmul.msk.f32.gmra.mxu0 %vm146_vm0, %v829_v15  ;;  %3385 = vmatmul.msk.f32.gmra.mxu1 %vm146_vm0, %v1017_v24  ;;  %v604_v18 = vadd.f32 %v4341_v20, %v499_v23 }
 0x105   :  { %3405 = vmatmul.msk.f32.gmra.mxu3 %vm146_vm0, %v1225_v35  ;;  %v746_v48 = vmul.f32 %v4293_v58, %v731_v45 }
 0x106   :  { %v680_v29 = vpop.f32.mrf.mxu2 }
 0x107   :  { %v761_v16 = vadd.f32 %v4305_v30, %v746_v48  ;;  %v707_v52 = vadd.f32 %v680_v29, %v602_v46 }
 0x108   :  { %v4390_v55 = vpop.f32.mrf.mxu3 }
 0x109   :  { %v479_v47 = vpop.f32.mrf.mxu0  ;;  %v584_v49 = vpop.f32.mrf.mxu1  ;;  %v783_v50 = vld [vmem:[#allocation9] ss:$2 sm:$0xff]  ;;  %v795_v11 = vld [vmem:[#allocation9 + $0x1] ss:$2 sm:$0xff]  ;;  %773 = vst.msk [vmem:[#allocation9 + $0x10] sm:$0xff] %vm770_vm4, %v761_v16  ;;  %v721_v60 = vadd.f32 %v4259_v13, %v707_v52 }
 0x10a   :  { %v806_v63 = vmax.f32 %v783_v50, %v795_v11  ;;  %v500_v32 = vadd.f32 %v479_v47, %v4174_v4 }
 0x10b   :  { %v732_v0 = vmax.f32 %v721_v60, 0.0  ;;  %3395 = vmatmul.msk.f32.gmra.mxu2 %vm146_vm0, %v1121_v56 }
 0x10c   :  { %812 = vst.msk [vmem:[#allocation3] sm:$0xff] %vm770_vm4, %v806_v63  ;;  %v605_v38 = vadd.f32 %v584_v49, %v500_v32 }
 0x10d   :  { %3406 = vmatmul.msk.f32.gmra.mxu3 %vm146_vm0, %v1226_v51  ;;  %v747_v54 = vmul.f32 %v4293_v58, %v732_v0 }
 0x10e   :  { %v683_v2 = vpop.f32.mrf.mxu2 }
 0x10f   :  { %v762_v3 = vadd.f32 %v4305_v30, %v747_v54  ;;  %v708_v5 = vadd.f32 %v683_v2, %v603_v1 }
 0x110   :  { %v4410_v7 = vpop.f32.mrf.mxu3 }
 0x111   :  { %v482_v57 = vpop.f32.mrf.mxu0  ;;  %v587_v62 = vpop.f32.mrf.mxu1  ;;  %774 = vst.msk [vmem:[#allocation9 + $0x18] sm:$0xff] %vm770_vm4, %v762_v3  ;;  %v722_v26 = vadd.f32 %v4259_v13, %v708_v5 }
 0x112   :  { %v501_v4 = vadd.f32 %v482_v57, %v4190_v14 }
 0x113   :  { %v1419_v10 = vld [vmem:[#allocation3] sm:$0xff]  ;;  %v733_v12 = vmax.f32 %v722_v26, 0.0  ;;  %3396 = vmatmul.msk.f32.gmra.mxu2 %vm146_vm0, %v1122_v59  ;;  %v395_v26 = vadd.f32 %v4222_v36, %v4217_v34 }
 0x114   :  { %3415 = vmatmul.msk.f32.vlgmr.msrb.gmra.mxu1 %vm770_vm4, %v1419_v10  ;;  %v606_v56 = vadd.f32 %v587_v62, %v501_v4 }
 0x115   :  { %3407 = vmatmul.msk.f32.gmra.mxu3 %vm146_vm0, %v1227_v8  ;;  %v748_v61 = vmul.f32 %v4293_v58, %v733_v12 }
 0x116   :  { %v686_v39 = vpop.f32.mrf.mxu2 }
 0x117   :  { %v763_v22 = vadd.f32 %v4305_v30, %v748_v61  ;;  %v709_v24 = vadd.f32 %v686_v39, %v604_v18 }
 0x118   :  { %v4428_v21 = vpop.f32.mrf.mxu3  ;;  %v785_v25 = vld [vmem:[#allocation9 + $0x10] ss:$2 sm:$0xff]  ;;  %v797_v31 = vld [vmem:[#allocation9 + $0x11] ss:$2 sm:$0xff] }
 0x119   :  { %v485_v15 = vpop.f32.mrf.mxu0  ;;  %v590_v9 = vpop.f32.mrf.mxu1  ;;  %775 = vst.msk [vmem:[#allocation9 + $0x20] sm:$0xff] %vm770_vm4, %v763_v22  ;;  %v723_v19 = vadd.f32 %v4259_v13, %v709_v24  ;;  %v807_v35 = vmax.f32 %v785_v25, %v797_v31  ;;  %v398_v25 = vadd.f32 %v4240_v43, %v4235_v41 }
 0x11a   :  { %v502_v57 = vadd.f32 %v485_v15, %v4206_v28 }
 0x11b   :  { %v734_v37 = vmax.f32 %v723_v19, 0.0  ;;  %813 = vst.msk [vmem:[#allocation3 + $0x8] sm:$0xff] %vm770_vm4, %v807_v35 }
 0x11c   :  { %v607_v3 = vadd.f32 %v590_v9, %v502_v57 }
 0x11d   :  { %v749_v40 = vmul.f32 %v4293_v58, %v734_v37 }
 0x11e   :  { %v689_v17 = vpop.f32.mrf.mxu2 }
 0x11f   :  { %v764_v44 = vadd.f32 %v4305_v30, %v749_v40  ;;  %v710_v45 = vadd.f32 %v689_v17, %v605_v38 }
 0x120   :  { %v4436_v46 = vpop.f32.mrf.mxu3 }
 0x121   :  { %v488_v20 = vpop.f32.mrf.mxu0  ;;  %v593_v42 = vpop.f32.mrf.mxu1  ;;  %776 = vst.msk [vmem:[#allocation9 + $0x28] sm:$0xff] %vm770_vm4, %v764_v44  ;;  %v724_v47 = vadd.f32 %v4259_v13, %v710_v45 }
 0x122   :  { %v1424_v48 = vld [vmem:[#allocation3 + $0x1] sm:$0xff]  ;;  %v503_v12 = vadd.f32 %v488_v20, %v395_v26 }
 0x123   :  { %v1420_v29 = vld [vmem:[#allocation3 + $0x8] sm:$0xff]  ;;  %v735_v52 = vmax.f32 %v724_v47, 0.0  ;;  %3409 = vmatmul.msk.f32.vlgmr.msrb.gmra.mxu0 %vm770_vm4, %v1424_v48 }
 0x124   :  { %v1530_v16 = vld [vmem:[#allocation3 + $0x2] sm:$0xff]  ;;  %3416 = vmatmul.msk.f32.gmra.mxu1 %vm770_vm4, %v1420_v29  ;;  %v608_v36 = vadd.f32 %v593_v42, %v503_v12 }
 0x125   :  { %3421 = vmatmul.msk.f32.vlgmr.msrb.gmra.mxu2 %vm770_vm4, %v1530_v16  ;;  %v750_v50 = vmul.f32 %v4293_v58, %v735_v52 }
 0x126   :  { %v692_v14 = vpop.f32.mrf.mxu2 }
 0x127   :  { %v765_v51 = vadd.f32 %v4305_v30, %v750_v50  ;;  %v711_v27 = vadd.f32 %v692_v14, %v606_v56 }
 0x128   :  { %v4446_v60 = vpop.f32.mrf.mxu3  ;;  %v787_v63 = vld [vmem:[#allocation9 + $0x20] ss:$2 sm:$0xff]  ;;  %v799_v0 = vld [vmem:[#allocation9 + $0x21] ss:$2 sm:$0xff] }
 0x129   :  { %v491_v49 = vpop.f32.mrf.mxu0  ;;  %v596_v11 = vpop.f32.mrf.mxu1  ;;  %777 = vst.msk [vmem:[#allocation9 + $0x30] sm:$0xff] %vm770_vm4, %v765_v51  ;;  %v725_v1 = vadd.f32 %v4259_v13, %v711_v27  ;;  %v808_v54 = vmax.f32 %v787_v63, %v799_v0 }
 0x12a   :  { %v504_v38 = vadd.f32 %v491_v49, %v398_v25 }
 0x12b   :  { %v736_v2 = vmax.f32 %v725_v1, 0.0  ;;  %814 = vst.msk [vmem:[#allocation3 + $0x10] sm:$0xff] %vm770_vm4, %v808_v54 }
 0x12c   :  { %v609_v44 = vadd.f32 %v596_v11, %v504_v38 }
 0x12d   :  { %v751_v5 = vmul.f32 %v4293_v58, %v736_v2 }
 0x12e   :  { %v695_v59 = vpop.f32.mrf.mxu2 }
 0x12f   :  { %v766_v8 = vadd.f32 %v4305_v30, %v751_v5  ;;  %v712_v28 = vadd.f32 %v695_v59, %v607_v3 }
 0x130   :  { %v4456_v10 = vpop.f32.mrf.mxu3 }
 0x131   :  { %v974_v62 = vpop.f32.mrf.mxu0  ;;  %v1068_v23 = vpop.f32.mrf.mxu1  ;;  %778 = vst.msk [vmem:[#allocation9 + $0x38] sm:$0xff] %vm770_vm4, %v766_v8  ;;  %v726_v15 = vadd.f32 %v4259_v13, %v712_v28 }
 0x132   :  { %v1425_v18 = vld [vmem:[#allocation3 + $0x9] sm:$0xff]  ;;  %v975_v29 = vadd.f32 %v974_v62, %v4273_v53 }
 0x133   :  { %v1421_v61 = vld [vmem:[#allocation3 + $0x10] sm:$0xff]  ;;  %v737_v39 = vmax.f32 %v726_v15, 0.0  ;;  %3410 = vmatmul.msk.f32.gmra.mxu0 %vm770_vm4, %v1425_v18 }
 0x134   :  { %v1531_v9 = vld [vmem:[#allocation3 + $0xa] sm:$0xff]  ;;  %3417 = vmatmul.msk.f32.gmra.mxu1 %vm770_vm4, %v1421_v61  ;;  %v1101_v14 = vadd.f32 %v1068_v23, %v975_v29 }
 0x135   :  { %3422 = vmatmul.msk.f32.gmra.mxu2 %vm770_vm4, %v1531_v9  ;;  %v752_v22 = vmul.f32 %v4293_v58, %v737_v39 }
 0x136   :  { %v698_v24 = vpop.f32.mrf.mxu2 }
 0x137   :  { %v767_v31 = vadd.f32 %v4305_v30, %v752_v22  ;;  %v713_v32 = vadd.f32 %v698_v24, %v608_v36 }
 0x138   :  { %v4467_v19 = vpop.f32.mrf.mxu3  ;;  %v789_v37 = vld [vmem:[#allocation9 + $0x30] ss:$2 sm:$0xff]  ;;  %v801_v20 = vld [vmem:[#allocation9 + $0x31] ss:$2 sm:$0xff] }
 0x139   :  { %v977_v34 = vpop.f32.mrf.mxu0  ;;  %v1071_v35 = vpop.f32.mrf.mxu1  ;;  %779 = vst.msk [vmem:[#allocation9 + $0x40] sm:$0xff] %vm770_vm4, %v767_v31  ;;  %v727_v40 = vadd.f32 %v4259_v13, %v713_v32  ;;  %v809_v42 = vmax.f32 %v789_v37, %v801_v20 }
 0x13a   :  { %v978_v2 = vadd.f32 %v977_v34, %v4321_v6  ;;  %v4496_v6 = vld [vmem:[%s5129_s26] ss:$0 sm:$0xff] }
 0x13b   :  { %v738_v17 = vmax.f32 %v727_v40, 0.0  ;;  %815 = vst.msk [vmem:[#allocation3 + $0x18] sm:$0xff] %vm770_vm4, %v809_v42 }
 0x13c   :  { %v1102_v59 = vadd.f32 %v1071_v35, %v978_v2 }
 0x13d   :  { %v753_v41 = vmul.f32 %v4293_v58, %v738_v17 }
 0x13e   :  { %v701_v45 = vpop.f32.mrf.mxu2 }
 0x13f   :  { %v768_v4 = vadd.f32 %v4305_v30, %v753_v41  ;;  %v714_v47 = vadd.f32 %v701_v45, %v609_v44 }
 0x140   :  { %v4474_v48 = vpop.f32.mrf.mxu3 }
 0x141   :  { %v980_v43 = vpop.f32.mrf.mxu0  ;;  %780 = vst.msk [vmem:[#allocation9 + $0x48] sm:$0xff] %vm770_vm4, %v768_v4  ;;  %v728_v16 = vadd.f32 %v4259_v13, %v714_v47  ;;  %v1074_v52 = vpop.f32.mrf.mxu1 }
 0x142   :  { %v1426_v49 = vld [vmem:[#allocation3 + $0x11] sm:$0xff]  ;;  %v981_v61 = vadd.f32 %v980_v43, %v4354_v33 }
 0x143   :  { %v1422_v56 = vld [vmem:[#allocation3 + $0x18] sm:$0xff]  ;;  %v739_v11 = vmax.f32 %v728_v16, 0.0  ;;  %3411 = vmatmul.msk.f32.gmra.mxu0 %vm770_vm4, %v1426_v49 }
 0x144   :  { %v1532_v50 = vld [vmem:[#allocation3 + $0x12] sm:$0xff]  ;;  %3418 = vmatmul.msk.f32.gmra.mxu1 %vm770_vm4, %v1422_v56  ;;  %v1103_v33 = vadd.f32 %v1074_v52, %v981_v61 }
 0x145   :  { %3423 = vmatmul.msk.f32.gmra.mxu2 %vm770_vm4, %v1532_v50  ;;  %v754_v51 = vmul.f32 %v4293_v58, %v739_v11  ;;  %v4490_v58 = vld [vmem:[%s5128_s4] ss:$0 sm:$0xff] }
 0x146   :  { %v1173_v53 = vpop.f32.mrf.mxu2 }
 0x147   :  { %v769_v27 = vadd.f32 %v4305_v30, %v754_v51  ;;  %v1206_v63 = vadd.f32 %v1173_v53, %v1101_v14 }
 0x148   :  { %v1278_v0 = vpop.f32.mrf.mxu3  ;;  %v791_v1 = vld [vmem:[#allocation9 + $0x40] ss:$2 sm:$0xff]  ;;  %v803_v54 = vld [vmem:[#allocation9 + $0x41] ss:$2 sm:$0xff] }
 0x149   :  { %v983_v57 = vpop.f32.mrf.mxu0  ;;  %782 = vst.msk [vmem:[#allocation9 + $0x50] sm:$0xf] %vm781_vm5, %v769_v27  ;;  %v1311_v62 = vadd.f32 %v1278_v0, %v1206_v63  ;;  %v810_v3 = vmax.f32 %v791_v1, %v803_v54  ;;  %v1077_v30 = vpop.f32.mrf.mxu1 }
 0x14a   :  { %v984_v42 = vadd.f32 %v983_v57, %v4390_v55 }
 0x14b   :  { %v1322_v5 = vadd.f32 %v4259_v13, %v1311_v62  ;;  %816 = vst.msk [vmem:[#allocation3 + $0x20] sm:$0xff] %vm770_vm4, %v810_v3 }
 0x14c   :  { %v1104_v47 = vadd.f32 %v1077_v30, %v984_v42 }
 0x14d   :  { %v1333_v23 = vmax.f32 %v1322_v5, 0.0 }
 0x14e   :  { %v1176_v26 = vpop.f32.mrf.mxu2 }
 0x14f   :  { %v1348_v8 = vmul.f32 %v4490_v58, %v1333_v23  ;;  %v1207_v28 = vadd.f32 %v1176_v26, %v1102_v59 }
 0x150   :  { %v1281_v12 = vpop.f32.mrf.mxu3  ;;  %v793_v15 = vld [vmem:[#allocation9 + $0x50] ss:$2 sm:$0x3]  ;;  %v805_v18 = vld [vmem:[#allocation9 + $0x51] ss:$2 sm:$0x3] }
 0x151   :  { %v1363_v9 = vadd.f32 %v4496_v6, %v1348_v8  ;;  %v1312_v39 = vadd.f32 %v1281_v12, %v1207_v28  ;;  %v811_v34 = vmax.f32 %v793_v15, %v805_v18  ;;  %v986_v36 = vpop.f32.mrf.mxu0  ;;  %v1080_v35 = vpop.f32.mrf.mxu1 }
 0x152   :  { %v1427_v22 = vld [vmem:[#allocation3 + $0x19] sm:$0xff]  ;;  %v987_v50 = vadd.f32 %v986_v36, %v4410_v7 }
 0x153   :  { %v1423_v24 = vld [vmem:[#allocation3 + $0x20] sm:$0xff]  ;;  %1374 = vst.msk [vmem:[#allocation9] sm:$0xff] %vm770_vm4, %v1363_v9  ;;  %v1323_v31 = vadd.f32 %v4259_v13, %v1312_v39  ;;  %3412 = vmatmul.msk.f32.gmra.mxu0 %vm770_vm4, %v1427_v22 }
 0x154   :  { %v1533_v25 = vld [vmem:[#allocation3 + $0x1a] sm:$0xff]  ;;  %3419 = vmatmul.msk.f32.gmra.mxu1 %vm770_vm4, %v1423_v24  ;;  %818 = vst.msk [vmem:[#allocation3 + $0x28] sm:$0x3] %vm817_vm6, %v811_v34  ;;  %v1105_v0 = vadd.f32 %v1080_v35, %v987_v50 }
 0x155   :  { %3424 = vmatmul.msk.f32.gmra.mxu2 %vm770_vm4, %v1533_v25  ;;  %v1334_v32 = vmax.f32 %v1323_v31, 0.0 }
 0x156   :  { %v1179_v37 = vpop.f32.mrf.mxu2 }
 0x157   :  { %v1349_v20 = vmul.f32 %v4490_v58, %v1334_v32  ;;  %v1208_v38 = vadd.f32 %v1179_v37, %v1103_v33 }
 0x158   :  { %v1284_v40 = vpop.f32.mrf.mxu3 }
 0x159   :  { %v1364_v17 = vadd.f32 %v4496_v6, %v1349_v20  ;;  %v1313_v44 = vadd.f32 %v1284_v40, %v1208_v38  ;;  %v989_v4 = vpop.f32.mrf.mxu0  ;;  %v1083_v56 = vpop.f32.mrf.mxu1 }
 0x15a   :  { %v990_v3 = vadd.f32 %v989_v4, %v4428_v21 }
 0x15b   :  { %1375 = vst.msk [vmem:[#allocation9 + $0x8] sm:$0xff] %vm770_vm4, %v1364_v17  ;;  %v1324_v41 = vadd.f32 %v4259_v13, %v1313_v44  ;;  %v1428_v43 = vld [vmem:[#allocation3 + $0x21] sm:$0xff] }
 0x15c   :  { %v1534_v45 = vld [vmem:[#allocation3 + $0x22] sm:$0xff]  ;;  %3413 = vmatmul.msk.f32.gmra.mxu0 %vm770_vm4, %v1428_v43  ;;  %v1106_v8 = vadd.f32 %v1083_v56, %v990_v3 }
 0x15d   :  { %3425 = vmatmul.msk.f32.gmra.mxu2 %vm770_vm4, %v1534_v45  ;;  %v1335_v29 = vmax.f32 %v1324_v41, 0.0 }
 0x15e   :  { %v1182_v16 = vpop.f32.mrf.mxu2 }
 0x15f   :  { %v1350_v52 = vmul.f32 %v4490_v58, %v1335_v29  ;;  %v1209_v55 = vadd.f32 %v1182_v16, %v1104_v47 }
 0x160   :  { %v1287_v49 = vpop.f32.mrf.mxu3 }
 0x161   :  { %v1365_v11 = vadd.f32 %v4496_v6, %v1350_v52  ;;  %v1314_v14 = vadd.f32 %v1287_v49, %v1209_v55  ;;  %v992_v1 = vpop.f32.mrf.mxu0  ;;  %v1086_v59 = vpop.f32.mrf.mxu1 }
 0x162   :  { %v1385_v51 = vld [vmem:[#allocation9] ss:$2 sm:$0xff]  ;;  %v1391_v53 = vld [vmem:[#allocation9 + $0x1] ss:$2 sm:$0xff]  ;;  %v993_v21 = vadd.f32 %v992_v1, %v4436_v46 }
 0x163   :  { %1376 = vst.msk [vmem:[#allocation9 + $0x10] sm:$0xff] %vm770_vm4, %v1365_v11  ;;  %v1325_v27 = vadd.f32 %v4259_v13, %v1314_v14  ;;  %v1397_v63 = vmax.f32 %v1385_v51, %v1391_v53 }
 0x164   :  { %v1107_v33 = vadd.f32 %v1086_v59, %v993_v21 }
 0x165   :  { %v1336_v57 = vmax.f32 %v1325_v27, 0.0  ;;  %1403 = vst.msk [vmem:[#allocation3 + $0x30] sm:$0xff] %vm770_vm4, %v1397_v63 }
 0x166   :  { %v1185_v54 = vpop.f32.mrf.mxu2 }
 0x167   :  { %v1351_v2 = vmul.f32 %v4490_v58, %v1336_v57  ;;  %v1210_v62 = vadd.f32 %v1185_v54, %v1105_v0 }
 0x168   :  { %v1290_v7 = vpop.f32.mrf.mxu3 }
 0x169   :  { %v1366_v5 = vadd.f32 %v4496_v6, %v1351_v2  ;;  %v1315_v30 = vadd.f32 %v1290_v7, %v1210_v62  ;;  %v995_v9 = vpop.f32.mrf.mxu0  ;;  %v1089_v31 = vpop.f32.mrf.mxu1 }
 0x16a   :  { %v996_v38 = vadd.f32 %v995_v9, %v4446_v60 }
 0x16b   :  { %1377 = vst.msk [vmem:[#allocation9 + $0x18] sm:$0xff] %vm770_vm4, %v1366_v5  ;;  %v1326_v23 = vadd.f32 %v4259_v13, %v1315_v30 }
 0x16c   :  { %v1627_v26 = vld [vmem:[#allocation3 + $0x30] sm:$0xff]  ;;  %v1108_v4 = vadd.f32 %v1089_v31, %v996_v38 }
 0x16d   :  { %v1337_v28 = vmax.f32 %v1326_v23, 0.0  ;;  %3433 = vmatmul.msk.f32.vlgmr.msra.gmra.mxu0 %vm770_vm4, %v1627_v26 }
 0x16e   :  { %v1188_v12 = vpop.f32.mrf.mxu2 }
 0x16f   :  { %v1352_v15 = vmul.f32 %v4490_v58, %v1337_v28  ;;  %v1211_v18 = vadd.f32 %v1188_v12, %v1106_v8 }
 0x170   :  { %v1293_v61 = vpop.f32.mrf.mxu3 }
 0x171   :  { %v1367_v39 = vadd.f32 %v4496_v6, %v1352_v15  ;;  %v1316_v34 = vadd.f32 %v1293_v61, %v1211_v18  ;;  %v998_v17 = vpop.f32.mrf.mxu0  ;;  %v1092_v29 = vpop.f32.mrf.mxu1 }
 0x172   :  { %v1386_v36 = vld [vmem:[#allocation9 + $0x10] ss:$2 sm:$0xff]  ;;  %v1392_v22 = vld [vmem:[#allocation9 + $0x11] ss:$2 sm:$0xff]  ;;  %v999_v49 = vadd.f32 %v998_v17, %v4456_v10 }
 0x173   :  { %1378 = vst.msk [vmem:[#allocation9 + $0x20] sm:$0xff] %vm770_vm4, %v1367_v39  ;;  %v1327_v24 = vadd.f32 %v4259_v13, %v1316_v34  ;;  %v1398_v25 = vmax.f32 %v1386_v36, %v1392_v22 }
 0x174   :  { %v1109_v63 = vadd.f32 %v1092_v29, %v999_v49 }
 0x175   :  { %v1338_v32 = vmax.f32 %v1327_v24, 0.0  ;;  %1404 = vst.msk [vmem:[#allocation3 + $0x38] sm:$0xff] %vm770_vm4, %v1398_v25 }
 0x176   :  { %v1191_v35 = vpop.f32.mrf.mxu2 }
 0x177   :  { %v1353_v37 = vmul.f32 %v4490_v58, %v1338_v32  ;;  %v1212_v20 = vadd.f32 %v1191_v35, %v1107_v33 }
 0x178   :  { %v1296_v46 = vpop.f32.mrf.mxu3 }
 0x179   :  { %v1368_v40 = vadd.f32 %v4496_v6, %v1353_v37  ;;  %v1317_v42 = vadd.f32 %v1296_v46, %v1212_v20  ;;  %v1001_v27 = vpop.f32.mrf.mxu0  ;;  %v1095_v2 = vpop.f32.mrf.mxu1 }
 0x17a   :  { %v1002_v62 = vadd.f32 %v1001_v27, %v4467_v19  ;;  %v4602_v27 = vld [vmem:[%s5091_s8 + $0x8] sm:$0xff] }
 0x17b   :  { %1379 = vst.msk [vmem:[#allocation9 + $0x28] sm:$0xff] %vm770_vm4, %v1368_v40  ;;  %v1328_v44 = vadd.f32 %v4259_v13, %v1317_v42 }
 0x17c   :  { %v1632_v41 = vld [vmem:[#allocation3 + $0x31] sm:$0xff]  ;;  %v1110_v26 = vadd.f32 %v1095_v2, %v1002_v62 }
 0x17d   :  { %v1628_v43 = vld [vmem:[#allocation3 + $0x38] sm:$0xff]  ;;  %v1339_v47 = vmax.f32 %v1328_v44, 0.0  ;;  %3427 = vmatmul.msk.f32.vlgmr.msrb.gmra.mxu3 %vm770_vm4, %v1632_v41 }
 0x17e   :  { %v1731_v45 = vld [vmem:[#allocation3 + $0x32] sm:$0xff]  ;;  %3434 = vmatmul.msk.f32.gmra.mxu0 %vm770_vm4, %v1628_v43  ;;  %v1194_v60 = vpop.f32.mrf.mxu2 }
 0x17f   :  { %3439 = vmatmul.msk.f32.vlgmr.msra.gmra.mxu1 %vm770_vm4, %v1731_v45  ;;  %v1354_v16 = vmul.f32 %v4490_v58, %v1339_v47  ;;  %v1213_v52 = vadd.f32 %v1194_v60, %v1108_v4  ;;  %v4574_v60 = vld [vmem:[%s5130_s6] ss:$0 sm:$0xff] }
 0x180   :  { %v1299_v55 = vpop.f32.mrf.mxu3 }
 0x181   :  { %v1369_v56 = vadd.f32 %v4496_v6, %v1354_v16  ;;  %v1318_v50 = vadd.f32 %v1299_v55, %v1213_v52  ;;  %v1004_v28 = vpop.f32.mrf.mxu0  ;;  %v1098_v39 = vpop.f32.mrf.mxu1 }
 0x182   :  { %v1387_v11 = vld [vmem:[#allocation9 + $0x20] ss:$2 sm:$0xff]  ;;  %v1393_v14 = vld [vmem:[#allocation9 + $0x21] ss:$2 sm:$0xff]  ;;  %v1005_v61 = vadd.f32 %v1004_v28, %v4474_v48 }
 0x183   :  { %1380 = vst.msk [vmem:[#allocation9 + $0x30] sm:$0xff] %vm770_vm4, %v1369_v56  ;;  %v1329_v51 = vadd.f32 %v4259_v13, %v1318_v50  ;;  %v1399_v53 = vmax.f32 %v1387_v11, %v1393_v14  ;;  %v4580_v56 = vld [vmem:[%s5091_s8 + $0x20] sm:$0xff] }
 0x184   :  { %v1111_v25 = vadd.f32 %v1098_v39, %v1005_v61  ;;  %1892 = vmatpush.msra.mxu3 %v4580_v56  ;;  %v1829_v61 = vld [vmem:[%s5091_s8 + $0x70] sm:$0xff]  ;;  %v1822_v39 = vld [vmem:[%s5091_s8 + $0x38] sm:$0xff] }
 0x185   :  { %v1340_v0 = vmax.f32 %v1329_v51, 0.0  ;;  %1405 = vst.msk [vmem:[#allocation3 + $0x40] sm:$0xff] %vm770_vm4, %v1399_v53  ;;  %v4589_v51 = vld [vmem:[%s5091_s8 + $0x18] sm:$0xff]  ;;  %v4596_v53 = vld [vmem:[%s5091_s8 + $0x10] sm:$0xff]  ;;  %1930 = vmatpush.msrb.mxu0 %v1829_v61 }
 0x186   :  { %v1197_v57 = vpop.f32.mrf.mxu2  ;;  %1893 = vmatpush.msra.mxu3 %v4589_v51 }
 0x187   :  { %v1355_v1 = vmul.f32 %v4490_v58, %v1340_v0  ;;  %v1214_v54 = vadd.f32 %v1197_v57, %v1109_v63  ;;  %v4609_v57 = vld [vmem:[%s5091_s8] sm:$0xff] }
 0x188   :  { %v1302_v10 = vpop.f32.mrf.mxu3  ;;  %1894 = vmatpush.msra.mxu3 %v4596_v53 }
 0x189   :  { %v1370_v7 = vadd.f32 %v4496_v6, %v1355_v1  ;;  %v1319_v3 = vadd.f32 %v1302_v10, %v1214_v54 }
 0x18a   :  { %1895 = vmatpush.msra.mxu3 %v4602_v27 }
 0x18b   :  { %1381 = vst.msk [vmem:[#allocation9 + $0x38] sm:$0xff] %vm770_vm4, %v1370_v7  ;;  %v1330_v5 = vadd.f32 %v4259_v13, %v1319_v3 }
 0x18c   :  { %v1633_v30 = vld [vmem:[#allocation3 + $0x39] sm:$0xff]  ;;  %1896 = vmatpush.msra.mxu3 %v4609_v57 }
 0x18d   :  { %v1629_v59 = vld [vmem:[#allocation3 + $0x40] sm:$0xff]  ;;  %v1341_v8 = vmax.f32 %v1330_v5, 0.0  ;;  %3428 = vmatmul.msk.f32.gmra.mxu3 %vm770_vm4, %v1633_v30 }
 0x18e   :  { %v1732_v23 = vld [vmem:[#allocation3 + $0x3a] sm:$0xff]  ;;  %3435 = vmatmul.msk.f32.gmra.mxu0 %vm770_vm4, %v1629_v59  ;;  %v1200_v19 = vpop.f32.mrf.mxu2  ;;  %2084 = vmatpush.msrb.mxu3 %v1829_v61 }
 0x18f   :  { %3440 = vmatmul.msk.f32.gmra.mxu1 %vm770_vm4, %v1732_v23  ;;  %v1356_v12 = vmul.f32 %v4490_v58, %v1341_v8  ;;  %v1215_v15 = vadd.f32 %v1200_v19, %v1110_v26 }
 0x190   :  { %v1305_v18 = vpop.f32.mrf.mxu3 }
 0x191   :  { %v1371_v9 = vadd.f32 %v4496_v6, %v1356_v12  ;;  %v1320_v21 = vadd.f32 %v1305_v18, %v1215_v15  ;;  %v1515_v47 = vpop.f32.mrf.mxu1  ;;  %v1824_v18 = vld [vmem:[%s5091_s8 + $0x48] sm:$0xff] }
 0x192   :  { %v1388_v34 = vld [vmem:[#allocation9 + $0x30] ss:$2 sm:$0xff]  ;;  %v1394_v36 = vld [vmem:[#allocation9 + $0x31] ss:$2 sm:$0xff]  ;;  %1857 = vmatpush.msra.mxu2 %v1824_v18  ;;  %2011 = vmatpush.msrb.mxu1 %v1824_v18 }
 0x193   :  { %1382 = vst.msk [vmem:[#allocation9 + $0x40] sm:$0xff] %vm770_vm4, %v1371_v9  ;;  %v1331_v22 = vadd.f32 %v4259_v13, %v1320_v21  ;;  %v1400_v24 = vmax.f32 %v1388_v34, %v1394_v36  ;;  %v1823_v9 = vld [vmem:[%s5091_s8 + $0x40] sm:$0xff]  ;;  %v1828_v21 = vld [vmem:[%s5091_s8 + $0x68] sm:$0xff]  ;;  %v1821_v36 = vld [vmem:[%s5091_s8 + $0x30] sm:$0xff] }
 0x194   :  { %v1827_v34 = vld [vmem:[%s5091_s8 + $0x60] sm:$0xff]  ;;  %1858 = vmatpush.msra.mxu2 %v1823_v9  ;;  %1931 = vmatpush.msrb.mxu0 %v1828_v21 }
 0x195   :  { %v1342_v31 = vmax.f32 %v1331_v22, 0.0  ;;  %1406 = vst.msk [vmem:[#allocation3 + $0x48] sm:$0xff] %vm770_vm4, %v1400_v24  ;;  %v1826_v22 = vld [vmem:[%s5091_s8 + $0x58] sm:$0xff]  ;;  %2012 = vmatpush.msrb.mxu1 %v1823_v9  ;;  %2085 = vmatpush.msrb.mxu3 %v1828_v21 }
 0x196   :  { %v1203_v33 = vpop.f32.mrf.mxu2  ;;  %1859 = vmatpush.msra.mxu2 %v1822_v39  ;;  %1932 = vmatpush.msrb.mxu0 %v1827_v34 }
 0x197   :  { %v1357_v32 = vmul.f32 %v4490_v58, %v1342_v31  ;;  %v1216_v35 = vadd.f32 %v1203_v33, %v1111_v25  ;;  %v1820_v25 = vld [vmem:[%s5091_s8 + $0x28] sm:$0xff]  ;;  %v1825_v31 = vld [vmem:[%s5091_s8 + $0x50] sm:$0xff]  ;;  %2013 = vmatpush.msrb.mxu1 %v1822_v39  ;;  %2086 = vmatpush.msrb.mxu3 %v1827_v34 }
 0x198   :  { %v1308_v48 = vpop.f32.mrf.mxu3  ;;  %1860 = vmatpush.msra.mxu2 %v1821_v36  ;;  %1933 = vmatpush.msrb.mxu0 %v1826_v22 }
 0x199   :  { %v1372_v37 = vadd.f32 %v4496_v6, %v1357_v32  ;;  %v1321_v20 = vadd.f32 %v1308_v48, %v1216_v35  ;;  %2014 = vmatpush.msrb.mxu1 %v1821_v36  ;;  %2087 = vmatpush.msrb.mxu3 %v1826_v22 }
 0x19a   :  { %1861 = vmatpush.msra.mxu2 %v1820_v25  ;;  %1934 = vmatpush.msrb.mxu0 %v1825_v31 }
 0x19b   :  { %1383 = vst.msk [vmem:[#allocation9 + $0x48] sm:$0xff] %vm770_vm4, %v1372_v37  ;;  %v1332_v46 = vadd.f32 %v4259_v13, %v1321_v20  ;;  %2015 = vmatpush.msrb.mxu1 %v1820_v25  ;;  %2088 = vmatpush.msrb.mxu3 %v1825_v31 }
 0x19c   :  { %v1634_v38 = vld [vmem:[#allocation3 + $0x41] sm:$0xff]  ;;  %2046 = vmatpush.msrb.mxu2 %v4580_v56 }
 0x19d   :  { %v1630_v40 = vld [vmem:[#allocation3 + $0x48] sm:$0xff]  ;;  %v1343_v17 = vmax.f32 %v1332_v46, 0.0  ;;  %3429 = vmatmul.msk.f32.gmra.mxu3 %vm770_vm4, %v1634_v38 }
 0x19e   :  { %v1733_v42 = vld [vmem:[#allocation3 + $0x42] sm:$0xff]  ;;  %3436 = vmatmul.msk.f32.gmra.mxu0 %vm770_vm4, %v1630_v40  ;;  %2047 = vmatpush.msrb.mxu2 %v4589_v51 }
 0x19f   :  { %3441 = vmatmul.msk.f32.gmra.mxu1 %vm770_vm4, %v1733_v42  ;;  %v1358_v44 = vmul.f32 %v4490_v58, %v1343_v17 }
 0x1a0   :  { %v1465_v4 = vpop.f32.mrf.mxu0  ;;  %2048 = vmatpush.msrb.mxu2 %v4596_v53 }
 0x1a1   :  { %v1373_v41 = vadd.f32 %v4496_v6, %v1358_v44  ;;  %v1516_v29 = vadd.f32 %v1515_v47, %v1465_v4  ;;  %v1518_v10 = vpop.f32.mrf.mxu1 }
 0x1a2   :  { %v1389_v43 = vld [vmem:[#allocation9 + $0x40] ss:$2 sm:$0xff]  ;;  %v1395_v45 = vld [vmem:[#allocation9 + $0x41] ss:$2 sm:$0xff]  ;;  %2049 = vmatpush.msrb.mxu2 %v4602_v27 }
 0x1a3   :  { %1384 = vst.msk [vmem:[#allocation9 + $0x50] sm:$0xf] %vm781_vm5, %v1373_v41  ;;  %v1401_v13 = vmax.f32 %v1389_v43, %v1395_v45 }
 0x1a4   :  { %2050 = vmatpush.msrb.mxu2 %v4609_v57 }
 0x1a5   :  { %1407 = vst.msk [vmem:[#allocation3 + $0x50] sm:$0xff] %vm770_vm4, %v1401_v13 }
 0x1a8   :  { %v1570_v16 = vpop.f32.mrf.mxu2 }
 0x1a9   :  { %v1585_v52 = vadd.f32 %v1570_v16, %v1516_v29 }
 0x1aa   :  { %v1390_v6 = vld [vmem:[#allocation9 + $0x50] ss:$2 sm:$0x3]  ;;  %v1396_v55 = vld [vmem:[#allocation9 + $0x51] ss:$2 sm:$0x3] }
 0x1ab   :  { %v1593_v58 = vadd.f32 %v4574_v60, %v1585_v52  ;;  %v1402_v49 = vmax.f32 %v1390_v6, %v1396_v55 }
 0x1ac   :  { %v1635_v50 = vld [vmem:[#allocation3 + $0x49] sm:$0xff] }
 0x1ad   :  { %3543 = vtanh.f32 %v1593_v58  ;;  %v1631_v11 = vld [vmem:[#allocation3 + $0x50] sm:$0xff]  ;;  %3430 = vmatmul.msk.f32.gmra.mxu3 %vm770_vm4, %v1635_v50  ;;  %1408 = vst.msk [vmem:[#allocation3 + $0x58] sm:$0x3] %vm817_vm6, %v1402_v49 }
 0x1ae   :  { %v1734_v14 = vld [vmem:[#allocation3 + $0x4a] sm:$0xff]  ;;  %3437 = vmatmul.msk.f32.gmra.mxu0 %vm770_vm4, %v1631_v11 }
 0x1af   :  { %3442 = vmatmul.msk.f32.gmra.mxu1 %vm770_vm4, %v1734_v14 }
 0x1b0   :  { %v1468_v0 = vpop.f32.mrf.mxu0 }
 0x1b1   :  { %v1519_v2 = vadd.f32 %v1518_v10, %v1468_v0  ;;  %v1521_v59 = vpop.f32.mrf.mxu1 }
 0x1b3   :  { %v3544_v63 = vpop.eup %3543 }
 0x1b4   :  { %1604 = vst.msk [vmem:[#allocation10] sm:$0xff] %vm1603_vm7, %v3544_v63  ;;  %v1636_v1 = vld [vmem:[#allocation3 + $0x51] sm:$0xff] }
 0x1b5   :  { %v1735_v54 = vld [vmem:[#allocation3 + $0x52] sm:$0xff]  ;;  %3431 = vmatmul.msk.f32.gmra.mxu3 %vm770_vm4, %v1636_v1 }
 0x1b7   :  { %3443 = vmatmul.msk.f32.gmra.mxu1 %vm770_vm4, %v1735_v54 }
 0x1b8   :  { %v1573_v62 = vpop.f32.mrf.mxu2 }
 0x1b9   :  { %v1586_v7 = vadd.f32 %v1573_v62, %v1519_v2 }
 0x1bb   :  { %v1594_v3 = vadd.f32 %v4574_v60, %v1586_v7 }
 0x1bd   :  { %3545 = vtanh.f32 %v1594_v3 }
 0x1c0   :  { %v1471_v30 = vpop.f32.mrf.mxu0 }
 0x1c1   :  { %v1522_v23 = vadd.f32 %v1521_v59, %v1471_v30  ;;  %v1524_v35 = vpop.f32.mrf.mxu1 }
 0x1c3   :  { %v3546_v5 = vpop.eup %3545 }
 0x1c4   :  { %1605 = vst.msk [vmem:[#allocation10 + $0x8] sm:$0xff] %vm1603_vm7, %v3546_v5 }
 0x1c8   :  { %v1576_v26 = vpop.f32.mrf.mxu2 }
 0x1c9   :  { %v1587_v8 = vadd.f32 %v1576_v26, %v1522_v23 }
 0x1cb   :  { %v1609_v28 = vld [vmem:[#allocation10] ss:$2 sm:$0xff]  ;;  %v1615_v19 = vld [vmem:[#allocation10 + $0x1] ss:$2 sm:$0xff]  ;;  %v1595_v12 = vadd.f32 %v4574_v60, %v1587_v8 }
 0x1cc   :  { %v1620_v15 = vmax.f32 %v1609_v28, %v1615_v19 }
 0x1cd   :  { %3547 = vtanh.f32 %v1595_v12 }
 0x1ce   :  { %1623 = vst.msk [vmem:[#allocation4] sm:$0xff] %vm1603_vm7, %v1620_v15 }
 0x1d0   :  { %v1474_v24 = vpop.f32.mrf.mxu0 }
 0x1d1   :  { %v1525_v48 = vadd.f32 %v1524_v35, %v1474_v24  ;;  %v1527_v40 = vpop.f32.mrf.mxu1 }
 0x1d3   :  { %v3548_v33 = vpop.eup %3547 }
 0x1d4   :  { %1606 = vst.msk [vmem:[#allocation10 + $0x10] sm:$0xff] %vm1603_vm7, %v3548_v33 }
 0x1d5   :  { %v1831_v32 = vld [vmem:[#allocation4] sm:$0xff] }
 0x1d6   :  { %3447 = vmatmul.msk.f32.vlgmr.msra.gmra.mxu3 %vm1603_vm7, %v1831_v32 }
 0x1d8   :  { %v1579_v37 = vpop.f32.mrf.mxu2 }
 0x1d9   :  { %v1588_v20 = vadd.f32 %v1579_v37, %v1525_v48  ;;  %v1477_v38 = vpop.f32.mrf.mxu0 }
 0x1da   :  { %v1528_v42 = vadd.f32 %v1527_v40, %v1477_v38 }
 0x1db   :  { %v1596_v46 = vadd.f32 %v4574_v60, %v1588_v20 }
 0x1dd   :  { %3549 = vtanh.f32 %v1596_v46 }
 0x1e0   :  { %v1582_v17 = vpop.f32.mrf.mxu2 }
 0x1e1   :  { %v1589_v44 = vadd.f32 %v1582_v17, %v1528_v42 }
 0x1e3   :  { %v3550_v41 = vpop.eup %3549  ;;  %v1597_v43 = vadd.f32 %v4574_v60, %v1589_v44 }
 0x1e4   :  { %1607 = vst.msk [vmem:[#allocation10 + $0x18] sm:$0xff] %vm1603_vm7, %v3550_v41 }
 0x1e5   :  { %3551 = vtanh.f32 %v1597_v43 }
 0x1ea   :  { %v1716_v11 = vpop.f32.mrf.mxu0 }
 0x1eb   :  { %v3552_v45 = vpop.eup %3551  ;;  %v1611_v4 = vld [vmem:[#allocation10 + $0x10] ss:$2 sm:$0xff]  ;;  %v1617_v13 = vld [vmem:[#allocation10 + $0x11] ss:$2 sm:$0xff] }
 0x1ec   :  { %1608 = vst.msk [vmem:[#allocation10 + $0x20] sm:$0xff] %vm1603_vm7, %v3552_v45  ;;  %v1621_v47 = vmax.f32 %v1611_v4, %v1617_v13 }
 0x1ee   :  { %1624 = vst.msk [vmem:[#allocation4 + $0x8] sm:$0xff] %vm1603_vm7, %v1621_v47 }
 0x1f3   :  { %v1613_v29 = vld [vmem:[#allocation10 + $0x20] ss:$2 sm:$0xf]  ;;  %v1619_v16 = vld [vmem:[#allocation10 + $0x21] ss:$2 sm:$0xf] }
 0x1f4   :  { %v1622_v52 = vmax.f32 %v1613_v29, %v1619_v16 }
 0x1f5   :  { %v1834_v58 = vld [vmem:[#allocation4 + $0x1] sm:$0xff] }
 0x1f6   :  { %v1832_v6 = vld [vmem:[#allocation4 + $0x8] sm:$0xff]  ;;  %3444 = vmatmul.msk.f32.vlgmr.msra.gmra.mxu2 %vm1603_vm7, %v1834_v58  ;;  %1626 = vst.msk [vmem:[#allocation4 + $0x10] sm:$0xf] %vm1625_vm8, %v1622_v52 }
 0x1f7   :  { %v1907_v55 = vld [vmem:[#allocation4 + $0x2] sm:$0xff]  ;;  %3448 = vmatmul.msk.f32.gmra.mxu3 %vm1603_vm7, %v1832_v6  ;;  %v4694_v6 = vld [vmem:[%s5092_s9] ss:$0 sm:$0xff] }
 0x1f8   :  { %3450 = vmatmul.msk.f32.vlgmr.msrb.gmra.mxu0 %vm1603_vm7, %v1907_v55  ;;  %v2146_v55 = vld [vmem:[%s5095_s12 + $0x74] sm:$0xf] }
 0x1f9   :  { %3462 = vmatpush.msk.msra.mxu0 %vm1444_vm3, %v2146_v55  ;;  %3468 = vmatpush.msk.msra.mxu3 %vm1444_vm3, %v2146_v55  ;;  %v2502_v55 = vld [vmem:[#allocation2 + $0x4] ss:$2 sm:$0xff] }
 0x1fb   :  { %v1719_v54 = vpop.f32.mrf.mxu0 }
 0x1fc   :  { %v1768_v53 = vpop.f32.mrf.mxu1 }
 0x1fd   :  { %v1835_v49 = vld [vmem:[#allocation4 + $0x9] sm:$0xff]  ;;  %v1836_v63 = vld [vmem:[#allocation4 + $0x11] sm:$0x3] }
 0x1fe   :  { %v1833_v56 = vld [vmem:[#allocation4 + $0x10] sm:$0x3]  ;;  %3445 = vmatmul.msk.f32.gmra.mxu2 %vm1603_vm7, %v1835_v49  ;;  %v1909_v57 = vld [vmem:[#allocation4 + $0x12] sm:$0x3]  ;;  %v4702_v49 = vld [vmem:[%s5095_s12 + $0x38] sm:$0xf] }
 0x1ff   :  { %v1908_v50 = vld [vmem:[#allocation4 + $0xa] sm:$0xff]  ;;  %3449 = vmatmul.msk.f32.gmra.mxu3 %vm1603_vm7, %v1833_v56  ;;  %3464 = vmatpush.msk.msra.mxu1 %vm1444_vm3, %v4702_v49 }
 0x200   :  { %3451 = vmatmul.msk.f32.gmra.mxu0 %vm1603_vm7, %v1908_v50  ;;  %v1669_v14 = vpop.f32.mrf.mxu3  ;;  %v4707_v56 = vld [vmem:[%s5095_s12 + $0xb0] sm:$0xf] }
 0x201   :  { %v1717_v51 = vadd.f32 %v1716_v11, %v1669_v14  ;;  %v4712_v11 = vld [vmem:[%s5093_s10] ss:$0 sm:$0xff]  ;;  %3466 = vmatpush.msk.msra.mxu2 %vm1444_vm3, %v4707_v56  ;;  %v2145_v14 = vld [vmem:[%s5095_s12 + $0x6c] sm:$0xff] }
 0x202   :  { %2174 = vmatpush.msra.mxu0 %v2145_v14  ;;  %2263 = vmatpush.msra.mxu3 %v2145_v14 }
 0x203   :  { %v1783_v27 = vadd.f32 %v1768_v53, %v1717_v51  ;;  %v4725_v51 = vld [vmem:[%s5095_s12 + $0x30] sm:$0xff]  ;;  %v4730_v53 = vld [vmem:[%s5095_s12 + $0xa8] sm:$0xff] }
 0x204   :  { %2200 = vmatpush.msra.mxu1 %v4725_v51  ;;  %2228 = vmatpush.msra.mxu2 %v4730_v53 }
 0x205   :  { %v1788_v0 = vadd.f32 %v4574_v60, %v1783_v27 }
 0x206   :  { %3446 = vmatmul.msk.f32.gmra.mxu2 %vm1603_vm7, %v1836_v63  ;;  %v2144_v63 = vld [vmem:[%s5095_s12 + $0x64] sm:$0xff] }
 0x207   :  { %3553 = vtanh.f32 %v1788_v0  ;;  %v4741_v0 = vld [vmem:[%s5095_s12 + $0x28] sm:$0xff]  ;;  %2175 = vmatpush.msra.mxu0 %v2144_v63  ;;  %2264 = vmatpush.msra.mxu3 %v2144_v63  ;;  %v3533_v63 = vld [vmem:[%s5093_s10] ss:$0 sm:$0xff] }
 0x208   :  { %3452 = vmatmul.msk.f32.gmra.mxu0 %vm1603_vm7, %v1909_v57  ;;  %v4746_v57 = vld [vmem:[%s5095_s12 + $0xa0] sm:$0xff]  ;;  %2201 = vmatpush.msra.mxu1 %v4741_v0 }
 0x209   :  { %2229 = vmatpush.msra.mxu2 %v4746_v57 }
 0x20b   :  { %v1722_v30 = vpop.f32.mrf.mxu0 }
 0x20c   :  { %v1771_v62 = vpop.f32.mrf.mxu1 }
 0x20d   :  { %v3554_v1 = vpop.eup %3553 }
 0x20e   :  { %1798 = vst.msk [vmem:[#allocation10] sm:$0xff] %vm1603_vm7, %v3554_v1 }
 0x210   :  { %v1672_v10 = vpop.f32.mrf.mxu3 }
 0x211   :  { %v1720_v2 = vadd.f32 %v1719_v54, %v1672_v10  ;;  %v2143_v54 = vld [vmem:[%s5095_s12 + $0x5c] sm:$0xff] }
 0x212   :  { %v4755_v10 = vld [vmem:[%s5095_s12 + $0x20] sm:$0xff]  ;;  %2176 = vmatpush.msra.mxu0 %v2143_v54  ;;  %2265 = vmatpush.msra.mxu3 %v2143_v54 }
 0x213   :  { %v1784_v7 = vadd.f32 %v1771_v62, %v1720_v2  ;;  %v4760_v62 = vld [vmem:[%s5094_s11] ss:$0 sm:$0xff]  ;;  %2202 = vmatpush.msra.mxu1 %v4755_v10  ;;  %v2506_v54 = vld [vmem:[#allocation2 + $0x24] ss:$2 sm:$0x1f] }
 0x215   :  { %v1789_v3 = vadd.f32 %v4574_v60, %v1784_v7  ;;  %v4766_v7 = vld [vmem:[%s5095_s12 + $0x98] sm:$0xff] }
 0x216   :  { %2230 = vmatpush.msra.mxu2 %v4766_v7 }
 0x217   :  { %3555 = vtanh.f32 %v1789_v3 }
 0x21b   :  { %v1725_v61 = vpop.f32.mrf.mxu0 }
 0x21c   :  { %v1774_v26 = vpop.f32.mrf.mxu1 }
 0x21d   :  { %v3556_v5 = vpop.eup %3555 }
 0x21e   :  { %1799 = vst.msk [vmem:[#allocation10 + $0x8] sm:$0xff] %vm1603_vm7, %v3556_v5 }
 0x220   :  { %v1675_v59 = vpop.f32.mrf.mxu3 }
 0x221   :  { %v1723_v23 = vadd.f32 %v1722_v30, %v1675_v59  ;;  %v2142_v30 = vld [vmem:[%s5095_s12 + $0x54] sm:$0xff] }
 0x222   :  { %v2134_v59 = vld [vmem:[%s5095_s12 + $0x18] sm:$0xff]  ;;  %2177 = vmatpush.msra.mxu0 %v2142_v30  ;;  %2266 = vmatpush.msra.mxu3 %v2142_v30 }
 0x223   :  { %v1785_v8 = vadd.f32 %v1774_v26, %v1723_v23  ;;  %2203 = vmatpush.msra.mxu1 %v2134_v59 }
 0x225   :  { %v1790_v28 = vadd.f32 %v4574_v60, %v1785_v8  ;;  %v1803_v19 = vld [vmem:[#allocation10] ss:$2 sm:$0xff]  ;;  %v1806_v12 = vld [vmem:[#allocation10 + $0x1] ss:$2 sm:$0xff] }
 0x226   :  { %v1809_v15 = vmax.f32 %v1803_v19, %v1806_v12  ;;  %v2150_v8 = vld [vmem:[%s5095_s12 + $0x90] sm:$0xff] }
 0x227   :  { %3557 = vtanh.f32 %v1790_v28  ;;  %v2141_v28 = vld [vmem:[%s5095_s12 + $0x4c] sm:$0xff]  ;;  %2231 = vmatpush.msra.mxu2 %v2150_v8 }
 0x228   :  { %1812 = vst.msk [vmem:[#allocation4 + $0x18] sm:$0xff] %vm1603_vm7, %v1809_v15  ;;  %v2133_v19 = vld [vmem:[%s5095_s12 + $0x10] sm:$0xff]  ;;  %2178 = vmatpush.msra.mxu0 %v2141_v28  ;;  %2267 = vmatpush.msra.mxu3 %v2141_v28 }
 0x229   :  { %2204 = vmatpush.msra.mxu1 %v2133_v19 }
 0x22b   :  { %v1728_v24 = vpop.f32.mrf.mxu0 }
 0x22c   :  { %v1777_v21 = vpop.f32.mrf.mxu1 }
 0x22d   :  { %v3558_v18 = vpop.eup %3557 }
 0x22e   :  { %1800 = vst.msk [vmem:[#allocation10 + $0x10] sm:$0xff] %vm1603_vm7, %v3558_v18  ;;  %v2149_v18 = vld [vmem:[%s5095_s12 + $0x88] sm:$0xff] }
 0x22f   :  { %v1985_v9 = vld [vmem:[#allocation4 + $0x18] sm:$0xff]  ;;  %2232 = vmatpush.msra.mxu2 %v2149_v18 }
 0x230   :  { %v1678_v39 = vpop.f32.mrf.mxu3  ;;  %3456 = vmatmul.msk.f32.vlgmr.msrb.gmra.mxu2 %vm1603_vm7, %v1985_v9  ;;  %v2132_v9 = vld [vmem:[%s5095_s12 + $0x8] sm:$0xff] }
 0x231   :  { %v1726_v34 = vadd.f32 %v1725_v61, %v1678_v39  ;;  %v2140_v61 = vld [vmem:[%s5095_s12 + $0x44] sm:$0xff]  ;;  %2205 = vmatpush.msra.mxu1 %v2132_v9 }
 0x232   :  { %v2148_v39 = vld [vmem:[%s5095_s12 + $0x80] sm:$0xff]  ;;  %2179 = vmatpush.msra.mxu0 %v2140_v61  ;;  %2268 = vmatpush.msra.mxu3 %v2140_v61 }
 0x233   :  { %v1786_v36 = vadd.f32 %v1777_v21, %v1726_v34  ;;  %v2139_v34 = vld [vmem:[%s5095_s12 + $0x3c] sm:$0xff]  ;;  %2233 = vmatpush.msra.mxu2 %v2148_v39 }
 0x234   :  { %v1780_v33 = vpop.f32.mrf.mxu1  ;;  %2180 = vmatpush.msra.mxu0 %v2139_v34  ;;  %2269 = vmatpush.msra.mxu3 %v2139_v34 }
 0x235   :  { %v1791_v22 = vadd.f32 %v4574_v60, %v1786_v36  ;;  %v2131_v36 = vld [vmem:[%s5095_s12] sm:$0xff] }
 0x236   :  { %2206 = vmatpush.msra.mxu1 %v2131_v36  ;;  %3470 = vmatpush.msk.msrb.mxu0 %vm1444_vm3, %v4702_v49 }
 0x237   :  { %3559 = vtanh.f32 %v1791_v22 }
 0x238   :  { %v1681_v25 = vpop.f32.mrf.mxu3  ;;  %2286 = vmatpush.msrb.mxu0 %v4725_v51 }
 0x239   :  { %v1729_v31 = vadd.f32 %v1728_v24, %v1681_v25  ;;  %v2147_v24 = vld [vmem:[%s5095_s12 + $0x78] sm:$0xff]  ;;  %s3605_s12 = smov [#allocation13]  }
 0x23a   :  { %2234 = vmatpush.msra.mxu2 %v2147_v24  ;;  %2287 = vmatpush.msrb.mxu0 %v4741_v0 }
 0x23b   :  { %v1787_v32 = vadd.f32 %v1780_v33, %v1729_v31 }
 0x23c   :  { %2288 = vmatpush.msrb.mxu0 %v4755_v10 }
 0x23d   :  { %v3560_v35 = vpop.eup %3559  ;;  %v1792_v48 = vadd.f32 %v4574_v60, %v1787_v32 }
 0x23e   :  { %1801 = vst.msk [vmem:[#allocation10 + $0x18] sm:$0xff] %vm1603_vm7, %v3560_v35  ;;  %2289 = vmatpush.msrb.mxu0 %v2134_v59 }
 0x23f   :  { %3561 = vtanh.f32 %v1792_v48  ;;  %v4815_v48 = vld [vmem:[%s5097_s14 + $0x8] sm:$0xff] }
 0x240   :  { %2367 = vmatpush.msrb.mxu2 %v4815_v48  ;;  %2290 = vmatpush.msrb.mxu0 %v2133_v19 }
 0x242   :  { %2291 = vmatpush.msrb.mxu0 %v2132_v9 }
 0x244   :  { %2292 = vmatpush.msrb.mxu0 %v2131_v36 }
 0x245   :  { %v3562_v37 = vpop.eup %3561  ;;  %v1804_v20 = vld [vmem:[#allocation10 + $0x10] ss:$2 sm:$0xff]  ;;  %v1807_v46 = vld [vmem:[#allocation10 + $0x11] ss:$2 sm:$0xff] }
 0x246   :  { %1802 = vst.msk [vmem:[#allocation10 + $0x20] sm:$0xff] %vm1603_vm7, %v3562_v37  ;;  %v1810_v38 = vmax.f32 %v1804_v20, %v1807_v46 }
 0x248   :  { %1813 = vst.msk [vmem:[#allocation4 + $0x20] sm:$0xff] %vm1603_vm7, %v1810_v38 }
 0x24d   :  { %v1805_v40 = vld [vmem:[#allocation10 + $0x20] ss:$2 sm:$0xf]  ;;  %v1808_v42 = vld [vmem:[#allocation10 + $0x21] ss:$2 sm:$0xf] }
 0x24e   :  { %v1811_v17 = vmax.f32 %v1805_v40, %v1808_v42 }
 0x24f   :  { %v1988_v44 = vld [vmem:[#allocation4 + $0x19] sm:$0xff] }
 0x250   :  { %v1986_v41 = vld [vmem:[#allocation4 + $0x20] sm:$0xff]  ;;  %3453 = vmatmul.msk.f32.vlgmr.msrb.gmra.mxu1 %vm1603_vm7, %v1988_v44  ;;  %1814 = vst.msk [vmem:[#allocation4 + $0x28] sm:$0xf] %vm1625_vm8, %v1811_v17 }
 0x251   :  { %v2061_v43 = vld [vmem:[#allocation4 + $0x1a] sm:$0xff]  ;;  %3457 = vmatmul.msk.f32.gmra.mxu2 %vm1603_vm7, %v1986_v41  ;;  %3472 = vmatpush.msk.msrb.mxu1 %vm1444_vm3, %v4707_v56 }
 0x252   :  { %3459 = vmatmul.msk.f32.vlgmr.msrb.gmra.mxu3 %vm1603_vm7, %v2061_v43 }
 0x253   :  { %2311 = vmatpush.msrb.mxu1 %v4730_v53 }
 0x255   :  { %2312 = vmatpush.msrb.mxu1 %v4746_v57 }
 0x257   :  { %v1989_v60 = vld [vmem:[#allocation4 + $0x21] sm:$0xff]  ;;  %v1990_v13 = vld [vmem:[#allocation4 + $0x29] sm:$0x3]  ;;  %2313 = vmatpush.msrb.mxu1 %v4766_v7 }
 0x258   :  { %v1987_v45 = vld [vmem:[#allocation4 + $0x28] sm:$0x3]  ;;  %3454 = vmatmul.msk.f32.gmra.mxu1 %vm1603_vm7, %v1989_v60  ;;  %v2063_v47 = vld [vmem:[#allocation4 + $0x2a] sm:$0x3] }
 0x259   :  { %v2062_v4 = vld [vmem:[#allocation4 + $0x22] sm:$0xff]  ;;  %3458 = vmatmul.msk.f32.gmra.mxu2 %vm1603_vm7, %v1987_v45  ;;  %v1898_v29 = vpop.f32.mrf.mxu3  ;;  %2314 = vmatpush.msrb.mxu1 %v2150_v8 }
 0x25a   :  { %3460 = vmatmul.msk.f32.gmra.mxu3 %vm1603_vm7, %v2062_v4  ;;  %v4838_v45 = vld [vmem:[%s5097_s14 + $0x20] sm:$0xff] }
 0x25b   :  { %2315 = vmatpush.msrb.mxu1 %v2149_v18 }
 0x25d   :  { %2316 = vmatpush.msrb.mxu1 %v2148_v39  ;;  %v2702_v39 = vld [vmem:[#allocation2 + $0x43] ss:$2 sm:$0xff] }
 0x25f   :  { %2317 = vmatpush.msrb.mxu1 %v2147_v24 }
 0x260   :  { %3455 = vmatmul.msk.f32.gmra.mxu1 %vm1603_vm7, %v1990_v13 }
 0x262   :  { %3461 = vmatmul.msk.f32.gmra.mxu3 %vm1603_vm7, %v2063_v47 }
 0x275   :  { %v1936_v16 = vpop.f32.mrf.mxu0 }
 0x279   :  { %v1863_v52 = vpop.f32.mrf.mxu2 }
 0x27a   :  { %v1899_v58 = vadd.f32 %v1898_v29, %v1863_v52  ;;  %v1901_v1 = vpop.f32.mrf.mxu3  ;;  %v2338_v29 = vld [vmem:[#allocation2 + $0x1] ss:$2 sm:$0xff]  ;;  %v2329_v52 = vld [vmem:[%s5097_s14 + $0x18] sm:$0xff] }
 0x27c   :  { %v1945_v50 = vadd.f32 %v1936_v16, %v1899_v58  ;;  %v2340_v16 = vld [vmem:[#allocation2 + $0x11] ss:$2 sm:$0xff]  ;;  %v2342_v58 = vld [vmem:[#allocation2 + $0x21] ss:$2 sm:$0x1f] }
 0x27d   :  { %v1939_v3 = vpop.f32.mrf.mxu0 }
 0x27e   :  { %v1951_v27 = vadd.f32 %v4694_v6, %v1945_v50  ;;  %v2504_v50 = vld [vmem:[#allocation2 + $0x14] ss:$2 sm:$0xff] }
 0x280   :  { %v1954_v2 = vmax.f32 %v1951_v27, 0.0 }
 0x281   :  { %v1866_v5 = vpop.f32.mrf.mxu2 }
 0x282   :  { %v1961_v23 = vmul.f32 %v4712_v11, %v1954_v2  ;;  %v1902_v26 = vadd.f32 %v1901_v1, %v1866_v5  ;;  %v1904_v25 = vpop.f32.mrf.mxu3  ;;  %v3534_v1 = vld [vmem:[%s5094_s11] ss:$0 sm:$0xff] }
 0x284   :  { %v1968_v12 = vadd.f32 %v4760_v62, %v1961_v23  ;;  %v1946_v15 = vadd.f32 %v1939_v3, %v1902_v26  ;;  %v2700_v23 = vld [vmem:[#allocation2 + $0x33] ss:$2 sm:$0xff] }
 0x285   :  { %v1942_v35 = vpop.f32.mrf.mxu0 }
 0x286   :  { %1972 = vst.msk [vmem:[#allocation11] sm:$0xff] %vm1971_vm9, %v1968_v12  ;;  %v1952_v21 = vadd.f32 %v4694_v6, %v1946_v15  ;;  %v2326_v12 = vld [vmem:[%s5097_s14] sm:$0xff]  ;;  %v2328_v15 = vld [vmem:[%s5097_s14 + $0x10] sm:$0xff] }
 0x287   :  { %2402 = vmatpush.msrb.mxu3 %v2326_v12 }
 0x288   :  { %v1955_v22 = vmax.f32 %v1952_v21, 0.0 }
 0x289   :  { %v1869_v31 = vpop.f32.mrf.mxu2 }
 0x28a   :  { %v1962_v33 = vmul.f32 %v4712_v11, %v1955_v22  ;;  %v1905_v32 = vadd.f32 %v1904_v25, %v1869_v31  ;;  %v2704_v22 = vld [vmem:[#allocation2 + $0x53] ss:$2 sm:$0x1f] }
 0x28c   :  { %v1969_v37 = vadd.f32 %v4760_v62, %v1962_v33  ;;  %v1947_v20 = vadd.f32 %v1942_v35, %v1905_v32 }
 0x28e   :  { %1973 = vst.msk [vmem:[#allocation11 + $0x8] sm:$0xff] %vm1971_vm9, %v1969_v37  ;;  %v1953_v46 = vadd.f32 %v4694_v6, %v1947_v20  ;;  %v2332_v20 = vld [vmem:[#allocation2] ss:$2 sm:$0xff] }
 0x290   :  { %v1956_v38 = vmax.f32 %v1953_v46, 0.0  ;;  %v2414_v46 = vld [vmem:[#allocation2 + $0x2] ss:$2 sm:$0xff] }
 0x292   :  { %v1963_v40 = vmul.f32 %v4712_v11, %v1956_v38  ;;  %v2458_v38 = vld [vmem:[#allocation2 + $0x3] ss:$2 sm:$0xff] }
 0x294   :  { %v1970_v42 = vadd.f32 %v4760_v62, %v1963_v40  ;;  %v2334_v40 = vld [vmem:[#allocation2 + $0x10] ss:$2 sm:$0xff] }
 0x295   :  { %v1976_v17 = vld [vmem:[#allocation11] ss:$3 sm:$0x3f] }
 0x296   :  { %1975 = vst.msk [vmem:[#allocation11 + $0x10] sm:$0x3] %vm1974_vm10, %v1970_v42  ;;  %v2416_v42 = vld [vmem:[#allocation2 + $0x12] ss:$2 sm:$0xff] }
 0x29d   :  { %v1978_v44 = vld [vmem:[#allocation11 + $0x1] ss:$3 sm:$0x3f]  ;;  %v1981_v43 = vld [vmem:[#allocation11 + $0x2] ss:$3 sm:$0x3f] }
 0x29e   :  { %v1979_v41 = vmax.f32 %v1976_v17, %v1978_v44  ;;  %v2336_v17 = vld [vmem:[#allocation2 + $0x20] ss:$2 sm:$0x1f] }
 0x29f   :  { %v2418_v44 = vld [vmem:[#allocation2 + $0x22] ss:$2 sm:$0x1f] }
 0x2a0   :  { %v1982_v60 = vmax.f32 %v1979_v41, %v1981_v43  ;;  %v2462_v41 = vld [vmem:[#allocation2 + $0x23] ss:$2 sm:$0x1f]  ;;  %v2580_v43 = vld [vmem:[#allocation2 + $0x31] ss:$2 sm:$0xff] }
 0x2a2   :  { %1984 = vst.msk [vmem:[#allocation5] sm:$0x3f] %vm1983_vm11, %v1982_v60  ;;  %v2574_v60 = vld [vmem:[#allocation2 + $0x30] ss:$2 sm:$0xff] }
 0x2a9   :  { %v2158_v4 = vld [vmem:[#allocation5 + $0x1] ss:$3 sm:$0x3]  ;;  %v2156_v13 = vld [vmem:[#allocation5] ss:$3 sm:$0x3] }
 0x2aa   :  { %3463 = vmatmul.msk.f32.vlgmr.msra.gmra.mxu0 %vm1971_vm9, %v2158_v4  ;;  %3465 = vmatmul.msk.f32.vlgmr.msra.gmra.mxu1 %vm1971_vm9, %v2156_v13  ;;  %v2212_v47 = vld [vmem:[#allocation5 + $0x2] ss:$3 sm:$0x3] }
 0x2ab   :  { %3467 = vmatmul.msk.f32.vlgmr.msra.gmra.mxu2 %vm1971_vm9, %v2212_v47  ;;  %2487 = vmatpush.msra.mxu1 %v2329_v52  ;;  %v2582_v47 = vld [vmem:[#allocation2 + $0x41] ss:$2 sm:$0xff] }
 0x2ac   :  { %2531 = vmatpush.msra.mxu2 %v4838_v45  ;;  %2443 = vmatpush.msra.mxu0 %v2328_v15 }
 0x2b3   :  { %3474 = vmatmul.msk.f32.vlgmr.msrb.gmra.mxu2 %vm146_vm0, %v2338_v29  ;;  %v2052_v56 = vpop.f32.mrf.mxu2  ;;  %v2576_v29 = vld [vmem:[#allocation2 + $0x40] ss:$2 sm:$0xff] }
 0x2b4   :  { %2729 = vmatpush.msrb.mxu2 %v2329_v52 }
 0x2bb   :  { %3475 = vmatmul.msk.f32.gmra.mxu2 %vm146_vm0, %v2340_v16  ;;  %v2658_v16 = vld [vmem:[#allocation2 + $0x42] ss:$2 sm:$0xff] }
 0x2c3   :  { %3476 = vmatmul.msk.f32.gmra.mxu2 %vm146_vm0, %v2342_v58  ;;  %v3535_v58 = vld [vmem:[%s5096_s13] ss:$0 sm:$0xff] }
 0x2cb   :  { %3486 = vmatmul.msk.f32.vlgmr.msra.gmra.mxu2 %vm146_vm0, %v2502_v55 }
 0x2cd   :  { %v2017_v49 = vpop.f32.mrf.mxu1 }
 0x2ce   :  { %v2053_v11 = vadd.f32 %v2052_v56, %v2017_v49 }
 0x2d3   :  { %3487 = vmatmul.msk.f32.gmra.mxu2 %vm146_vm0, %v2504_v50  ;;  %v2584_v50 = vld [vmem:[#allocation2 + $0x51] ss:$2 sm:$0x1f] }
 0x2d4   :  { %v2055_v0 = vpop.f32.mrf.mxu2 }
 0x2d5   :  { %v2090_v14 = vpop.f32.mrf.mxu3  ;;  %v2020_v53 = vpop.f32.mrf.mxu1 }
 0x2d6   :  { %v2099_v51 = vadd.f32 %v2090_v14, %v2053_v11  ;;  %v2056_v2 = vadd.f32 %v2055_v0, %v2020_v53  ;;  %v2578_v11 = vld [vmem:[#allocation2 + $0x50] ss:$2 sm:$0x1f] }
 0x2d7   :  { %v2660_v14 = vld [vmem:[#allocation2 + $0x52] ss:$2 sm:$0x1f] }
 0x2d8   :  { %v2102_v27 = vadd.f32 %v4694_v6, %v2099_v51  ;;  %v2744_v53 = vld [vmem:[#allocation2 + $0x34] ss:$2 sm:$0xff] }
 0x2da   :  { %v2105_v57 = vmax.f32 %v2102_v27, 0.0  ;;  %v2746_v27 = vld [vmem:[#allocation2 + $0x44] ss:$2 sm:$0xff] }
 0x2db   :  { %3488 = vmatmul.msk.f32.gmra.mxu2 %vm146_vm0, %v2506_v54 }
 0x2dc   :  { %v2112_v10 = vmul.f32 %v3533_v63, %v2105_v57  ;;  %v2058_v26 = vpop.f32.mrf.mxu2 }
 0x2dd   :  { %v2093_v62 = vpop.f32.mrf.mxu3  ;;  %v2023_v30 = vpop.f32.mrf.mxu1 }
 0x2de   :  { %v2119_v7 = vadd.f32 %v3534_v1, %v2112_v10  ;;  %v2100_v3 = vadd.f32 %v2093_v62, %v2056_v2  ;;  %v2059_v28 = vadd.f32 %v2058_v26, %v2023_v30  ;;  %v2813_v30 = vld [vmem:[%s5101_s18 + $0x18] sm:$0xff] }
 0x2e0   :  { %2122 = vst.msk [vmem:[#allocation11] sm:$0xff] %vm1971_vm9, %v2119_v7  ;;  %v2103_v5 = vadd.f32 %v4694_v6, %v2100_v3 }
 0x2e2   :  { %v2106_v59 = vmax.f32 %v2103_v5, 0.0 }
 0x2e3   :  { %3498 = vmatmul.msk.f32.vlgmr.msrb.gmra.mxu2 %vm146_vm0, %v2700_v23 }
 0x2e4   :  { %v2113_v8 = vmul.f32 %v3533_v63, %v2106_v59  ;;  %v2811_v59 = vld [vmem:[%s5101_s18 + $0x8] sm:$0xff] }
 0x2e5   :  { %v2096_v19 = vpop.f32.mrf.mxu3 }
 0x2e6   :  { %v2120_v18 = vadd.f32 %v3534_v1, %v2113_v8  ;;  %v2101_v61 = vadd.f32 %v2096_v19, %v2059_v28  ;;  %v2812_v8 = vld [vmem:[%s5101_s18 + $0x10] sm:$0xff]  ;;  %v2810_v28 = vld [vmem:[%s5101_s18] sm:$0xff] }
 0x2e8   :  { %2123 = vst.msk [vmem:[#allocation11 + $0x8] sm:$0xff] %vm1971_vm9, %v2120_v18  ;;  %v2104_v9 = vadd.f32 %v4694_v6, %v2101_v61  ;;  %v2815_v18 = vld [vmem:[%s5101_s18 + $0x28] sm:$0xff]  ;;  %v2814_v61 = vld [vmem:[%s5101_s18 + $0x20] sm:$0xff] }
 0x2e9   :  { %2906 = vmatpush.msra.mxu2 %v2815_v18 }
 0x2ea   :  { %v2107_v21 = vmax.f32 %v2104_v9, 0.0  ;;  %v3065_v9 = vld [vmem:[%s5103_s20 + $0x98] sm:$0xff] }
 0x2eb   :  { %3499 = vmatmul.msk.f32.gmra.mxu2 %vm146_vm0, %v2702_v39 }
 0x2ec   :  { %v2114_v34 = vmul.f32 %v3533_v63, %v2107_v21  ;;  %v2748_v63 = vld [vmem:[#allocation2 + $0x54] ss:$2 sm:$0x1f]  ;;  %2907 = vmatpush.msra.mxu2 %v2814_v61 }
 0x2ee   :  { %v2121_v36 = vadd.f32 %v3534_v1, %v2114_v34  ;;  %v4931_v34 = vld [vmem:[%s5098_s15] ss:$0 sm:$0xff]  ;;  %3076 = vmatpush.msrb.mxu2 %v3065_v9  ;;  %v3049_v9 = vld [vmem:[%s5103_s20 + $0x28] sm:$0xff] }
 0x2ef   :  { %v2125_v24 = vld [vmem:[#allocation11] ss:$3 sm:$0x3f] }
 0x2f0   :  { %2124 = vst.msk [vmem:[#allocation11 + $0x10] sm:$0x3] %vm1974_vm10, %v2121_v36 }
 0x2f3   :  { %3500 = vmatmul.msk.f32.gmra.mxu2 %vm146_vm0, %v2704_v22 }
 0x2f7   :  { %v2126_v25 = vld [vmem:[#allocation11 + $0x1] ss:$3 sm:$0x3f]  ;;  %v2128_v33 = vld [vmem:[#allocation11 + $0x2] ss:$3 sm:$0x3f] }
 0x2f8   :  { %v2127_v31 = vmax.f32 %v2125_v24, %v2126_v25  ;;  %v3064_v25 = vld [vmem:[%s5103_s20 + $0x90] sm:$0xff] }
 0x2f9   :  { %3077 = vmatpush.msrb.mxu2 %v3064_v25 }
 0x2fa   :  { %v2129_v32 = vmax.f32 %v2127_v31, %v2128_v33  ;;  %v3537_v33 = vld [vmem:[%s5099_s16] ss:$0 sm:$0xff] }
 0x2fc   :  { %2130 = vst.msk [vmem:[#allocation5 + $0x8] sm:$0x3f] %vm1983_vm11, %v2129_v32 }
 0x303   :  { %v2250_v35 = vld [vmem:[#allocation5 + $0x9] ss:$3 sm:$0x3]  ;;  %v2248_v6 = vld [vmem:[#allocation5 + $0x8] ss:$3 sm:$0x3] }
 0x304   :  { %3469 = vmatmul.msk.f32.vlgmr.msra.gmra.mxu3 %vm1971_vm9, %v2250_v35  ;;  %3471 = vmatmul.msk.f32.vlgmr.msrb.gmra.mxu0 %vm1971_vm9, %v2248_v6  ;;  %v2298_v37 = vld [vmem:[#allocation5 + $0xa] ss:$3 sm:$0x3]  ;;  %v3063_v6 = vld [vmem:[%s5103_s20 + $0x88] sm:$0xff] }
 0x305   :  { %3473 = vmatmul.msk.f32.vlgmr.msrb.gmra.mxu1 %vm1971_vm9, %v2298_v37  ;;  %2609 = vmatpush.msra.mxu3 %v4815_v48  ;;  %v2460_v48 = vld [vmem:[#allocation2 + $0x13] ss:$2 sm:$0xff] }
 0x306   :  { %2644 = vmatpush.msrb.mxu0 %v2326_v12  ;;  %2685 = vmatpush.msrb.mxu1 %v2328_v15 }
 0x307   :  { %3078 = vmatpush.msrb.mxu2 %v3063_v6 }
 0x30c   :  { %3477 = vmatmul.msk.f32.vlgmr.msrb.gmra.mxu3 %vm146_vm0, %v2332_v20  ;;  %3480 = vmatmul.msk.f32.vlgmr.msra.gmra.mxu0 %vm146_vm0, %v2414_v46  ;;  %v3538_v20 = vld [vmem:[%s5131_s0] ss:$0 sm:$0xff] }
 0x30d   :  { %3483 = vmatmul.msk.f32.vlgmr.msra.gmra.mxu1 %vm146_vm0, %v2458_v38  ;;  %2773 = vmatpush.msrb.mxu3 %v4838_v45  ;;  %v2656_v45 = vld [vmem:[#allocation2 + $0x32] ss:$2 sm:$0xff] }
 0x30e   :  { %2844 = vmatpush.msra.mxu0 %v2813_v30  ;;  %2873 = vmatpush.msra.mxu1 %v2811_v59  ;;  %v3062_v38 = vld [vmem:[%s5103_s20 + $0x80] sm:$0xff] }
 0x30f   :  { %3079 = vmatpush.msrb.mxu2 %v3062_v38 }
 0x310   :  { %2845 = vmatpush.msra.mxu0 %v2812_v8  ;;  %2874 = vmatpush.msra.mxu1 %v2810_v28 }
 0x314   :  { %3478 = vmatmul.msk.f32.gmra.mxu3 %vm146_vm0, %v2334_v40  ;;  %3481 = vmatmul.msk.f32.gmra.mxu0 %vm146_vm0, %v2416_v42  ;;  %v3061_v42 = vld [vmem:[%s5103_s20 + $0x78] sm:$0xff] }
 0x315   :  { %3484 = vmatmul.msk.f32.gmra.mxu1 %vm146_vm0, %v2460_v48  ;;  %3080 = vmatpush.msrb.mxu2 %v3061_v42 }
 0x31c   :  { %3479 = vmatmul.msk.f32.gmra.mxu3 %vm146_vm0, %v2336_v17  ;;  %3482 = vmatmul.msk.f32.gmra.mxu0 %vm146_vm0, %v2418_v44 }
 0x31d   :  { %3485 = vmatmul.msk.f32.gmra.mxu1 %vm146_vm0, %v2462_v41 }
 0x324   :  { %3489 = vmatmul.msk.f32.vlgmr.msra.gmra.mxu3 %vm146_vm0, %v2580_v43  ;;  %3492 = vmatmul.msk.f32.vlgmr.msrb.gmra.mxu0 %vm146_vm0, %v2574_v60  ;;  %v3060_v60 = vld [vmem:[%s5103_s20 + $0x70] sm:$0xff] }
 0x325   :  { %3495 = vmatmul.msk.f32.vlgmr.msrb.gmra.mxu1 %vm146_vm0, %v2656_v45  ;;  %2960 = vmatpush.msra.mxu3 %v2813_v30 }
 0x326   :  { %2989 = vmatpush.msrb.mxu0 %v2811_v59  ;;  %3022 = vmatpush.msrb.mxu1 %v2815_v18 }
 0x327   :  { %v2182_v4 = vpop.f32.mrf.mxu0  ;;  %v2208_v13 = vpop.f32.mrf.mxu1  ;;  %2961 = vmatpush.msra.mxu3 %v2812_v8  ;;  %3081 = vmatpush.msrb.mxu2 %v3060_v60  ;;  %v3052_v8 = vld [vmem:[%s5103_s20 + $0x40] sm:$0xff] }
 0x328   :  { %v2209_v52 = vadd.f32 %v2208_v13, %v2182_v4  ;;  %2990 = vmatpush.msrb.mxu0 %v2810_v28  ;;  %3023 = vmatpush.msrb.mxu1 %v2814_v61  ;;  %v3044_v60 = vld [vmem:[%s5103_s20] sm:$0xff] }
 0x32c   :  { %3490 = vmatmul.msk.f32.gmra.mxu3 %vm146_vm0, %v2582_v47  ;;  %3493 = vmatmul.msk.f32.gmra.mxu0 %vm146_vm0, %v2576_v29  ;;  %v3059_v47 = vld [vmem:[%s5103_s20 + $0x68] sm:$0xff] }
 0x32d   :  { %3496 = vmatmul.msk.f32.gmra.mxu1 %vm146_vm0, %v2658_v16  ;;  %3082 = vmatpush.msrb.mxu2 %v3059_v47 }
 0x32e   :  { %v2236_v55 = vpop.f32.mrf.mxu2 }
 0x32f   :  { %v2239_v49 = vadd.f32 %v2236_v55, %v2209_v52 }
 0x331   :  { %v2243_v56 = vadd.f32 %v3535_v58, %v2239_v49 }
 0x333   :  { %3563 = vtanh.f32 %v2243_v56 }
 0x334   :  { %3491 = vmatmul.msk.f32.gmra.mxu3 %vm146_vm0, %v2584_v50  ;;  %3494 = vmatmul.msk.f32.gmra.mxu0 %vm146_vm0, %v2578_v11  ;;  %v3057_v50 = vld [vmem:[%s5103_s20 + $0x58] sm:$0xff] }
 0x335   :  { %3497 = vmatmul.msk.f32.gmra.mxu1 %vm146_vm0, %v2660_v14 }
 0x336   :  { %v2369_v0 = vpop.f32.mrf.mxu2 }
 0x339   :  { %v3564_v51 = vpop.eup %3563 }
 0x33a   :  { %2246 = vst.msk [vmem:[#allocation6] sm:$0x3] %vm2245_vm12, %v3564_v51 }
 0x33c   :  { %3501 = vmatmul.msk.f32.vlgmr.msrb.gmra.mxu3 %vm146_vm0, %v2744_v53  ;;  %v3056_v53 = vld [vmem:[%s5103_s20 + $0x50] sm:$0xff] }
 0x33e   :  { %v2372_v57 = vpop.f32.mrf.mxu2 }
 0x344   :  { %3502 = vmatmul.msk.f32.gmra.mxu3 %vm146_vm0, %v2746_v27 }
 0x346   :  { %v4905_v10 = vpop.f32.mrf.mxu2 }
 0x34c   :  { %3503 = vmatmul.msk.f32.gmra.mxu3 %vm146_vm0, %v2748_v63  ;;  %vm2925_vm0 = vcmask 123904  }
 0x34e   :  { %v2533_v12 = vpop.f32.mrf.mxu2 }
 0x356   :  { %v2536_v40 = vpop.f32.mrf.mxu2 }
 0x35e   :  { %v2539_v56 = vpop.f32.mrf.mxu2 }
 0x381   :  { %v2294_v1 = vpop.f32.mrf.mxu0 }
 0x382   :  { %v2319_v54 = vpop.f32.mrf.mxu1 }
 0x387   :  { %v2271_v2 = vpop.f32.mrf.mxu3 }
 0x388   :  { %v2295_v62 = vadd.f32 %v2294_v1, %v2271_v2 }
 0x389   :  { %v2445_v5 = vpop.f32.mrf.mxu0 }
 0x38a   :  { %v2322_v7 = vadd.f32 %v2319_v54, %v2295_v62  ;;  %v2489_v23 = vpop.f32.mrf.mxu1 }
 0x38c   :  { %v2323_v3 = vadd.f32 %v3535_v58, %v2322_v7  ;;  %v3058_v58 = vld [vmem:[%s5103_s20 + $0x60] sm:$0xff] }
 0x38d   :  { %3083 = vmatpush.msrb.mxu2 %v3058_v58 }
 0x38e   :  { %3565 = vtanh.f32 %v2323_v3 }
 0x38f   :  { %v2404_v26 = vpop.f32.mrf.mxu3  ;;  %3084 = vmatpush.msrb.mxu2 %v3057_v50 }
 0x390   :  { %v2405_v19 = vadd.f32 %v2404_v26, %v2369_v0  ;;  %v2731_v26 = vpop.f32.mrf.mxu2 }
 0x391   :  { %v2448_v22 = vpop.f32.mrf.mxu0  ;;  %3085 = vmatpush.msrb.mxu2 %v3056_v53 }
 0x392   :  { %v2454_v15 = vadd.f32 %v2445_v5, %v2405_v19  ;;  %v2492_v35 = vpop.f32.mrf.mxu1  ;;  %v3051_v19 = vld [vmem:[%s5103_s20 + $0x38] sm:$0xff] }
 0x394   :  { %v3566_v21 = vpop.eup %3565  ;;  %v2498_v39 = vadd.f32 %v2489_v23, %v2454_v15  ;;  %v3053_v23 = vld [vmem:[%s5103_s20 + $0x48] sm:$0xff]  ;;  %v3050_v15 = vld [vmem:[%s5103_s20 + $0x30] sm:$0xff] }
 0x395   :  { %2325 = vst.msk [vmem:[#allocation6 + $0x8] sm:$0x3] %vm2245_vm12, %v3566_v21  ;;  %3099 = vmatpush.msrb.mxu3 %v3053_v23 }
 0x396   :  { %v2542_v36 = vadd.f32 %v2533_v12, %v2498_v39 }
 0x397   :  { %v2407_v24 = vpop.f32.mrf.mxu3  ;;  %3100 = vmatpush.msrb.mxu3 %v3052_v8 }
 0x398   :  { %v2548_v31 = vadd.f32 %v4931_v34, %v2542_v36  ;;  %v2408_v32 = vadd.f32 %v2407_v24, %v2372_v57  ;;  %v3048_v24 = vld [vmem:[%s5103_s20 + $0x20] sm:$0xff] }
 0x399   :  { %v2451_v13 = vpop.f32.mrf.mxu0  ;;  %3101 = vmatpush.msrb.mxu3 %v3051_v19 }
 0x39a   :  { %v2551_v37 = vmax.f32 %v2548_v31, 0.0  ;;  %v2455_v46 = vadd.f32 %v2448_v22, %v2408_v32  ;;  %v2495_v52 = vpop.f32.mrf.mxu1  ;;  %v2734_v32 = vpop.f32.mrf.mxu2 }
 0x39b   :  { %3102 = vmatpush.msrb.mxu3 %v3050_v15  ;;  %v3143_v15 = vld [vmem:[%s5104_s21 + $0x18] sm:$0xff] }
 0x39c   :  { %v2558_v48 = vmul.f32 %v3537_v33, %v2551_v37  ;;  %v2499_v17 = vadd.f32 %v2492_v35, %v2455_v46  ;;  %v3047_v35 = vld [vmem:[%s5103_s20 + $0x18] sm:$0xff]  ;;  %v3540_v37 = vld [vmem:[%s5131_s0] ss:$0 sm:$0xff]  ;;  %s3277_s0 = sshll.u32 %s5106_s23, 4  ;;  %s3278_s0 = int_to_ptr.hbm [resolvable:$true] %s3277_s0 }
 0x39d   :  { %3103 = vmatpush.msrb.mxu3 %v3049_v9  ;;  %v3227_v9 = vld [vmem:[%s5104_s21 + $0x48] sm:$0xff] }
 0x39e   :  { %v2565_v44 = vadd.f32 %v3538_v20, %v2558_v48  ;;  %v2543_v41 = vadd.f32 %v2536_v40, %v2499_v17  ;;  %v3045_v48 = vld [vmem:[%s5103_s20 + $0x8] sm:$0xff] }
 0x39f   :  { %v2410_v43 = vpop.f32.mrf.mxu3  ;;  %3104 = vmatpush.msrb.mxu3 %v3048_v24 }
 0x3a0   :  { %2569 = vst.msk [vmem:[#allocation7] sm:$0xff] %vm2568_vm13, %v2565_v44  ;;  %v2549_v45 = vadd.f32 %v4931_v34, %v2543_v41  ;;  %v2411_v4 = vadd.f32 %v2410_v43, %v4905_v10  ;;  %v3055_v43 = vld [vmem:[#allocation6 + $0x1] ss:$8 sm:$0x3] }
 0x3a1   :  { %v2646_v2 = vpop.f32.mrf.mxu0  ;;  %3105 = vmatpush.msrb.mxu3 %v3047_v35 }
 0x3a2   :  { %v2552_v29 = vmax.f32 %v2549_v45, 0.0  ;;  %v2456_v16 = vadd.f32 %v2451_v13, %v2411_v4  ;;  %v2687_v62 = vpop.f32.mrf.mxu1 }
 0x3a4   :  { %v2559_v55 = vmul.f32 %v3537_v33, %v2552_v29  ;;  %v2500_v49 = vadd.f32 %v2495_v52, %v2456_v16  ;;  %v2737_v29 = vpop.f32.mrf.mxu2 }
 0x3a6   :  { %v2566_v11 = vadd.f32 %v3538_v20, %v2559_v55  ;;  %v2544_v14 = vadd.f32 %v2539_v56, %v2500_v49 }
 0x3a7   :  { %v2611_v51 = vpop.f32.mrf.mxu3 }
 0x3a8   :  { %2570 = vst.msk [vmem:[#allocation7 + $0x8] sm:$0xff] %vm2568_vm13, %v2566_v11  ;;  %v2550_v27 = vadd.f32 %v4931_v34, %v2544_v14  ;;  %v2647_v7 = vadd.f32 %v2646_v2, %v2611_v51  ;;  %v3541_v2 = vld [vmem:[%s5102_s19] ss:$0 sm:$0xff] }
 0x3a9   :  { %v2649_v12 = vpop.f32.mrf.mxu0 }
 0x3aa   :  { %v2553_v63 = vmax.f32 %v2550_v27, 0.0  ;;  %v2696_v28 = vadd.f32 %v2687_v62, %v2647_v7  ;;  %v2690_v21 = vpop.f32.mrf.mxu1 }
 0x3ac   :  { %v2560_v0 = vmul.f32 %v3537_v33, %v2553_v63  ;;  %v2740_v61 = vadd.f32 %v2731_v26, %v2696_v28  ;;  %v3539_v33 = vld [vmem:[%s5099_s16] ss:$0 sm:$0xff]  ;;  %s3275_s16 = sshll.u32 %s3605_s12, 4  ;;  %s3276_s16 = int_to_ptr.vmem [resolvable:$true] %s3275_s16 }
 0x3ae   :  { %v2567_v57 = vadd.f32 %v3538_v20, %v2560_v0  ;;  %v3046_v20 = vld [vmem:[%s5103_s20 + $0x10] sm:$0xff] }
 0x3af   :  { %v2614_v1 = vpop.f32.mrf.mxu3  ;;  %v2821_v54 = vld [vmem:[#allocation7 + $0x1] ss:$2 sm:$0xff]  ;;  %v2817_v10 = vld [vmem:[#allocation7] ss:$2 sm:$0xff]  ;;  %3106 = vmatpush.msrb.mxu3 %v3046_v20 }
 0x3b0   :  { %2572 = vst.msk [vmem:[#allocation7 + $0x10] sm:$0x1f] %vm2571_vm14, %v2567_v57  ;;  %3504 = vmatmul.msk.f32.vlgmr.msra.gmra.mxu0 %vm2568_vm13, %v2821_v54  ;;  %3506 = vmatmul.msk.f32.vlgmr.msra.gmra.mxu1 %vm2568_vm13, %v2817_v10  ;;  %v2650_v18 = vadd.f32 %v2649_v12, %v2614_v1  ;;  %v3115_v12 = vld [vmem:[%s5104_s21 + $0x8] sm:$0xff] }
 0x3b1   :  { %v2652_v46 = vpop.f32.mrf.mxu0  ;;  %3107 = vmatpush.msrb.mxu3 %v3045_v48  ;;  %3133 = vmatpush.msra.mxu0 %v3115_v12 }
 0x3b2   :  { %v2697_v25 = vadd.f32 %v2690_v21, %v2650_v18  ;;  %v2693_v45 = vpop.f32.mrf.mxu1  ;;  %v3114_v18 = vld [vmem:[%s5104_s21] sm:$0xff]  ;;  %3161 = vmatpush.msra.mxu1 %v3143_v15 }
 0x3b3   :  { %3108 = vmatpush.msrb.mxu3 %v3044_v60  ;;  %v3226_v21 = vld [vmem:[%s5104_s21 + $0x40] sm:$0xff]  ;;  %3134 = vmatpush.msra.mxu0 %v3114_v18 }
 0x3b4   :  { %v2741_v42 = vadd.f32 %v2734_v32, %v2697_v25 }
 0x3b7   :  { %v2617_v3 = vpop.f32.mrf.mxu3  ;;  %v2823_v5 = vld [vmem:[#allocation7 + $0x11] ss:$2 sm:$0x3]  ;;  %v2819_v30 = vld [vmem:[#allocation7 + $0x10] ss:$2 sm:$0x3] }
 0x3b8   :  { %3505 = vmatmul.msk.f32.gmra.mxu0 %vm2568_vm13, %v2823_v5  ;;  %3507 = vmatmul.msk.f32.gmra.mxu1 %vm2568_vm13, %v2819_v30  ;;  %v2883_v59 = vld [vmem:[#allocation7 + $0x2] ss:$2 sm:$0xff]  ;;  %v2885_v22 = vld [vmem:[#allocation7 + $0x12] ss:$2 sm:$0x3]  ;;  %v2653_v38 = vadd.f32 %v2652_v46, %v2617_v3  ;;  %v3171_v46 = vld [vmem:[%s5104_s21 + $0x28] sm:$0xff] }
 0x3b9   :  { %3508 = vmatmul.msk.f32.vlgmr.msra.gmra.mxu2 %vm2568_vm13, %v2883_v59 }
 0x3ba   :  { %v2698_v4 = vadd.f32 %v2693_v45, %v2653_v38  ;;  %3245 = vmatpush.msra.mxu2 %v3227_v9  ;;  %v3199_v38 = vld [vmem:[%s5104_s21 + $0x38] sm:$0xff] }
 0x3bc   :  { %v2742_v52 = vadd.f32 %v2737_v29, %v2698_v4  ;;  %3246 = vmatpush.msra.mxu2 %v3226_v21 }
 0x3bf   :  { %v2775_v39 = vpop.f32.mrf.mxu3 }
 0x3c0   :  { %v2784_v36 = vadd.f32 %v2775_v39, %v2740_v61  ;;  %v3142_v61 = vld [vmem:[%s5104_s21 + $0x10] sm:$0xff] }
 0x3c1   :  { %3509 = vmatmul.msk.f32.gmra.mxu2 %vm2568_vm13, %v2885_v22  ;;  %3162 = vmatpush.msra.mxu1 %v3142_v61 }
 0x3c2   :  { %v2787_v31 = vadd.f32 %v4931_v34, %v2784_v36 }
 0x3c4   :  { %v2790_v6 = vmax.f32 %v2787_v31, 0.0 }
 0x3c6   :  { %v2797_v40 = vmul.f32 %v3539_v33, %v2790_v6 }
 0x3c7   :  { %v2778_v17 = vpop.f32.mrf.mxu3 }
 0x3c8   :  { %v2804_v44 = vadd.f32 %v3540_v37, %v2797_v40  ;;  %v2785_v41 = vadd.f32 %v2778_v17, %v2741_v42  ;;  %v3170_v40 = vld [vmem:[%s5104_s21 + $0x20] sm:$0xff]  ;;  %v3198_v42 = vld [vmem:[%s5104_s21 + $0x30] sm:$0xff] }
 0x3c9   :  { %3516 = vmatmul.msk.f32.vlgmr.msrb.gmra.mxu2 %vm3066_vm15, %v3055_v43 }
 0x3ca   :  { %2807 = vst.msk [vmem:[#allocation7 + $0x18] sm:$0xff] %vm2568_vm13, %v2804_v44  ;;  %v2788_v13 = vadd.f32 %v4931_v34, %v2785_v41 }
 0x3cc   :  { %v2791_v47 = vmax.f32 %v2788_v13, 0.0 }
 0x3ce   :  { %v2798_v16 = vmul.f32 %v3539_v33, %v2791_v47 }
 0x3cf   :  { %v2781_v58 = vpop.f32.mrf.mxu3 }
 0x3d0   :  { %v2805_v55 = vadd.f32 %v3540_v37, %v2798_v16  ;;  %v2786_v49 = vadd.f32 %v2781_v58, %v2742_v52 }
 0x3d2   :  { %2808 = vst.msk [vmem:[#allocation7 + $0x20] sm:$0xff] %vm2568_vm13, %v2805_v55  ;;  %v2789_v56 = vadd.f32 %v4931_v34, %v2786_v49  ;;  %v3043_v34 = vld [vmem:[#allocation6] ss:$8 sm:$0x3] }
 0x3d4   :  { %v2792_v50 = vmax.f32 %v2789_v56, 0.0 }
 0x3d6   :  { %v2799_v11 = vmul.f32 %v3539_v33, %v2792_v50 }
 0x3d8   :  { %v2806_v14 = vadd.f32 %v3540_v37, %v2799_v11 }
 0x3d9   :  { %v2937_v51 = vld [vmem:[#allocation7 + $0x19] ss:$2 sm:$0xff]  ;;  %v2933_v53 = vld [vmem:[#allocation7 + $0x18] ss:$2 sm:$0xff] }
 0x3da   :  { %2809 = vst.msk [vmem:[#allocation7 + $0x28] sm:$0x1f] %vm2571_vm14, %v2806_v14  ;;  %3510 = vmatmul.msk.f32.vlgmr.msra.gmra.mxu3 %vm2568_vm13, %v2937_v51  ;;  %3512 = vmatmul.msk.f32.vlgmr.msrb.gmra.mxu0 %vm2568_vm13, %v2933_v53 }
 0x3db   :  { %3189 = vmatpush.msrb.mxu0 %v3171_v46 }
 0x3dd   :  { %3190 = vmatpush.msrb.mxu0 %v3170_v40 }
 0x3e1   :  { %v2939_v27 = vld [vmem:[#allocation7 + $0x29] ss:$2 sm:$0x3]  ;;  %v2935_v63 = vld [vmem:[#allocation7 + $0x28] ss:$2 sm:$0x3] }
 0x3e2   :  { %3511 = vmatmul.msk.f32.gmra.mxu3 %vm2568_vm13, %v2939_v27  ;;  %3513 = vmatmul.msk.f32.gmra.mxu0 %vm2568_vm13, %v2935_v63  ;;  %v2999_v0 = vld [vmem:[#allocation7 + $0x1a] ss:$2 sm:$0xff]  ;;  %v3001_v57 = vld [vmem:[#allocation7 + $0x2a] ss:$2 sm:$0x3] }
 0x3e3   :  { %3514 = vmatmul.msk.f32.vlgmr.msrb.gmra.mxu1 %vm2568_vm13, %v2999_v0  ;;  %v3542_v0 = vld [vmem:[%s5105_s22] ss:$0 sm:$0xff] }
 0x3e4   :  { %3217 = vmatpush.msrb.mxu1 %v3199_v38 }
 0x3e6   :  { %3218 = vmatpush.msrb.mxu1 %v3198_v42 }
 0x3ea   :  { %3517 = vmatmul.msk.f32.vlgmr.msrb.gmra.mxu3 %vm3066_vm15, %v3043_v34 }
 0x3eb   :  { %3515 = vmatmul.msk.f32.gmra.mxu1 %vm2568_vm13, %v3001_v57 }
 0x42d   :  { %v2847_v1 = vpop.f32.mrf.mxu0  ;;  %v2876_v54 = vpop.f32.mrf.mxu1 }
 0x42e   :  { %v2877_v10 = vadd.f32 %v2876_v54, %v2847_v1 }
 0x435   :  { %v2850_v5 = vpop.f32.mrf.mxu0  ;;  %v2879_v30 = vpop.f32.mrf.mxu1 }
 0x436   :  { %v2880_v59 = vadd.f32 %v2879_v30, %v2850_v5 }
 0x43c   :  { %v2909_v62 = vpop.f32.mrf.mxu2 }
 0x43d   :  { %v2915_v7 = vadd.f32 %v2909_v62, %v2877_v10 }
 0x43f   :  { %v2920_v3 = vadd.f32 %v3541_v2, %v2915_v7 }
 0x441   :  { %3567 = vtanh.f32 %v2920_v3 }
 0x444   :  { %v2912_v23 = vpop.f32.mrf.mxu2 }
 0x445   :  { %v2916_v26 = vadd.f32 %v2912_v23, %v2880_v59 }
 0x447   :  { %v3568_v8 = vpop.eup %3567  ;;  %v2921_v28 = vadd.f32 %v3541_v2, %v2916_v26 }
 0x448   :  { %2924 = vst.msk [vmem:[#allocation12] sm:$0xff] %vm2568_vm13, %v3568_v8 }
 0x449   :  { %3569 = vtanh.f32 %v2921_v28 }
 0x44c   :  { %v3087_v55 = vpop.f32.mrf.mxu2 }
 0x44f   :  { %v3570_v19 = vpop.eup %3569 }
 0x450   :  { %2926 = vst.msk [vmem:[#allocation12 + $0x8] sm:$0x3] %vm2925_vm0, %v3570_v19 }
 0x457   :  { %v2927_v39 = vld [vmem:[#allocation12] ss:$2 sm:$0x1f]  ;;  %v2929_v36 = vld [vmem:[#allocation12 + $0x1] ss:$2 sm:$0x1f]  ;;  %v2992_v24 = vpop.f32.mrf.mxu0 }
 0x458   :  { %v2930_v22 = vmax.f32 %v2927_v39, %v2929_v36 }
 0x45a   :  { %2931 = vst.msk [vmem:[#allocation8] sm:$0x1f] %vm2571_vm14, %v2930_v22 }
 0x45d   :  { %v2963_v25 = vpop.f32.mrf.mxu3 }
 0x45e   :  { %v2993_v31 = vadd.f32 %v2992_v24, %v2963_v25 }
 0x45f   :  { %v2995_v6 = vpop.f32.mrf.mxu0 }
 0x460   :  { %v3025_v33 = vpop.f32.mrf.mxu1 }
 0x461   :  { %v3031_v32 = vadd.f32 %v3025_v33, %v2993_v31 }
 0x463   :  { %v3033_v35 = vadd.f32 %v3541_v2, %v3031_v32 }
 0x465   :  { %3571 = vtanh.f32 %v3033_v35  ;;  %v2966_v37 = vpop.f32.mrf.mxu3 }
 0x466   :  { %v2996_v20 = vadd.f32 %v2995_v6, %v2966_v37 }
 0x468   :  { %v3028_v48 = vpop.f32.mrf.mxu1 }
 0x469   :  { %v3032_v17 = vadd.f32 %v3028_v48, %v2996_v20 }
 0x46b   :  { %v3572_v44 = vpop.eup %3571  ;;  %v3034_v41 = vadd.f32 %v3541_v2, %v3032_v17 }
 0x46c   :  { %3037 = vst.msk [vmem:[#allocation12] sm:$0xff] %vm2568_vm13, %v3572_v44 }
 0x46d   :  { %3573 = vtanh.f32 %v3034_v41  ;;  %v3110_v58 = vpop.f32.mrf.mxu3 }
 0x46e   :  { %v3111_v50 = vadd.f32 %v3110_v58, %v3087_v55 }
 0x473   :  { %v3574_v43 = vpop.eup %3573 }
 0x474   :  { %3038 = vst.msk [vmem:[#allocation12 + $0x8] sm:$0x3] %vm2925_vm0, %v3574_v43 }
 0x47b   :  { %v3039_v60 = vld [vmem:[#allocation12] ss:$2 sm:$0x1f]  ;;  %v3040_v45 = vld [vmem:[#allocation12 + $0x1] ss:$2 sm:$0x1f] }
 0x47c   :  { %v3041_v4 = vmax.f32 %v3039_v60, %v3040_v45 }
 0x47e   :  { %3042 = vst.msk [vmem:[#allocation8 + $0x8] sm:$0x1f] %vm2571_vm14, %v3041_v4 }
 0x485   :  { %v3113_v13 = vld [vmem:[#allocation8] ss:$8 sm:$0x3]  ;;  %v3141_v47 = vld [vmem:[#allocation8 + $0x1] ss:$8 sm:$0x3] }
 0x486   :  { %3518 = vmatmul.msk.f32.vlgmr.msra.gmra.mxu0 %vm2568_vm13, %v3113_v13  ;;  %3519 = vmatmul.msk.f32.vlgmr.msra.gmra.mxu1 %vm2568_vm13, %v3141_v47  ;;  %v3225_v29 = vld [vmem:[#allocation8 + $0x4] ss:$8 sm:$0x3]  ;;  %v3169_v16 = vld [vmem:[#allocation8 + $0x2] ss:$8 sm:$0x3] }
 0x487   :  { %3522 = vmatmul.msk.f32.vlgmr.msra.gmra.mxu2 %vm2568_vm13, %v3225_v29  ;;  %v3197_v52 = vld [vmem:[#allocation8 + $0x3] ss:$8 sm:$0x3] }
 0x48e   :  { %3520 = vmatmul.msk.f32.vlgmr.msrb.gmra.mxu0 %vm2568_vm13, %v3169_v16  ;;  %3521 = vmatmul.msk.f32.vlgmr.msrb.gmra.mxu1 %vm2568_vm13, %v3197_v52 }
 0x503   :  { %v3136_v49 = vpop.f32.mrf.mxu0  ;;  %v3164_v56 = vpop.f32.mrf.mxu1 }
 0x504   :  { %v3139_v11 = vadd.f32 %v3136_v49, %v3111_v50 }
 0x506   :  { %v3167_v14 = vadd.f32 %v3164_v56, %v3139_v11 }
 0x50a   :  { %v3248_v34 = vpop.f32.mrf.mxu2 }
 0x50b   :  { %v3192_v51 = vpop.f32.mrf.mxu0  ;;  %v3220_v27 = vpop.f32.mrf.mxu1 }
 0x50c   :  { %v3195_v53 = vadd.f32 %v3192_v51, %v3167_v14 }
 0x50e   :  { %v3223_v63 = vadd.f32 %v3220_v27, %v3195_v53 }
 0x510   :  { %v3251_v57 = vadd.f32 %v3248_v34, %v3223_v63 }
 0x512   :  { %v3256_v1 = vadd.f32 %v3542_v0, %v3251_v57 }
 0x514   :  { %v3258_v54 = vsel %vm3257_vm1, %v3256_v1, -inf }
 0x515   :  { %3259 = vmax.xlane.f32.xlu0 %v3258_v54 }
 0x588   :  { %v3260_v10 = vpop.xlane.xlu0 %3259 }
 0x589   :  { %v3261_v2 = vsub.f32 %v3256_v1, %v3260_v10 }
 0x58b   :  { %v3262_v62 = vmul.f32 1.442695, %v3261_v2 }
 0x58d   :  { %3575 = vpow2.f32 %v3262_v62 }
 0x593   :  { %v3576_v7 = vpop.eup %3575 }
 0x594   :  { %v3264_v3 = vsel %vm3257_vm1, %v3576_v7, 0.0 }
 0x595   :  { %3265 = vadd.xlane.f32.xlu0 %v3264_v3 }
 0x608   :  { %v3266_v5 = vpop.xlane.xlu0 %3265 }
 0x609   :  { %3577 = vrcp.f32 %v3266_v5 }
 0x60f   :  { %v3578_v30 = vpop.eup %3577 }
 0x610   :  { %v3268_v59 = vmul.f32 %v3578_v30, %v3576_v7 }
 0x612   :  { %3269 = vst.msk [vmem:[#allocation13] sm:$0x3] %vm3257_vm1, %v3268_v59 }
 0x613   :  { %3280 = dma.vmem_to_hbm [thread:$0]  %s3276_s16, 32, %s3278_s0, [#allocation14]  }
 0x614   :  { %3603 = dma.done.wait [#allocation14], 32  }
 0x615   :  { %3604 = vsyncadd [#allocation14], 4294967264 }
 0x616   :  { %3285 = vsyncpa [#allocation14], 1 }

</bundles_post_ra>
